<compile_context>
chip_gen: v6e
topology: v6e:2x2x1
jax: 0.10.0
libtpu: 0.0.40
codegen_flags: <defaults>
</compile_context>

<pallas_src>
import functools

import numpy as np
import jax
import jax.numpy as jnp
from jax import lax
from jax.experimental import pallas as pl
from jax.experimental.pallas import tpu as pltpu

LEAKY_SLOPE = 0.2
BN_EPS = 1e-5
KH = KW = 4
PAD = 1


# ----------------------------- fused Pallas kernel -------------------------- #

def _disc_kernel(*refs, cfgs):
    """Whole 5-layer discriminator forward in a single kernel invocation."""
    out_ref = refs[-1]
    it = iter(refs[:-1])
    x_ref = next(it)                                   # [N, H1, W1*C1] bf16
    n_img = cfgs[0]['N']

    xs = [x_ref[n] for n in range(n_img)]              # per-image [H, W*Cin]

    for cfg in cfgs:
        p_ref = next(it)                               # [KH, OH, H]          bf16
        t_ref = next(it)                               # [KH, W*Cin, OW*Cout] bf16
        b_ref = next(it)                               # [1, L]               f32
        if cfg['pos'] == 'middle':
            bsum_ref = next(it)                        # [L, L]               f32
            g_ref = next(it)                           # [1, L]               f32
            be_ref = next(it)                          # [1, L]               f32

        oh, l = cfg['OH'], cfg['L']
        bias = b_ref[...]

        # ---- conv (bias fused), accumulator stays resident in f32 ---------- #
        ys = []
        for n in range(n_img):
            acc = jnp.zeros((oh, l), jnp.float32)
            for ki in range(KH):
                sel = jnp.dot(p_ref[ki], xs[n],
                              preferred_element_type=jnp.float32)
                acc = acc + jnp.dot(sel.astype(jnp.bfloat16), t_ref[ki],
                                    preferred_element_type=jnp.float32)
            ys.append(acc + bias)

        # ---- fused training-mode BatchNorm epilogue ------------------------ #
        if cfg['pos'] == 'middle':
            cnt = float(cfg['N'] * oh * cfg['OW'])
            rowsum = jnp.zeros((1, l), jnp.float32)
            sqsum = jnp.zeros((1, l), jnp.float32)
            for y_n in ys:
                rowsum = rowsum + jnp.sum(y_n, axis=0, keepdims=True)
                sqsum = sqsum + jnp.sum(y_n * y_n, axis=0, keepdims=True)
            bsum = bsum_ref[...]                       # sums the OW groups and
            mean = jnp.dot(rowsum, bsum,               # re-broadcasts per lane
                           preferred_element_type=jnp.float32) * (1.0 / cnt)
            ex2 = jnp.dot(sqsum, bsum,
                          preferred_element_type=jnp.float32) * (1.0 / cnt)
            inv = lax.rsqrt(ex2 - mean * mean + BN_EPS)
            scale = inv * g_ref[...]
            shift = be_ref[...] - mean * scale
            ys = [y_n * scale + shift for y_n in ys]

        if cfg['pos'] == 'last':
            for n in range(n_img):
                out_ref[n * oh:(n + 1) * oh, :] = \
                    jax.nn.sigmoid(ys[n]).astype(out_ref.dtype)
        else:
            # LeakyReLU of the *next* block, applied once on the raw activation
            # (not on 16x-expanded patches).
            xs = [jnp.where(y_n > 0, y_n, LEAKY_SLOPE * y_n).astype(jnp.bfloat16)
                  for y_n in ys]


# ----------------------- host-side operand construction --------------------- #

def make_layer_cfgs(params, n_img, height, width):
    cfgs = []
    h, w = height, width
    for p in params:
        kh, kw, cin, cout = p['w'].shape
        s = p['stride']
        oh = (h + 2 * PAD - kh) // s + 1
        ow = (w + 2 * PAD - kw) // s + 1
        cfgs.append(dict(cin=cin, cout=cout, stride=s, pos=p['pos'],
                         H=h, W=w, OH=oh, OW=ow, N=n_img, L=ow * cout))
        h, w = oh, ow
    return cfgs


def build_operands(params, cfgs):
    """Per layer: row-selection P, lane-Toeplitz T, tiled bias row, and (for
    middle layers) the BN channel-broadcast-sum matrix + tiled gamma/beta."""
    ops = []
    for p, cfg in zip(params, cfgs):
        w_hwio = np.asarray(p['w'], np.float32)        # [KH, KW, Cin, Cout]
        cin, cout, s = cfg['cin'], cfg['cout'], cfg['stride']
        h, w, oh, ow = cfg['H'], cfg['W'], cfg['OH'], cfg['OW']

        pmat = np.zeros((KH, oh, h), np.float32)
        for ki in range(KH):
            for o in range(oh):
                r = o * s - PAD + ki
                if 0 <= r < h:
                    pmat[ki, o, r] = 1.0

        tmat = np.zeros((KH, w * cin, ow * cout), np.float32)
        for ki in range(KH):
            for o in range(ow):
                for kj in range(KW):
                    col = o * s - PAD + kj
                    if 0 <= col < w:
                        tmat[ki, col * cin:(col + 1) * cin,
                             o * cout:(o + 1) * cout] = w_hwio[ki, kj]

        bias_row = np.tile(np.asarray(p['b'], np.float32), ow)[None, :]

        ops += [jnp.asarray(pmat, jnp.bfloat16),
                jnp.asarray(tmat, jnp.bfloat16),
                jnp.asarray(bias_row, jnp.float32)]

        if cfg['pos'] == 'middle':
            bsum = np.kron(np.ones((ow, ow), np.float32),
                           np.eye(cout, dtype=np.float32))
            gam = np.tile(np.asarray(p['gamma'], np.float32), ow)[None, :]
            bet = np.tile(np.asarray(p['beta'], np.float32), ow)[None, :]
            ops += [jnp.asarray(bsum, jnp.float32),
                    jnp.asarray(gam, jnp.float32),
                    jnp.asarray(bet, jnp.float32)]
    return ops


def _zero_map(ndim, i):
    return (0,) * ndim


def discriminator_forward(x_nchw, params):
    n_img, cin, height, width = x_nchw.shape
    cfgs = make_layer_cfgs(params, n_img, height, width)
    ops = build_operands(params, cfgs)

    # NCHW -> per-image row-image layout [N, H, W*C]; bf16 halves the only HBM read.
    x0 = jnp.transpose(x_nchw, (0, 2, 3, 1)).reshape(
        n_img, height, width * cin).astype(jnp.bfloat16)

    last = cfgs[-1]
    out_rows, out_cols = n_img * last['OH'], last['L']

    inputs = (x0, *ops)
    in_specs = [pl.BlockSpec(a.shape, functools.partial(_zero_map, a.ndim))
                for a in inputs]
    out_specs = pl.BlockSpec((out_rows, out_cols), lambda i: (0, 0))

    y2d = pl.pallas_call(
        functools.partial(_disc_kernel, cfgs=cfgs),
        grid=(1,),
        in_specs=in_specs,
        out_specs=out_specs,
        out_shape=jax.ShapeDtypeStruct((out_rows, out_cols), jnp.float32),
        compiler_params=pltpu.CompilerParams(
            dimension_semantics=("arbitrary",),
            vmem_limit_bytes=32 * 1024 * 1024),
    )(*inputs)

    return y2d.reshape(n_img, last['OH'], last['OW'], last['cout']) \
              .transpose(0, 3, 1, 2)                   # -> NCHW


# ------------------------------- init / reference --------------------------- #

def init_params(key, in_ch, out_ch, n_filt):
    cfg = [(in_ch + out_ch, n_filt,      2, 'first'),
           (n_filt,         n_filt * 2,  2, 'middle'),
           (n_filt * 2,     n_filt * 4,  2, 'middle'),
           (n_filt * 4,     n_filt * 8,  1, 'middle'),
           (n_filt * 8,     1,           1, 'last')]
    params = []
    for cin, cout, stride, pos in cfg:
        key, kw_, kb_ = jax.random.split(key, 3)
        bound = 1.0 / (cin * KH * KW) ** 0.5           # PyTorch conv default init
        w = jax.random.uniform(kw_, (KH, KW, cin, cout), jnp.float32, -bound, bound)
        b = jax.random.uniform(kb_, (cout,), jnp.float32, -bound, bound)
        p = {'w': w, 'b': b, 'stride': stride, 'pos': pos}
        if pos == 'middle':
            p['gamma'] = jnp.ones((cout,), jnp.float32)
            p['beta'] = jnp.zeros((cout,), jnp.float32)
        params.append(p)
    return params


def ref_forward(x_nchw, params):
    y = jnp.transpose(x_nchw, (0, 2, 3, 1))
    for p in params:
        if p['pos'] != 'first':
            y = jnp.where(y > 0, y, LEAKY_SLOPE * y)
        y = lax.conv_general_dilated(
            y, p['w'], (p['stride'], p['stride']), [(PAD, PAD), (PAD, PAD)],
            dimension_numbers=('NHWC', 'HWIO', 'NHWC'),
            precision=lax.Precision.HIGHEST) + p['b'].reshape(1, 1, 1, -1)
        if p['pos'] == 'middle':
            mean = jnp.mean(y, axis=(0, 1, 2), keepdims=True)
            var = jnp.mean((y - mean) ** 2, axis=(0, 1, 2), keepdims=True)
            y = (y - mean) * lax.rsqrt(var + BN_EPS) \
                * p['gamma'].reshape(1, 1, 1, -1) + p['beta'].reshape(1, 1, 1, -1)
        if p['pos'] == 'last':
            y = jax.nn.sigmoid(y)
    return jnp.transpose(y, (0, 3, 1, 2))


# ----------------------------------- main ----------------------------------- #

if __name__ == "__main__":
    in_ch, out_ch, n_filt = 2, 2, 8          # conv1 input channels = in_ch + out_ch = 4
    N, H, W = 2, 32, 32                      # 32 -> 16 -> 8 -> 4 -> 3 -> 2 spatial

    key = jax.random.PRNGKey(0)
    kx, kp = jax.random.split(key)
    x = jax.random.normal(kx, (N, in_ch + out_ch, H, W), dtype=jnp.float32)  # NCHW
    params = init_params(kp, in_ch, out_ch, n_filt)

    out = jax.block_until_ready(discriminator_forward(x, params))
    ref = jax.block_until_ready(ref_forward(x, params))

    assert out.shape == (N, 1, 2, 2), out.shape
    # Tolerance accounts for bf16 MXU operands (f32 accumulation) vs the f32
    # HIGHEST-precision reference, compounded over 5 layers.
    err = float(jnp.max(jnp.abs(out - ref)))
    assert err < 3e-2, f"max abs err {err}"

    print("KERNEL_OK")
</pallas_src>

<mosaic_0001>
module attributes {stable_mosaic.version = 11 : i64} {
  func.func @_disc_kernel(%arg0: i32, %arg1: memref<2x32x128xbf16, #tpu.memory_space<vmem>>, %arg2: memref<4x16x32xbf16, #tpu.memory_space<vmem>>, %arg3: memref<4x128x128xbf16, #tpu.memory_space<vmem>>, %arg4: memref<1x128xf32, #tpu.memory_space<vmem>>, %arg5: memref<4x8x16xbf16, #tpu.memory_space<vmem>>, %arg6: memref<4x128x128xbf16, #tpu.memory_space<vmem>>, %arg7: memref<1x128xf32, #tpu.memory_space<vmem>>, %arg8: memref<128x128xf32, #tpu.memory_space<vmem>>, %arg9: memref<1x128xf32, #tpu.memory_space<vmem>>, %arg10: memref<1x128xf32, #tpu.memory_space<vmem>>, %arg11: memref<4x4x8xbf16, #tpu.memory_space<vmem>>, %arg12: memref<4x128x128xbf16, #tpu.memory_space<vmem>>, %arg13: memref<1x128xf32, #tpu.memory_space<vmem>>, %arg14: memref<128x128xf32, #tpu.memory_space<vmem>>, %arg15: memref<1x128xf32, #tpu.memory_space<vmem>>, %arg16: memref<1x128xf32, #tpu.memory_space<vmem>>, %arg17: memref<4x3x4xbf16, #tpu.memory_space<vmem>>, %arg18: memref<4x128x192xbf16, #tpu.memory_space<vmem>>, %arg19: memref<1x192xf32, #tpu.memory_space<vmem>>, %arg20: memref<192x192xf32, #tpu.memory_space<vmem>>, %arg21: memref<1x192xf32, #tpu.memory_space<vmem>>, %arg22: memref<1x192xf32, #tpu.memory_space<vmem>>, %arg23: memref<4x2x3xbf16, #tpu.memory_space<vmem>>, %arg24: memref<4x192x2xbf16, #tpu.memory_space<vmem>>, %arg25: memref<1x2xf32, #tpu.memory_space<vmem>>, %arg26: memref<4x2xf32, #tpu.memory_space<vmem>>) attributes {dimension_semantics = [#tpu.dimension_semantics<arbitrary>], iteration_bounds = array<i64: 1>, scalar_prefetch = 0 : i64, scratch_operands = 0 : i64, tpu.core_type = #tpu.core_type<tc>, window_params = [{pipeline_mode = #tpu.pipeline_mode<synchronous>, transform_indices = @transform_0, window_bounds = array<i64: 2, 32, 128>}, {pipeline_mode = #tpu.pipeline_mode<synchronous>, transform_indices = @transform_1, window_bounds = array<i64: 4, 16, 32>}, {pipeline_mode = #tpu.pipeline_mode<synchronous>, transform_indices = @transform_2, window_bounds = array<i64: 4, 128, 128>}, {pipeline_mode = #tpu.pipeline_mode<synchronous>, transform_indices = @transform_3, window_bounds = array<i64: 1, 128>}, {pipeline_mode = #tpu.pipeline_mode<synchronous>, transform_indices = @transform_4, window_bounds = array<i64: 4, 8, 16>}, {pipeline_mode = #tpu.pipeline_mode<synchronous>, transform_indices = @transform_5, window_bounds = array<i64: 4, 128, 128>}, {pipeline_mode = #tpu.pipeline_mode<synchronous>, transform_indices = @transform_6, window_bounds = array<i64: 1, 128>}, {pipeline_mode = #tpu.pipeline_mode<synchronous>, transform_indices = @transform_7, window_bounds = array<i64: 128, 128>}, {pipeline_mode = #tpu.pipeline_mode<synchronous>, transform_indices = @transform_8, window_bounds = array<i64: 1, 128>}, {pipeline_mode = #tpu.pipeline_mode<synchronous>, transform_indices = @transform_9, window_bounds = array<i64: 1, 128>}, {pipeline_mode = #tpu.pipeline_mode<synchronous>, transform_indices = @transform_10, window_bounds = array<i64: 4, 4, 8>}, {pipeline_mode = #tpu.pipeline_mode<synchronous>, transform_indices = @transform_11, window_bounds = array<i64: 4, 128, 128>}, {pipeline_mode = #tpu.pipeline_mode<synchronous>, transform_indices = @transform_12, window_bounds = array<i64: 1, 128>}, {pipeline_mode = #tpu.pipeline_mode<synchronous>, transform_indices = @transform_13, window_bounds = array<i64: 128, 128>}, {pipeline_mode = #tpu.pipeline_mode<synchronous>, transform_indices = @transform_14, window_bounds = array<i64: 1, 128>}, {pipeline_mode = #tpu.pipeline_mode<synchronous>, transform_indices = @transform_15, window_bounds = array<i64: 1, 128>}, {pipeline_mode = #tpu.pipeline_mode<synchronous>, transform_indices = @transform_16, window_bounds = array<i64: 4, 3, 4>}, {pipeline_mode = #tpu.pipeline_mode<synchronous>, transform_indices = @transform_17, window_bounds = array<i64: 4, 128, 192>}, {pipeline_mode = #tpu.pipeline_mode<synchronous>, transform_indices = @transform_18, window_bounds = array<i64: 1, 192>}, {pipeline_mode = #tpu.pipeline_mode<synchronous>, transform_indices = @transform_19, window_bounds = array<i64: 192, 192>}, {pipeline_mode = #tpu.pipeline_mode<synchronous>, transform_indices = @transform_20, window_bounds = array<i64: 1, 192>}, {pipeline_mode = #tpu.pipeline_mode<synchronous>, transform_indices = @transform_21, window_bounds = array<i64: 1, 192>}, {pipeline_mode = #tpu.pipeline_mode<synchronous>, transform_indices = @transform_22, window_bounds = array<i64: 4, 2, 3>}, {pipeline_mode = #tpu.pipeline_mode<synchronous>, transform_indices = @transform_23, window_bounds = array<i64: 4, 192, 2>}, {pipeline_mode = #tpu.pipeline_mode<synchronous>, transform_indices = @transform_24, window_bounds = array<i64: 1, 2>}, {pipeline_mode = #tpu.pipeline_mode<synchronous>, transform_indices = @transform_25, window_bounds = array<i64: 4, 2>}]} {
    %c0 = arith.constant 0 : index
    %c0_0 = arith.constant 0 : index
    %c0_1 = arith.constant 0 : index
    %0 = vector.load %arg1[%c0, %c0_0, %c0_1] : memref<2x32x128xbf16, #tpu.memory_space<vmem>>, vector<1x32x128xbf16>
    %1 = vector.shape_cast %0 : vector<1x32x128xbf16> to vector<32x128xbf16>
    %c1 = arith.constant 1 : index
    %c0_2 = arith.constant 0 : index
    %c0_3 = arith.constant 0 : index
    %2 = vector.load %arg1[%c1, %c0_2, %c0_3] : memref<2x32x128xbf16, #tpu.memory_space<vmem>>, vector<1x32x128xbf16>
    %3 = vector.shape_cast %2 : vector<1x32x128xbf16> to vector<32x128xbf16>
    %c0_4 = arith.constant 0 : index
    %c0_5 = arith.constant 0 : index
    %4 = vector.load %arg4[%c0_4, %c0_5] : memref<1x128xf32, #tpu.memory_space<vmem>>, vector<1x128xf32>
    %cst = arith.constant 0.000000e+00 : f32
    %5 = vector.broadcast %cst : f32 to vector<16x128xf32>
    %c0_6 = arith.constant 0 : index
    %c0_7 = arith.constant 0 : index
    %c0_8 = arith.constant 0 : index
    %6 = vector.load %arg2[%c0_6, %c0_7, %c0_8] : memref<4x16x32xbf16, #tpu.memory_space<vmem>>, vector<1x16x32xbf16>
    %7 = vector.shape_cast %6 : vector<1x16x32xbf16> to vector<16x32xbf16>
    %cst_9 = arith.constant dense<0.000000e+00> : vector<16x128xf32>
    %8 = tpu.matmul %7, %1, %cst_9 {dimension_numbers = #tpu.dot_dimension_numbers<[1], [0], [0], [1], [0, 0, 1, 1], [], []>} : vector<16x32xbf16>, vector<32x128xbf16>, vector<16x128xf32> -> vector<16x128xf32>
    %9 = arith.truncf %8 : vector<16x128xf32> to vector<16x128xbf16>
    %c0_10 = arith.constant 0 : index
    %c0_11 = arith.constant 0 : index
    %c0_12 = arith.constant 0 : index
    %10 = vector.load %arg3[%c0_10, %c0_11, %c0_12] : memref<4x128x128xbf16, #tpu.memory_space<vmem>>, vector<1x128x128xbf16>
    %11 = vector.shape_cast %10 : vector<1x128x128xbf16> to vector<128x128xbf16>
    %cst_13 = arith.constant dense<0.000000e+00> : vector<16x128xf32>
    %12 = tpu.matmul %9, %11, %cst_13 {dimension_numbers = #tpu.dot_dimension_numbers<[1], [0], [0], [1], [0, 0, 1, 1], [], []>} : vector<16x128xbf16>, vector<128x128xbf16>, vector<16x128xf32> -> vector<16x128xf32>
    %13 = arith.addf %5, %12 : vector<16x128xf32>
    %c1_14 = arith.constant 1 : index
    %c0_15 = arith.constant 0 : index
    %c0_16 = arith.constant 0 : index
    %14 = vector.load %arg2[%c1_14, %c0_15, %c0_16] : memref<4x16x32xbf16, #tpu.memory_space<vmem>>, vector<1x16x32xbf16>
    %15 = vector.shape_cast %14 : vector<1x16x32xbf16> to vector<16x32xbf16>
    %cst_17 = arith.constant dense<0.000000e+00> : vector<16x128xf32>
    %16 = tpu.matmul %15, %1, %cst_17 {dimension_numbers = #tpu.dot_dimension_numbers<[1], [0], [0], [1], [0, 0, 1, 1], [], []>} : vector<16x32xbf16>, vector<32x128xbf16>, vector<16x128xf32> -> vector<16x128xf32>
    %17 = arith.truncf %16 : vector<16x128xf32> to vector<16x128xbf16>
    %c1_18 = arith.constant 1 : index
    %c0_19 = arith.constant 0 : index
    %c0_20 = arith.constant 0 : index
    %18 = vector.load %arg3[%c1_18, %c0_19, %c0_20] : memref<4x128x128xbf16, #tpu.memory_space<vmem>>, vector<1x128x128xbf16>
    %19 = vector.shape_cast %18 : vector<1x128x128xbf16> to vector<128x128xbf16>
    %cst_21 = arith.constant dense<0.000000e+00> : vector<16x128xf32>
    %20 = tpu.matmul %17, %19, %cst_21 {dimension_numbers = #tpu.dot_dimension_numbers<[1], [0], [0], [1], [0, 0, 1, 1], [], []>} : vector<16x128xbf16>, vector<128x128xbf16>, vector<16x128xf32> -> vector<16x128xf32>
    %21 = arith.addf %13, %20 : vector<16x128xf32>
    %c2 = arith.constant 2 : index
    %c0_22 = arith.constant 0 : index
    %c0_23 = arith.constant 0 : index
    %22 = vector.load %arg2[%c2, %c0_22, %c0_23] : memref<4x16x32xbf16, #tpu.memory_space<vmem>>, vector<1x16x32xbf16>
    %23 = vector.shape_cast %22 : vector<1x16x32xbf16> to vector<16x32xbf16>
    %cst_24 = arith.constant dense<0.000000e+00> : vector<16x128xf32>
    %24 = tpu.matmul %23, %1, %cst_24 {dimension_numbers = #tpu.dot_dimension_numbers<[1], [0], [0], [1], [0, 0, 1, 1], [], []>} : vector<16x32xbf16>, vector<32x128xbf16>, vector<16x128xf32> -> vector<16x128xf32>
    %25 = arith.truncf %24 : vector<16x128xf32> to vector<16x128xbf16>
    %c2_25 = arith.constant 2 : index
    %c0_26 = arith.constant 0 : index
    %c0_27 = arith.constant 0 : index
    %26 = vector.load %arg3[%c2_25, %c0_26, %c0_27] : memref<4x128x128xbf16, #tpu.memory_space<vmem>>, vector<1x128x128xbf16>
    %27 = vector.shape_cast %26 : vector<1x128x128xbf16> to vector<128x128xbf16>
    %cst_28 = arith.constant dense<0.000000e+00> : vector<16x128xf32>
    %28 = tpu.matmul %25, %27, %cst_28 {dimension_numbers = #tpu.dot_dimension_numbers<[1], [0], [0], [1], [0, 0, 1, 1], [], []>} : vector<16x128xbf16>, vector<128x128xbf16>, vector<16x128xf32> -> vector<16x128xf32>
    %29 = arith.addf %21, %28 : vector<16x128xf32>
    %c3 = arith.constant 3 : index
    %c0_29 = arith.constant 0 : index
    %c0_30 = arith.constant 0 : index
    %30 = vector.load %arg2[%c3, %c0_29, %c0_30] : memref<4x16x32xbf16, #tpu.memory_space<vmem>>, vector<1x16x32xbf16>
    %31 = vector.shape_cast %30 : vector<1x16x32xbf16> to vector<16x32xbf16>
    %cst_31 = arith.constant dense<0.000000e+00> : vector<16x128xf32>
    %32 = tpu.matmul %31, %1, %cst_31 {dimension_numbers = #tpu.dot_dimension_numbers<[1], [0], [0], [1], [0, 0, 1, 1], [], []>} : vector<16x32xbf16>, vector<32x128xbf16>, vector<16x128xf32> -> vector<16x128xf32>
    %33 = arith.truncf %32 : vector<16x128xf32> to vector<16x128xbf16>
    %c3_32 = arith.constant 3 : index
    %c0_33 = arith.constant 0 : index
    %c0_34 = arith.constant 0 : index
    %34 = vector.load %arg3[%c3_32, %c0_33, %c0_34] : memref<4x128x128xbf16, #tpu.memory_space<vmem>>, vector<1x128x128xbf16>
    %35 = vector.shape_cast %34 : vector<1x128x128xbf16> to vector<128x128xbf16>
    %cst_35 = arith.constant dense<0.000000e+00> : vector<16x128xf32>
    %36 = tpu.matmul %33, %35, %cst_35 {dimension_numbers = #tpu.dot_dimension_numbers<[1], [0], [0], [1], [0, 0, 1, 1], [], []>} : vector<16x128xbf16>, vector<128x128xbf16>, vector<16x128xf32> -> vector<16x128xf32>
    %37 = arith.addf %29, %36 : vector<16x128xf32>
    %38 = vector.broadcast %4 : vector<1x128xf32> to vector<16x128xf32>
    %39 = arith.addf %37, %38 : vector<16x128xf32>
    %cst_36 = arith.constant 0.000000e+00 : f32
    %40 = vector.broadcast %cst_36 : f32 to vector<16x128xf32>
    %c0_37 = arith.constant 0 : index
    %c0_38 = arith.constant 0 : index
    %c0_39 = arith.constant 0 : index
    %41 = vector.load %arg2[%c0_37, %c0_38, %c0_39] : memref<4x16x32xbf16, #tpu.memory_space<vmem>>, vector<1x16x32xbf16>
    %42 = vector.shape_cast %41 : vector<1x16x32xbf16> to vector<16x32xbf16>
    %cst_40 = arith.constant dense<0.000000e+00> : vector<16x128xf32>
    %43 = tpu.matmul %42, %3, %cst_40 {dimension_numbers = #tpu.dot_dimension_numbers<[1], [0], [0], [1], [0, 0, 1, 1], [], []>} : vector<16x32xbf16>, vector<32x128xbf16>, vector<16x128xf32> -> vector<16x128xf32>
    %44 = arith.truncf %43 : vector<16x128xf32> to vector<16x128xbf16>
    %c0_41 = arith.constant 0 : index
    %c0_42 = arith.constant 0 : index
    %c0_43 = arith.constant 0 : index
    %45 = vector.load %arg3[%c0_41, %c0_42, %c0_43] : memref<4x128x128xbf16, #tpu.memory_space<vmem>>, vector<1x128x128xbf16>
    %46 = vector.shape_cast %45 : vector<1x128x128xbf16> to vector<128x128xbf16>
    %cst_44 = arith.constant dense<0.000000e+00> : vector<16x128xf32>
    %47 = tpu.matmul %44, %46, %cst_44 {dimension_numbers = #tpu.dot_dimension_numbers<[1], [0], [0], [1], [0, 0, 1, 1], [], []>} : vector<16x128xbf16>, vector<128x128xbf16>, vector<16x128xf32> -> vector<16x128xf32>
    %48 = arith.addf %40, %47 : vector<16x128xf32>
    %c1_45 = arith.constant 1 : index
    %c0_46 = arith.constant 0 : index
    %c0_47 = arith.constant 0 : index
    %49 = vector.load %arg2[%c1_45, %c0_46, %c0_47] : memref<4x16x32xbf16, #tpu.memory_space<vmem>>, vector<1x16x32xbf16>
    %50 = vector.shape_cast %49 : vector<1x16x32xbf16> to vector<16x32xbf16>
    %cst_48 = arith.constant dense<0.000000e+00> : vector<16x128xf32>
    %51 = tpu.matmul %50, %3, %cst_48 {dimension_numbers = #tpu.dot_dimension_numbers<[1], [0], [0], [1], [0, 0, 1, 1], [], []>} : vector<16x32xbf16>, vector<32x128xbf16>, vector<16x128xf32> -> vector<16x128xf32>
    %52 = arith.truncf %51 : vector<16x128xf32> to vector<16x128xbf16>
    %c1_49 = arith.constant 1 : index
    %c0_50 = arith.constant 0 : index
    %c0_51 = arith.constant 0 : index
    %53 = vector.load %arg3[%c1_49, %c0_50, %c0_51] : memref<4x128x128xbf16, #tpu.memory_space<vmem>>, vector<1x128x128xbf16>
    %54 = vector.shape_cast %53 : vector<1x128x128xbf16> to vector<128x128xbf16>
    %cst_52 = arith.constant dense<0.000000e+00> : vector<16x128xf32>
    %55 = tpu.matmul %52, %54, %cst_52 {dimension_numbers = #tpu.dot_dimension_numbers<[1], [0], [0], [1], [0, 0, 1, 1], [], []>} : vector<16x128xbf16>, vector<128x128xbf16>, vector<16x128xf32> -> vector<16x128xf32>
    %56 = arith.addf %48, %55 : vector<16x128xf32>
    %c2_53 = arith.constant 2 : index
    %c0_54 = arith.constant 0 : index
    %c0_55 = arith.constant 0 : index
    %57 = vector.load %arg2[%c2_53, %c0_54, %c0_55] : memref<4x16x32xbf16, #tpu.memory_space<vmem>>, vector<1x16x32xbf16>
    %58 = vector.shape_cast %57 : vector<1x16x32xbf16> to vector<16x32xbf16>
    %cst_56 = arith.constant dense<0.000000e+00> : vector<16x128xf32>
    %59 = tpu.matmul %58, %3, %cst_56 {dimension_numbers = #tpu.dot_dimension_numbers<[1], [0], [0], [1], [0, 0, 1, 1], [], []>} : vector<16x32xbf16>, vector<32x128xbf16>, vector<16x128xf32> -> vector<16x128xf32>
    %60 = arith.truncf %59 : vector<16x128xf32> to vector<16x128xbf16>
    %c2_57 = arith.constant 2 : index
    %c0_58 = arith.constant 0 : index
    %c0_59 = arith.constant 0 : index
    %61 = vector.load %arg3[%c2_57, %c0_58, %c0_59] : memref<4x128x128xbf16, #tpu.memory_space<vmem>>, vector<1x128x128xbf16>
    %62 = vector.shape_cast %61 : vector<1x128x128xbf16> to vector<128x128xbf16>
    %cst_60 = arith.constant dense<0.000000e+00> : vector<16x128xf32>
    %63 = tpu.matmul %60, %62, %cst_60 {dimension_numbers = #tpu.dot_dimension_numbers<[1], [0], [0], [1], [0, 0, 1, 1], [], []>} : vector<16x128xbf16>, vector<128x128xbf16>, vector<16x128xf32> -> vector<16x128xf32>
    %64 = arith.addf %56, %63 : vector<16x128xf32>
    %c3_61 = arith.constant 3 : index
    %c0_62 = arith.constant 0 : index
    %c0_63 = arith.constant 0 : index
    %65 = vector.load %arg2[%c3_61, %c0_62, %c0_63] : memref<4x16x32xbf16, #tpu.memory_space<vmem>>, vector<1x16x32xbf16>
    %66 = vector.shape_cast %65 : vector<1x16x32xbf16> to vector<16x32xbf16>
    %cst_64 = arith.constant dense<0.000000e+00> : vector<16x128xf32>
    %67 = tpu.matmul %66, %3, %cst_64 {dimension_numbers = #tpu.dot_dimension_numbers<[1], [0], [0], [1], [0, 0, 1, 1], [], []>} : vector<16x32xbf16>, vector<32x128xbf16>, vector<16x128xf32> -> vector<16x128xf32>
    %68 = arith.truncf %67 : vector<16x128xf32> to vector<16x128xbf16>
    %c3_65 = arith.constant 3 : index
    %c0_66 = arith.constant 0 : index
    %c0_67 = arith.constant 0 : index
    %69 = vector.load %arg3[%c3_65, %c0_66, %c0_67] : memref<4x128x128xbf16, #tpu.memory_space<vmem>>, vector<1x128x128xbf16>
    %70 = vector.shape_cast %69 : vector<1x128x128xbf16> to vector<128x128xbf16>
    %cst_68 = arith.constant dense<0.000000e+00> : vector<16x128xf32>
    %71 = tpu.matmul %68, %70, %cst_68 {dimension_numbers = #tpu.dot_dimension_numbers<[1], [0], [0], [1], [0, 0, 1, 1], [], []>} : vector<16x128xbf16>, vector<128x128xbf16>, vector<16x128xf32> -> vector<16x128xf32>
    %72 = arith.addf %64, %71 : vector<16x128xf32>
    %73 = vector.broadcast %4 : vector<1x128xf32> to vector<16x128xf32>
    %74 = arith.addf %72, %73 : vector<16x128xf32>
    %cst_69 = arith.constant 0.000000e+00 : f32
    %75 = vector.broadcast %cst_69 : f32 to vector<16x128xf32>
    %76 = arith.cmpf ogt, %39, %75 : vector<16x128xf32>
    %cst_70 = arith.constant 2.000000e-01 : f32
    %77 = vector.broadcast %cst_70 : f32 to vector<16x128xf32>
    %78 = arith.mulf %77, %39 : vector<16x128xf32>
    %79 = arith.select %76, %39, %78 : vector<16x128xi1>, vector<16x128xf32>
    %80 = arith.truncf %79 : vector<16x128xf32> to vector<16x128xbf16>
    %cst_71 = arith.constant 0.000000e+00 : f32
    %81 = vector.broadcast %cst_71 : f32 to vector<16x128xf32>
    %82 = arith.cmpf ogt, %74, %81 : vector<16x128xf32>
    %cst_72 = arith.constant 2.000000e-01 : f32
    %83 = vector.broadcast %cst_72 : f32 to vector<16x128xf32>
    %84 = arith.mulf %83, %74 : vector<16x128xf32>
    %85 = arith.select %82, %74, %84 : vector<16x128xi1>, vector<16x128xf32>
    %86 = arith.truncf %85 : vector<16x128xf32> to vector<16x128xbf16>
    %c0_73 = arith.constant 0 : index
    %c0_74 = arith.constant 0 : index
    %87 = vector.load %arg7[%c0_73, %c0_74] : memref<1x128xf32, #tpu.memory_space<vmem>>, vector<1x128xf32>
    %cst_75 = arith.constant 0.000000e+00 : f32
    %88 = vector.broadcast %cst_75 : f32 to vector<8x128xf32>
    %c0_76 = arith.constant 0 : index
    %c0_77 = arith.constant 0 : index
    %c0_78 = arith.constant 0 : index
    %89 = vector.load %arg5[%c0_76, %c0_77, %c0_78] : memref<4x8x16xbf16, #tpu.memory_space<vmem>>, vector<1x8x16xbf16>
    %90 = vector.shape_cast %89 : vector<1x8x16xbf16> to vector<8x16xbf16>
    %cst_79 = arith.constant dense<0.000000e+00> : vector<8x128xf32>
    %91 = tpu.matmul %90, %80, %cst_79 {dimension_numbers = #tpu.dot_dimension_numbers<[1], [0], [0], [1], [0, 0, 1, 1], [], []>} : vector<8x16xbf16>, vector<16x128xbf16>, vector<8x128xf32> -> vector<8x128xf32>
    %92 = arith.truncf %91 : vector<8x128xf32> to vector<8x128xbf16>
    %c0_80 = arith.constant 0 : index
    %c0_81 = arith.constant 0 : index
    %c0_82 = arith.constant 0 : index
    %93 = vector.load %arg6[%c0_80, %c0_81, %c0_82] : memref<4x128x128xbf16, #tpu.memory_space<vmem>>, vector<1x128x128xbf16>
    %94 = vector.shape_cast %93 : vector<1x128x128xbf16> to vector<128x128xbf16>
    %cst_83 = arith.constant dense<0.000000e+00> : vector<8x128xf32>
    %95 = tpu.matmul %92, %94, %cst_83 {dimension_numbers = #tpu.dot_dimension_numbers<[1], [0], [0], [1], [0, 0, 1, 1], [], []>} : vector<8x128xbf16>, vector<128x128xbf16>, vector<8x128xf32> -> vector<8x128xf32>
    %96 = arith.addf %88, %95 : vector<8x128xf32>
    %c1_84 = arith.constant 1 : index
    %c0_85 = arith.constant 0 : index
    %c0_86 = arith.constant 0 : index
    %97 = vector.load %arg5[%c1_84, %c0_85, %c0_86] : memref<4x8x16xbf16, #tpu.memory_space<vmem>>, vector<1x8x16xbf16>
    %98 = vector.shape_cast %97 : vector<1x8x16xbf16> to vector<8x16xbf16>
    %cst_87 = arith.constant dense<0.000000e+00> : vector<8x128xf32>
    %99 = tpu.matmul %98, %80, %cst_87 {dimension_numbers = #tpu.dot_dimension_numbers<[1], [0], [0], [1], [0, 0, 1, 1], [], []>} : vector<8x16xbf16>, vector<16x128xbf16>, vector<8x128xf32> -> vector<8x128xf32>
    %100 = arith.truncf %99 : vector<8x128xf32> to vector<8x128xbf16>
    %c1_88 = arith.constant 1 : index
    %c0_89 = arith.constant 0 : index
    %c0_90 = arith.constant 0 : index
    %101 = vector.load %arg6[%c1_88, %c0_89, %c0_90] : memref<4x128x128xbf16, #tpu.memory_space<vmem>>, vector<1x128x128xbf16>
    %102 = vector.shape_cast %101 : vector<1x128x128xbf16> to vector<128x128xbf16>
    %cst_91 = arith.constant dense<0.000000e+00> : vector<8x128xf32>
    %103 = tpu.matmul %100, %102, %cst_91 {dimension_numbers = #tpu.dot_dimension_numbers<[1], [0], [0], [1], [0, 0, 1, 1], [], []>} : vector<8x128xbf16>, vector<128x128xbf16>, vector<8x128xf32> -> vector<8x128xf32>
    %104 = arith.addf %96, %103 : vector<8x128xf32>
    %c2_92 = arith.constant 2 : index
    %c0_93 = arith.constant 0 : index
    %c0_94 = arith.constant 0 : index
    %105 = vector.load %arg5[%c2_92, %c0_93, %c0_94] : memref<4x8x16xbf16, #tpu.memory_space<vmem>>, vector<1x8x16xbf16>
    %106 = vector.shape_cast %105 : vector<1x8x16xbf16> to vector<8x16xbf16>
    %cst_95 = arith.constant dense<0.000000e+00> : vector<8x128xf32>
    %107 = tpu.matmul %106, %80, %cst_95 {dimension_numbers = #tpu.dot_dimension_numbers<[1], [0], [0], [1], [0, 0, 1, 1], [], []>} : vector<8x16xbf16>, vector<16x128xbf16>, vector<8x128xf32> -> vector<8x128xf32>
    %108 = arith.truncf %107 : vector<8x128xf32> to vector<8x128xbf16>
    %c2_96 = arith.constant 2 : index
    %c0_97 = arith.constant 0 : index
    %c0_98 = arith.constant 0 : index
    %109 = vector.load %arg6[%c2_96, %c0_97, %c0_98] : memref<4x128x128xbf16, #tpu.memory_space<vmem>>, vector<1x128x128xbf16>
    %110 = vector.shape_cast %109 : vector<1x128x128xbf16> to vector<128x128xbf16>
    %cst_99 = arith.constant dense<0.000000e+00> : vector<8x128xf32>
    %111 = tpu.matmul %108, %110, %cst_99 {dimension_numbers = #tpu.dot_dimension_numbers<[1], [0], [0], [1], [0, 0, 1, 1], [], []>} : vector<8x128xbf16>, vector<128x128xbf16>, vector<8x128xf32> -> vector<8x128xf32>
    %112 = arith.addf %104, %111 : vector<8x128xf32>
    %c3_100 = arith.constant 3 : index
    %c0_101 = arith.constant 0 : index
    %c0_102 = arith.constant 0 : index
    %113 = vector.load %arg5[%c3_100, %c0_101, %c0_102] : memref<4x8x16xbf16, #tpu.memory_space<vmem>>, vector<1x8x16xbf16>
    %114 = vector.shape_cast %113 : vector<1x8x16xbf16> to vector<8x16xbf16>
    %cst_103 = arith.constant dense<0.000000e+00> : vector<8x128xf32>
    %115 = tpu.matmul %114, %80, %cst_103 {dimension_numbers = #tpu.dot_dimension_numbers<[1], [0], [0], [1], [0, 0, 1, 1], [], []>} : vector<8x16xbf16>, vector<16x128xbf16>, vector<8x128xf32> -> vector<8x128xf32>
    %116 = arith.truncf %115 : vector<8x128xf32> to vector<8x128xbf16>
    %c3_104 = arith.constant 3 : index
    %c0_105 = arith.constant 0 : index
    %c0_106 = arith.constant 0 : index
    %117 = vector.load %arg6[%c3_104, %c0_105, %c0_106] : memref<4x128x128xbf16, #tpu.memory_space<vmem>>, vector<1x128x128xbf16>
    %118 = vector.shape_cast %117 : vector<1x128x128xbf16> to vector<128x128xbf16>
    %cst_107 = arith.constant dense<0.000000e+00> : vector<8x128xf32>
    %119 = tpu.matmul %116, %118, %cst_107 {dimension_numbers = #tpu.dot_dimension_numbers<[1], [0], [0], [1], [0, 0, 1, 1], [], []>} : vector<8x128xbf16>, vector<128x128xbf16>, vector<8x128xf32> -> vector<8x128xf32>
    %120 = arith.addf %112, %119 : vector<8x128xf32>
    %121 = vector.broadcast %87 : vector<1x128xf32> to vector<8x128xf32>
    %122 = arith.addf %120, %121 : vector<8x128xf32>
    %cst_108 = arith.constant 0.000000e+00 : f32
    %123 = vector.broadcast %cst_108 : f32 to vector<8x128xf32>
    %c0_109 = arith.constant 0 : index
    %c0_110 = arith.constant 0 : index
    %c0_111 = arith.constant 0 : index
    %124 = vector.load %arg5[%c0_109, %c0_110, %c0_111] : memref<4x8x16xbf16, #tpu.memory_space<vmem>>, vector<1x8x16xbf16>
    %125 = vector.shape_cast %124 : vector<1x8x16xbf16> to vector<8x16xbf16>
    %cst_112 = arith.constant dense<0.000000e+00> : vector<8x128xf32>
    %126 = tpu.matmul %125, %86, %cst_112 {dimension_numbers = #tpu.dot_dimension_numbers<[1], [0], [0], [1], [0, 0, 1, 1], [], []>} : vector<8x16xbf16>, vector<16x128xbf16>, vector<8x128xf32> -> vector<8x128xf32>
    %127 = arith.truncf %126 : vector<8x128xf32> to vector<8x128xbf16>
    %c0_113 = arith.constant 0 : index
    %c0_114 = arith.constant 0 : index
    %c0_115 = arith.constant 0 : index
    %128 = vector.load %arg6[%c0_113, %c0_114, %c0_115] : memref<4x128x128xbf16, #tpu.memory_space<vmem>>, vector<1x128x128xbf16>
    %129 = vector.shape_cast %128 : vector<1x128x128xbf16> to vector<128x128xbf16>
    %cst_116 = arith.constant dense<0.000000e+00> : vector<8x128xf32>
    %130 = tpu.matmul %127, %129, %cst_116 {dimension_numbers = #tpu.dot_dimension_numbers<[1], [0], [0], [1], [0, 0, 1, 1], [], []>} : vector<8x128xbf16>, vector<128x128xbf16>, vector<8x128xf32> -> vector<8x128xf32>
    %131 = arith.addf %123, %130 : vector<8x128xf32>
    %c1_117 = arith.constant 1 : index
    %c0_118 = arith.constant 0 : index
    %c0_119 = arith.constant 0 : index
    %132 = vector.load %arg5[%c1_117, %c0_118, %c0_119] : memref<4x8x16xbf16, #tpu.memory_space<vmem>>, vector<1x8x16xbf16>
    %133 = vector.shape_cast %132 : vector<1x8x16xbf16> to vector<8x16xbf16>
    %cst_120 = arith.constant dense<0.000000e+00> : vector<8x128xf32>
    %134 = tpu.matmul %133, %86, %cst_120 {dimension_numbers = #tpu.dot_dimension_numbers<[1], [0], [0], [1], [0, 0, 1, 1], [], []>} : vector<8x16xbf16>, vector<16x128xbf16>, vector<8x128xf32> -> vector<8x128xf32>
    %135 = arith.truncf %134 : vector<8x128xf32> to vector<8x128xbf16>
    %c1_121 = arith.constant 1 : index
    %c0_122 = arith.constant 0 : index
    %c0_123 = arith.constant 0 : index
    %136 = vector.load %arg6[%c1_121, %c0_122, %c0_123] : memref<4x128x128xbf16, #tpu.memory_space<vmem>>, vector<1x128x128xbf16>
    %137 = vector.shape_cast %136 : vector<1x128x128xbf16> to vector<128x128xbf16>
    %cst_124 = arith.constant dense<0.000000e+00> : vector<8x128xf32>
    %138 = tpu.matmul %135, %137, %cst_124 {dimension_numbers = #tpu.dot_dimension_numbers<[1], [0], [0], [1], [0, 0, 1, 1], [], []>} : vector<8x128xbf16>, vector<128x128xbf16>, vector<8x128xf32> -> vector<8x128xf32>
    %139 = arith.addf %131, %138 : vector<8x128xf32>
    %c2_125 = arith.constant 2 : index
    %c0_126 = arith.constant 0 : index
    %c0_127 = arith.constant 0 : index
    %140 = vector.load %arg5[%c2_125, %c0_126, %c0_127] : memref<4x8x16xbf16, #tpu.memory_space<vmem>>, vector<1x8x16xbf16>
    %141 = vector.shape_cast %140 : vector<1x8x16xbf16> to vector<8x16xbf16>
    %cst_128 = arith.constant dense<0.000000e+00> : vector<8x128xf32>
    %142 = tpu.matmul %141, %86, %cst_128 {dimension_numbers = #tpu.dot_dimension_numbers<[1], [0], [0], [1], [0, 0, 1, 1], [], []>} : vector<8x16xbf16>, vector<16x128xbf16>, vector<8x128xf32> -> vector<8x128xf32>
    %143 = arith.truncf %142 : vector<8x128xf32> to vector<8x128xbf16>
    %c2_129 = arith.constant 2 : index
    %c0_130 = arith.constant 0 : index
    %c0_131 = arith.constant 0 : index
    %144 = vector.load %arg6[%c2_129, %c0_130, %c0_131] : memref<4x128x128xbf16, #tpu.memory_space<vmem>>, vector<1x128x128xbf16>
    %145 = vector.shape_cast %144 : vector<1x128x128xbf16> to vector<128x128xbf16>
    %cst_132 = arith.constant dense<0.000000e+00> : vector<8x128xf32>
    %146 = tpu.matmul %143, %145, %cst_132 {dimension_numbers = #tpu.dot_dimension_numbers<[1], [0], [0], [1], [0, 0, 1, 1], [], []>} : vector<8x128xbf16>, vector<128x128xbf16>, vector<8x128xf32> -> vector<8x128xf32>
    %147 = arith.addf %139, %146 : vector<8x128xf32>
    %c3_133 = arith.constant 3 : index
    %c0_134 = arith.constant 0 : index
    %c0_135 = arith.constant 0 : index
    %148 = vector.load %arg5[%c3_133, %c0_134, %c0_135] : memref<4x8x16xbf16, #tpu.memory_space<vmem>>, vector<1x8x16xbf16>
    %149 = vector.shape_cast %148 : vector<1x8x16xbf16> to vector<8x16xbf16>
    %cst_136 = arith.constant dense<0.000000e+00> : vector<8x128xf32>
    %150 = tpu.matmul %149, %86, %cst_136 {dimension_numbers = #tpu.dot_dimension_numbers<[1], [0], [0], [1], [0, 0, 1, 1], [], []>} : vector<8x16xbf16>, vector<16x128xbf16>, vector<8x128xf32> -> vector<8x128xf32>
    %151 = arith.truncf %150 : vector<8x128xf32> to vector<8x128xbf16>
    %c3_137 = arith.constant 3 : index
    %c0_138 = arith.constant 0 : index
    %c0_139 = arith.constant 0 : index
    %152 = vector.load %arg6[%c3_137, %c0_138, %c0_139] : memref<4x128x128xbf16, #tpu.memory_space<vmem>>, vector<1x128x128xbf16>
    %153 = vector.shape_cast %152 : vector<1x128x128xbf16> to vector<128x128xbf16>
    %cst_140 = arith.constant dense<0.000000e+00> : vector<8x128xf32>
    %154 = tpu.matmul %151, %153, %cst_140 {dimension_numbers = #tpu.dot_dimension_numbers<[1], [0], [0], [1], [0, 0, 1, 1], [], []>} : vector<8x128xbf16>, vector<128x128xbf16>, vector<8x128xf32> -> vector<8x128xf32>
    %155 = arith.addf %147, %154 : vector<8x128xf32>
    %156 = vector.broadcast %87 : vector<1x128xf32> to vector<8x128xf32>
    %157 = arith.addf %155, %156 : vector<8x128xf32>
    %cst_141 = arith.constant 0.000000e+00 : f32
    %158 = vector.broadcast %cst_141 : f32 to vector<1x128xf32>
    %cst_142 = arith.constant 0.000000e+00 : f32
    %159 = vector.broadcast %cst_142 : f32 to vector<1x128xf32>
    %cst_143 = arith.constant dense<0.000000e+00> : vector<128xf32>
    %160 = vector.multi_reduction <add>, %122, %cst_143 [0] : vector<8x128xf32> to vector<128xf32>
    %161 = vector.shape_cast %160 : vector<128xf32> to vector<1x128xf32>
    %162 = arith.addf %158, %161 : vector<1x128xf32>
    %163 = arith.mulf %122, %122 : vector<8x128xf32>
    %cst_144 = arith.constant dense<0.000000e+00> : vector<128xf32>
    %164 = vector.multi_reduction <add>, %163, %cst_144 [0] : vector<8x128xf32> to vector<128xf32>
    %165 = vector.shape_cast %164 : vector<128xf32> to vector<1x128xf32>
    %166 = arith.addf %159, %165 : vector<1x128xf32>
    %cst_145 = arith.constant dense<0.000000e+00> : vector<128xf32>
    %167 = vector.multi_reduction <add>, %157, %cst_145 [0] : vector<8x128xf32> to vector<128xf32>
    %168 = vector.shape_cast %167 : vector<128xf32> to vector<1x128xf32>
    %169 = arith.addf %162, %168 : vector<1x128xf32>
    %170 = arith.mulf %157, %157 : vector<8x128xf32>
    %cst_146 = arith.constant dense<0.000000e+00> : vector<128xf32>
    %171 = vector.multi_reduction <add>, %170, %cst_146 [0] : vector<8x128xf32> to vector<128xf32>
    %172 = vector.shape_cast %171 : vector<128xf32> to vector<1x128xf32>
    %173 = arith.addf %166, %172 : vector<1x128xf32>
    %c0_147 = arith.constant 0 : index
    %c0_148 = arith.constant 0 : index
    %174 = vector.load %arg8[%c0_147, %c0_148] : memref<128x128xf32, #tpu.memory_space<vmem>>, vector<128x128xf32>
    %cst_149 = arith.constant dense<0.000000e+00> : vector<1x128xf32>
    %175 = tpu.matmul %169, %174, %cst_149 {dimension_numbers = #tpu.dot_dimension_numbers<[1], [0], [0], [1], [0, 0, 1, 1], [], []>} : vector<1x128xf32>, vector<128x128xf32>, vector<1x128xf32> -> vector<1x128xf32>
    %cst_150 = arith.constant 7.812500e-03 : f32
    %176 = vector.broadcast %cst_150 : f32 to vector<1x128xf32>
    %177 = arith.mulf %175, %176 : vector<1x128xf32>
    %cst_151 = arith.constant dense<0.000000e+00> : vector<1x128xf32>
    %178 = tpu.matmul %173, %174, %cst_151 {dimension_numbers = #tpu.dot_dimension_numbers<[1], [0], [0], [1], [0, 0, 1, 1], [], []>} : vector<1x128xf32>, vector<128x128xf32>, vector<1x128xf32> -> vector<1x128xf32>
    %cst_152 = arith.constant 7.812500e-03 : f32
    %179 = vector.broadcast %cst_152 : f32 to vector<1x128xf32>
    %180 = arith.mulf %178, %179 : vector<1x128xf32>
    %181 = arith.mulf %177, %177 : vector<1x128xf32>
    %182 = arith.subf %180, %181 : vector<1x128xf32>
    %cst_153 = arith.constant 9.99999974E-6 : f32
    %183 = vector.broadcast %cst_153 : f32 to vector<1x128xf32>
    %184 = arith.addf %182, %183 : vector<1x128xf32>
    %185 = math.rsqrt %184 : vector<1x128xf32>
    %c0_154 = arith.constant 0 : index
    %c0_155 = arith.constant 0 : index
    %186 = vector.load %arg9[%c0_154, %c0_155] : memref<1x128xf32, #tpu.memory_space<vmem>>, vector<1x128xf32>
    %187 = arith.mulf %185, %186 : vector<1x128xf32>
    %c0_156 = arith.constant 0 : index
    %c0_157 = arith.constant 0 : index
    %188 = vector.load %arg10[%c0_156, %c0_157] : memref<1x128xf32, #tpu.memory_space<vmem>>, vector<1x128xf32>
    %189 = arith.mulf %177, %187 : vector<1x128xf32>
    %190 = arith.subf %188, %189 : vector<1x128xf32>
    %191 = vector.broadcast %187 : vector<1x128xf32> to vector<8x128xf32>
    %192 = arith.mulf %122, %191 : vector<8x128xf32>
    %193 = vector.broadcast %190 : vector<1x128xf32> to vector<8x128xf32>
    %194 = arith.addf %192, %193 : vector<8x128xf32>
    %195 = vector.broadcast %187 : vector<1x128xf32> to vector<8x128xf32>
    %196 = arith.mulf %157, %195 : vector<8x128xf32>
    %197 = vector.broadcast %190 : vector<1x128xf32> to vector<8x128xf32>
    %198 = arith.addf %196, %197 : vector<8x128xf32>
    %cst_158 = arith.constant 0.000000e+00 : f32
    %199 = vector.broadcast %cst_158 : f32 to vector<8x128xf32>
    %200 = arith.cmpf ogt, %194, %199 : vector<8x128xf32>
    %cst_159 = arith.constant 2.000000e-01 : f32
    %201 = vector.broadcast %cst_159 : f32 to vector<8x128xf32>
    %202 = arith.mulf %201, %194 : vector<8x128xf32>
    %203 = arith.select %200, %194, %202 : vector<8x128xi1>, vector<8x128xf32>
    %204 = arith.truncf %203 : vector<8x128xf32> to vector<8x128xbf16>
    %cst_160 = arith.constant 0.000000e+00 : f32
    %205 = vector.broadcast %cst_160 : f32 to vector<8x128xf32>
    %206 = arith.cmpf ogt, %198, %205 : vector<8x128xf32>
    %cst_161 = arith.constant 2.000000e-01 : f32
    %207 = vector.broadcast %cst_161 : f32 to vector<8x128xf32>
    %208 = arith.mulf %207, %198 : vector<8x128xf32>
    %209 = arith.select %206, %198, %208 : vector<8x128xi1>, vector<8x128xf32>
    %210 = arith.truncf %209 : vector<8x128xf32> to vector<8x128xbf16>
    %c0_162 = arith.constant 0 : index
    %c0_163 = arith.constant 0 : index
    %211 = vector.load %arg13[%c0_162, %c0_163] : memref<1x128xf32, #tpu.memory_space<vmem>>, vector<1x128xf32>
    %cst_164 = arith.constant 0.000000e+00 : f32
    %212 = vector.broadcast %cst_164 : f32 to vector<4x128xf32>
    %c0_165 = arith.constant 0 : index
    %c0_166 = arith.constant 0 : index
    %c0_167 = arith.constant 0 : index
    %213 = vector.load %arg11[%c0_165, %c0_166, %c0_167] : memref<4x4x8xbf16, #tpu.memory_space<vmem>>, vector<1x4x8xbf16>
    %214 = vector.shape_cast %213 : vector<1x4x8xbf16> to vector<4x8xbf16>
    %cst_168 = arith.constant dense<0.000000e+00> : vector<4x128xf32>
    %215 = tpu.matmul %214, %204, %cst_168 {dimension_numbers = #tpu.dot_dimension_numbers<[1], [0], [0], [1], [0, 0, 1, 1], [], []>} : vector<4x8xbf16>, vector<8x128xbf16>, vector<4x128xf32> -> vector<4x128xf32>
    %216 = arith.truncf %215 : vector<4x128xf32> to vector<4x128xbf16>
    %c0_169 = arith.constant 0 : index
    %c0_170 = arith.constant 0 : index
    %c0_171 = arith.constant 0 : index
    %217 = vector.load %arg12[%c0_169, %c0_170, %c0_171] : memref<4x128x128xbf16, #tpu.memory_space<vmem>>, vector<1x128x128xbf16>
    %218 = vector.shape_cast %217 : vector<1x128x128xbf16> to vector<128x128xbf16>
    %cst_172 = arith.constant dense<0.000000e+00> : vector<4x128xf32>
    %219 = tpu.matmul %216, %218, %cst_172 {dimension_numbers = #tpu.dot_dimension_numbers<[1], [0], [0], [1], [0, 0, 1, 1], [], []>} : vector<4x128xbf16>, vector<128x128xbf16>, vector<4x128xf32> -> vector<4x128xf32>
    %220 = arith.addf %212, %219 : vector<4x128xf32>
    %c1_173 = arith.constant 1 : index
    %c0_174 = arith.constant 0 : index
    %c0_175 = arith.constant 0 : index
    %221 = vector.load %arg11[%c1_173, %c0_174, %c0_175] : memref<4x4x8xbf16, #tpu.memory_space<vmem>>, vector<1x4x8xbf16>
    %222 = vector.shape_cast %221 : vector<1x4x8xbf16> to vector<4x8xbf16>
    %cst_176 = arith.constant dense<0.000000e+00> : vector<4x128xf32>
    %223 = tpu.matmul %222, %204, %cst_176 {dimension_numbers = #tpu.dot_dimension_numbers<[1], [0], [0], [1], [0, 0, 1, 1], [], []>} : vector<4x8xbf16>, vector<8x128xbf16>, vector<4x128xf32> -> vector<4x128xf32>
    %224 = arith.truncf %223 : vector<4x128xf32> to vector<4x128xbf16>
    %c1_177 = arith.constant 1 : index
    %c0_178 = arith.constant 0 : index
    %c0_179 = arith.constant 0 : index
    %225 = vector.load %arg12[%c1_177, %c0_178, %c0_179] : memref<4x128x128xbf16, #tpu.memory_space<vmem>>, vector<1x128x128xbf16>
    %226 = vector.shape_cast %225 : vector<1x128x128xbf16> to vector<128x128xbf16>
    %cst_180 = arith.constant dense<0.000000e+00> : vector<4x128xf32>
    %227 = tpu.matmul %224, %226, %cst_180 {dimension_numbers = #tpu.dot_dimension_numbers<[1], [0], [0], [1], [0, 0, 1, 1], [], []>} : vector<4x128xbf16>, vector<128x128xbf16>, vector<4x128xf32> -> vector<4x128xf32>
    %228 = arith.addf %220, %227 : vector<4x128xf32>
    %c2_181 = arith.constant 2 : index
    %c0_182 = arith.constant 0 : index
    %c0_183 = arith.constant 0 : index
    %229 = vector.load %arg11[%c2_181, %c0_182, %c0_183] : memref<4x4x8xbf16, #tpu.memory_space<vmem>>, vector<1x4x8xbf16>
    %230 = vector.shape_cast %229 : vector<1x4x8xbf16> to vector<4x8xbf16>
    %cst_184 = arith.constant dense<0.000000e+00> : vector<4x128xf32>
    %231 = tpu.matmul %230, %204, %cst_184 {dimension_numbers = #tpu.dot_dimension_numbers<[1], [0], [0], [1], [0, 0, 1, 1], [], []>} : vector<4x8xbf16>, vector<8x128xbf16>, vector<4x128xf32> -> vector<4x128xf32>
    %232 = arith.truncf %231 : vector<4x128xf32> to vector<4x128xbf16>
    %c2_185 = arith.constant 2 : index
    %c0_186 = arith.constant 0 : index
    %c0_187 = arith.constant 0 : index
    %233 = vector.load %arg12[%c2_185, %c0_186, %c0_187] : memref<4x128x128xbf16, #tpu.memory_space<vmem>>, vector<1x128x128xbf16>
    %234 = vector.shape_cast %233 : vector<1x128x128xbf16> to vector<128x128xbf16>
    %cst_188 = arith.constant dense<0.000000e+00> : vector<4x128xf32>
    %235 = tpu.matmul %232, %234, %cst_188 {dimension_numbers = #tpu.dot_dimension_numbers<[1], [0], [0], [1], [0, 0, 1, 1], [], []>} : vector<4x128xbf16>, vector<128x128xbf16>, vector<4x128xf32> -> vector<4x128xf32>
    %236 = arith.addf %228, %235 : vector<4x128xf32>
    %c3_189 = arith.constant 3 : index
    %c0_190 = arith.constant 0 : index
    %c0_191 = arith.constant 0 : index
    %237 = vector.load %arg11[%c3_189, %c0_190, %c0_191] : memref<4x4x8xbf16, #tpu.memory_space<vmem>>, vector<1x4x8xbf16>
    %238 = vector.shape_cast %237 : vector<1x4x8xbf16> to vector<4x8xbf16>
    %cst_192 = arith.constant dense<0.000000e+00> : vector<4x128xf32>
    %239 = tpu.matmul %238, %204, %cst_192 {dimension_numbers = #tpu.dot_dimension_numbers<[1], [0], [0], [1], [0, 0, 1, 1], [], []>} : vector<4x8xbf16>, vector<8x128xbf16>, vector<4x128xf32> -> vector<4x128xf32>
    %240 = arith.truncf %239 : vector<4x128xf32> to vector<4x128xbf16>
    %c3_193 = arith.constant 3 : index
    %c0_194 = arith.constant 0 : index
    %c0_195 = arith.constant 0 : index
    %241 = vector.load %arg12[%c3_193, %c0_194, %c0_195] : memref<4x128x128xbf16, #tpu.memory_space<vmem>>, vector<1x128x128xbf16>
    %242 = vector.shape_cast %241 : vector<1x128x128xbf16> to vector<128x128xbf16>
    %cst_196 = arith.constant dense<0.000000e+00> : vector<4x128xf32>
    %243 = tpu.matmul %240, %242, %cst_196 {dimension_numbers = #tpu.dot_dimension_numbers<[1], [0], [0], [1], [0, 0, 1, 1], [], []>} : vector<4x128xbf16>, vector<128x128xbf16>, vector<4x128xf32> -> vector<4x128xf32>
    %244 = arith.addf %236, %243 : vector<4x128xf32>
    %245 = vector.broadcast %211 : vector<1x128xf32> to vector<4x128xf32>
    %246 = arith.addf %244, %245 : vector<4x128xf32>
    %cst_197 = arith.constant 0.000000e+00 : f32
    %247 = vector.broadcast %cst_197 : f32 to vector<4x128xf32>
    %c0_198 = arith.constant 0 : index
    %c0_199 = arith.constant 0 : index
    %c0_200 = arith.constant 0 : index
    %248 = vector.load %arg11[%c0_198, %c0_199, %c0_200] : memref<4x4x8xbf16, #tpu.memory_space<vmem>>, vector<1x4x8xbf16>
    %249 = vector.shape_cast %248 : vector<1x4x8xbf16> to vector<4x8xbf16>
    %cst_201 = arith.constant dense<0.000000e+00> : vector<4x128xf32>
    %250 = tpu.matmul %249, %210, %cst_201 {dimension_numbers = #tpu.dot_dimension_numbers<[1], [0], [0], [1], [0, 0, 1, 1], [], []>} : vector<4x8xbf16>, vector<8x128xbf16>, vector<4x128xf32> -> vector<4x128xf32>
    %251 = arith.truncf %250 : vector<4x128xf32> to vector<4x128xbf16>
    %c0_202 = arith.constant 0 : index
    %c0_203 = arith.constant 0 : index
    %c0_204 = arith.constant 0 : index
    %252 = vector.load %arg12[%c0_202, %c0_203, %c0_204] : memref<4x128x128xbf16, #tpu.memory_space<vmem>>, vector<1x128x128xbf16>
    %253 = vector.shape_cast %252 : vector<1x128x128xbf16> to vector<128x128xbf16>
    %cst_205 = arith.constant dense<0.000000e+00> : vector<4x128xf32>
    %254 = tpu.matmul %251, %253, %cst_205 {dimension_numbers = #tpu.dot_dimension_numbers<[1], [0], [0], [1], [0, 0, 1, 1], [], []>} : vector<4x128xbf16>, vector<128x128xbf16>, vector<4x128xf32> -> vector<4x128xf32>
    %255 = arith.addf %247, %254 : vector<4x128xf32>
    %c1_206 = arith.constant 1 : index
    %c0_207 = arith.constant 0 : index
    %c0_208 = arith.constant 0 : index
    %256 = vector.load %arg11[%c1_206, %c0_207, %c0_208] : memref<4x4x8xbf16, #tpu.memory_space<vmem>>, vector<1x4x8xbf16>
    %257 = vector.shape_cast %256 : vector<1x4x8xbf16> to vector<4x8xbf16>
    %cst_209 = arith.constant dense<0.000000e+00> : vector<4x128xf32>
    %258 = tpu.matmul %257, %210, %cst_209 {dimension_numbers = #tpu.dot_dimension_numbers<[1], [0], [0], [1], [0, 0, 1, 1], [], []>} : vector<4x8xbf16>, vector<8x128xbf16>, vector<4x128xf32> -> vector<4x128xf32>
    %259 = arith.truncf %258 : vector<4x128xf32> to vector<4x128xbf16>
    %c1_210 = arith.constant 1 : index
    %c0_211 = arith.constant 0 : index
    %c0_212 = arith.constant 0 : index
    %260 = vector.load %arg12[%c1_210, %c0_211, %c0_212] : memref<4x128x128xbf16, #tpu.memory_space<vmem>>, vector<1x128x128xbf16>
    %261 = vector.shape_cast %260 : vector<1x128x128xbf16> to vector<128x128xbf16>
    %cst_213 = arith.constant dense<0.000000e+00> : vector<4x128xf32>
    %262 = tpu.matmul %259, %261, %cst_213 {dimension_numbers = #tpu.dot_dimension_numbers<[1], [0], [0], [1], [0, 0, 1, 1], [], []>} : vector<4x128xbf16>, vector<128x128xbf16>, vector<4x128xf32> -> vector<4x128xf32>
    %263 = arith.addf %255, %262 : vector<4x128xf32>
    %c2_214 = arith.constant 2 : index
    %c0_215 = arith.constant 0 : index
    %c0_216 = arith.constant 0 : index
    %264 = vector.load %arg11[%c2_214, %c0_215, %c0_216] : memref<4x4x8xbf16, #tpu.memory_space<vmem>>, vector<1x4x8xbf16>
    %265 = vector.shape_cast %264 : vector<1x4x8xbf16> to vector<4x8xbf16>
    %cst_217 = arith.constant dense<0.000000e+00> : vector<4x128xf32>
    %266 = tpu.matmul %265, %210, %cst_217 {dimension_numbers = #tpu.dot_dimension_numbers<[1], [0], [0], [1], [0, 0, 1, 1], [], []>} : vector<4x8xbf16>, vector<8x128xbf16>, vector<4x128xf32> -> vector<4x128xf32>
    %267 = arith.truncf %266 : vector<4x128xf32> to vector<4x128xbf16>
    %c2_218 = arith.constant 2 : index
    %c0_219 = arith.constant 0 : index
    %c0_220 = arith.constant 0 : index
    %268 = vector.load %arg12[%c2_218, %c0_219, %c0_220] : memref<4x128x128xbf16, #tpu.memory_space<vmem>>, vector<1x128x128xbf16>
    %269 = vector.shape_cast %268 : vector<1x128x128xbf16> to vector<128x128xbf16>
    %cst_221 = arith.constant dense<0.000000e+00> : vector<4x128xf32>
    %270 = tpu.matmul %267, %269, %cst_221 {dimension_numbers = #tpu.dot_dimension_numbers<[1], [0], [0], [1], [0, 0, 1, 1], [], []>} : vector<4x128xbf16>, vector<128x128xbf16>, vector<4x128xf32> -> vector<4x128xf32>
    %271 = arith.addf %263, %270 : vector<4x128xf32>
    %c3_222 = arith.constant 3 : index
    %c0_223 = arith.constant 0 : index
    %c0_224 = arith.constant 0 : index
    %272 = vector.load %arg11[%c3_222, %c0_223, %c0_224] : memref<4x4x8xbf16, #tpu.memory_space<vmem>>, vector<1x4x8xbf16>
    %273 = vector.shape_cast %272 : vector<1x4x8xbf16> to vector<4x8xbf16>
    %cst_225 = arith.constant dense<0.000000e+00> : vector<4x128xf32>
    %274 = tpu.matmul %273, %210, %cst_225 {dimension_numbers = #tpu.dot_dimension_numbers<[1], [0], [0], [1], [0, 0, 1, 1], [], []>} : vector<4x8xbf16>, vector<8x128xbf16>, vector<4x128xf32> -> vector<4x128xf32>
    %275 = arith.truncf %274 : vector<4x128xf32> to vector<4x128xbf16>
    %c3_226 = arith.constant 3 : index
    %c0_227 = arith.constant 0 : index
    %c0_228 = arith.constant 0 : index
    %276 = vector.load %arg12[%c3_226, %c0_227, %c0_228] : memref<4x128x128xbf16, #tpu.memory_space<vmem>>, vector<1x128x128xbf16>
    %277 = vector.shape_cast %276 : vector<1x128x128xbf16> to vector<128x128xbf16>
    %cst_229 = arith.constant dense<0.000000e+00> : vector<4x128xf32>
    %278 = tpu.matmul %275, %277, %cst_229 {dimension_numbers = #tpu.dot_dimension_numbers<[1], [0], [0], [1], [0, 0, 1, 1], [], []>} : vector<4x128xbf16>, vector<128x128xbf16>, vector<4x128xf32> -> vector<4x128xf32>
    %279 = arith.addf %271, %278 : vector<4x128xf32>
    %280 = vector.broadcast %211 : vector<1x128xf32> to vector<4x128xf32>
    %281 = arith.addf %279, %280 : vector<4x128xf32>
    %cst_230 = arith.constant 0.000000e+00 : f32
    %282 = vector.broadcast %cst_230 : f32 to vector<1x128xf32>
    %cst_231 = arith.constant 0.000000e+00 : f32
    %283 = vector.broadcast %cst_231 : f32 to vector<1x128xf32>
    %cst_232 = arith.constant dense<0.000000e+00> : vector<128xf32>
    %284 = vector.multi_reduction <add>, %246, %cst_232 [0] : vector<4x128xf32> to vector<128xf32>
    %285 = vector.shape_cast %284 : vector<128xf32> to vector<1x128xf32>
    %286 = arith.addf %282, %285 : vector<1x128xf32>
    %287 = arith.mulf %246, %246 : vector<4x128xf32>
    %cst_233 = arith.constant dense<0.000000e+00> : vector<128xf32>
    %288 = vector.multi_reduction <add>, %287, %cst_233 [0] : vector<4x128xf32> to vector<128xf32>
    %289 = vector.shape_cast %288 : vector<128xf32> to vector<1x128xf32>
    %290 = arith.addf %283, %289 : vector<1x128xf32>
    %cst_234 = arith.constant dense<0.000000e+00> : vector<128xf32>
    %291 = vector.multi_reduction <add>, %281, %cst_234 [0] : vector<4x128xf32> to vector<128xf32>
    %292 = vector.shape_cast %291 : vector<128xf32> to vector<1x128xf32>
    %293 = arith.addf %286, %292 : vector<1x128xf32>
    %294 = arith.mulf %281, %281 : vector<4x128xf32>
    %cst_235 = arith.constant dense<0.000000e+00> : vector<128xf32>
    %295 = vector.multi_reduction <add>, %294, %cst_235 [0] : vector<4x128xf32> to vector<128xf32>
    %296 = vector.shape_cast %295 : vector<128xf32> to vector<1x128xf32>
    %297 = arith.addf %290, %296 : vector<1x128xf32>
    %c0_236 = arith.constant 0 : index
    %c0_237 = arith.constant 0 : index
    %298 = vector.load %arg14[%c0_236, %c0_237] : memref<128x128xf32, #tpu.memory_space<vmem>>, vector<128x128xf32>
    %cst_238 = arith.constant dense<0.000000e+00> : vector<1x128xf32>
    %299 = tpu.matmul %293, %298, %cst_238 {dimension_numbers = #tpu.dot_dimension_numbers<[1], [0], [0], [1], [0, 0, 1, 1], [], []>} : vector<1x128xf32>, vector<128x128xf32>, vector<1x128xf32> -> vector<1x128xf32>
    %cst_239 = arith.constant 3.125000e-02 : f32
    %300 = vector.broadcast %cst_239 : f32 to vector<1x128xf32>
    %301 = arith.mulf %299, %300 : vector<1x128xf32>
    %cst_240 = arith.constant dense<0.000000e+00> : vector<1x128xf32>
    %302 = tpu.matmul %297, %298, %cst_240 {dimension_numbers = #tpu.dot_dimension_numbers<[1], [0], [0], [1], [0, 0, 1, 1], [], []>} : vector<1x128xf32>, vector<128x128xf32>, vector<1x128xf32> -> vector<1x128xf32>
    %cst_241 = arith.constant 3.125000e-02 : f32
    %303 = vector.broadcast %cst_241 : f32 to vector<1x128xf32>
    %304 = arith.mulf %302, %303 : vector<1x128xf32>
    %305 = arith.mulf %301, %301 : vector<1x128xf32>
    %306 = arith.subf %304, %305 : vector<1x128xf32>
    %cst_242 = arith.constant 9.99999974E-6 : f32
    %307 = vector.broadcast %cst_242 : f32 to vector<1x128xf32>
    %308 = arith.addf %306, %307 : vector<1x128xf32>
    %309 = math.rsqrt %308 : vector<1x128xf32>
    %c0_243 = arith.constant 0 : index
    %c0_244 = arith.constant 0 : index
    %310 = vector.load %arg15[%c0_243, %c0_244] : memref<1x128xf32, #tpu.memory_space<vmem>>, vector<1x128xf32>
    %311 = arith.mulf %309, %310 : vector<1x128xf32>
    %c0_245 = arith.constant 0 : index
    %c0_246 = arith.constant 0 : index
    %312 = vector.load %arg16[%c0_245, %c0_246] : memref<1x128xf32, #tpu.memory_space<vmem>>, vector<1x128xf32>
    %313 = arith.mulf %301, %311 : vector<1x128xf32>
    %314 = arith.subf %312, %313 : vector<1x128xf32>
    %315 = vector.broadcast %311 : vector<1x128xf32> to vector<4x128xf32>
    %316 = arith.mulf %246, %315 : vector<4x128xf32>
    %317 = vector.broadcast %314 : vector<1x128xf32> to vector<4x128xf32>
    %318 = arith.addf %316, %317 : vector<4x128xf32>
    %319 = vector.broadcast %311 : vector<1x128xf32> to vector<4x128xf32>
    %320 = arith.mulf %281, %319 : vector<4x128xf32>
    %321 = vector.broadcast %314 : vector<1x128xf32> to vector<4x128xf32>
    %322 = arith.addf %320, %321 : vector<4x128xf32>
    %cst_247 = arith.constant 0.000000e+00 : f32
    %323 = vector.broadcast %cst_247 : f32 to vector<4x128xf32>
    %324 = arith.cmpf ogt, %318, %323 : vector<4x128xf32>
    %cst_248 = arith.constant 2.000000e-01 : f32
    %325 = vector.broadcast %cst_248 : f32 to vector<4x128xf32>
    %326 = arith.mulf %325, %318 : vector<4x128xf32>
    %327 = arith.select %324, %318, %326 : vector<4x128xi1>, vector<4x128xf32>
    %328 = arith.truncf %327 : vector<4x128xf32> to vector<4x128xbf16>
    %cst_249 = arith.constant 0.000000e+00 : f32
    %329 = vector.broadcast %cst_249 : f32 to vector<4x128xf32>
    %330 = arith.cmpf ogt, %322, %329 : vector<4x128xf32>
    %cst_250 = arith.constant 2.000000e-01 : f32
    %331 = vector.broadcast %cst_250 : f32 to vector<4x128xf32>
    %332 = arith.mulf %331, %322 : vector<4x128xf32>
    %333 = arith.select %330, %322, %332 : vector<4x128xi1>, vector<4x128xf32>
    %334 = arith.truncf %333 : vector<4x128xf32> to vector<4x128xbf16>
    %c0_251 = arith.constant 0 : index
    %c0_252 = arith.constant 0 : index
    %335 = vector.load %arg19[%c0_251, %c0_252] : memref<1x192xf32, #tpu.memory_space<vmem>>, vector<1x192xf32>
    %cst_253 = arith.constant 0.000000e+00 : f32
    %336 = vector.broadcast %cst_253 : f32 to vector<3x192xf32>
    %c0_254 = arith.constant 0 : index
    %c0_255 = arith.constant 0 : index
    %c0_256 = arith.constant 0 : index
    %337 = vector.load %arg17[%c0_254, %c0_255, %c0_256] : memref<4x3x4xbf16, #tpu.memory_space<vmem>>, vector<1x3x4xbf16>
    %338 = vector.shape_cast %337 : vector<1x3x4xbf16> to vector<3x4xbf16>
    %cst_257 = arith.constant dense<0.000000e+00> : vector<3x128xf32>
    %339 = tpu.matmul %338, %328, %cst_257 {dimension_numbers = #tpu.dot_dimension_numbers<[1], [0], [0], [1], [0, 0, 1, 1], [], []>} : vector<3x4xbf16>, vector<4x128xbf16>, vector<3x128xf32> -> vector<3x128xf32>
    %340 = arith.truncf %339 : vector<3x128xf32> to vector<3x128xbf16>
    %c0_258 = arith.constant 0 : index
    %c0_259 = arith.constant 0 : index
    %c0_260 = arith.constant 0 : index
    %341 = vector.load %arg18[%c0_258, %c0_259, %c0_260] : memref<4x128x192xbf16, #tpu.memory_space<vmem>>, vector<1x128x192xbf16>
    %342 = vector.shape_cast %341 : vector<1x128x192xbf16> to vector<128x192xbf16>
    %cst_261 = arith.constant dense<0.000000e+00> : vector<3x192xf32>
    %343 = tpu.matmul %340, %342, %cst_261 {dimension_numbers = #tpu.dot_dimension_numbers<[1], [0], [0], [1], [0, 0, 1, 1], [], []>} : vector<3x128xbf16>, vector<128x192xbf16>, vector<3x192xf32> -> vector<3x192xf32>
    %344 = arith.addf %336, %343 : vector<3x192xf32>
    %c1_262 = arith.constant 1 : index
    %c0_263 = arith.constant 0 : index
    %c0_264 = arith.constant 0 : index
    %345 = vector.load %arg17[%c1_262, %c0_263, %c0_264] : memref<4x3x4xbf16, #tpu.memory_space<vmem>>, vector<1x3x4xbf16>
    %346 = vector.shape_cast %345 : vector<1x3x4xbf16> to vector<3x4xbf16>
    %cst_265 = arith.constant dense<0.000000e+00> : vector<3x128xf32>
    %347 = tpu.matmul %346, %328, %cst_265 {dimension_numbers = #tpu.dot_dimension_numbers<[1], [0], [0], [1], [0, 0, 1, 1], [], []>} : vector<3x4xbf16>, vector<4x128xbf16>, vector<3x128xf32> -> vector<3x128xf32>
    %348 = arith.truncf %347 : vector<3x128xf32> to vector<3x128xbf16>
    %c1_266 = arith.constant 1 : index
    %c0_267 = arith.constant 0 : index
    %c0_268 = arith.constant 0 : index
    %349 = vector.load %arg18[%c1_266, %c0_267, %c0_268] : memref<4x128x192xbf16, #tpu.memory_space<vmem>>, vector<1x128x192xbf16>
    %350 = vector.shape_cast %349 : vector<1x128x192xbf16> to vector<128x192xbf16>
    %cst_269 = arith.constant dense<0.000000e+00> : vector<3x192xf32>
    %351 = tpu.matmul %348, %350, %cst_269 {dimension_numbers = #tpu.dot_dimension_numbers<[1], [0], [0], [1], [0, 0, 1, 1], [], []>} : vector<3x128xbf16>, vector<128x192xbf16>, vector<3x192xf32> -> vector<3x192xf32>
    %352 = arith.addf %344, %351 : vector<3x192xf32>
    %c2_270 = arith.constant 2 : index
    %c0_271 = arith.constant 0 : index
    %c0_272 = arith.constant 0 : index
    %353 = vector.load %arg17[%c2_270, %c0_271, %c0_272] : memref<4x3x4xbf16, #tpu.memory_space<vmem>>, vector<1x3x4xbf16>
    %354 = vector.shape_cast %353 : vector<1x3x4xbf16> to vector<3x4xbf16>
    %cst_273 = arith.constant dense<0.000000e+00> : vector<3x128xf32>
    %355 = tpu.matmul %354, %328, %cst_273 {dimension_numbers = #tpu.dot_dimension_numbers<[1], [0], [0], [1], [0, 0, 1, 1], [], []>} : vector<3x4xbf16>, vector<4x128xbf16>, vector<3x128xf32> -> vector<3x128xf32>
    %356 = arith.truncf %355 : vector<3x128xf32> to vector<3x128xbf16>
    %c2_274 = arith.constant 2 : index
    %c0_275 = arith.constant 0 : index
    %c0_276 = arith.constant 0 : index
    %357 = vector.load %arg18[%c2_274, %c0_275, %c0_276] : memref<4x128x192xbf16, #tpu.memory_space<vmem>>, vector<1x128x192xbf16>
    %358 = vector.shape_cast %357 : vector<1x128x192xbf16> to vector<128x192xbf16>
    %cst_277 = arith.constant dense<0.000000e+00> : vector<3x192xf32>
    %359 = tpu.matmul %356, %358, %cst_277 {dimension_numbers = #tpu.dot_dimension_numbers<[1], [0], [0], [1], [0, 0, 1, 1], [], []>} : vector<3x128xbf16>, vector<128x192xbf16>, vector<3x192xf32> -> vector<3x192xf32>
    %360 = arith.addf %352, %359 : vector<3x192xf32>
    %c3_278 = arith.constant 3 : index
    %c0_279 = arith.constant 0 : index
    %c0_280 = arith.constant 0 : index
    %361 = vector.load %arg17[%c3_278, %c0_279, %c0_280] : memref<4x3x4xbf16, #tpu.memory_space<vmem>>, vector<1x3x4xbf16>
    %362 = vector.shape_cast %361 : vector<1x3x4xbf16> to vector<3x4xbf16>
    %cst_281 = arith.constant dense<0.000000e+00> : vector<3x128xf32>
    %363 = tpu.matmul %362, %328, %cst_281 {dimension_numbers = #tpu.dot_dimension_numbers<[1], [0], [0], [1], [0, 0, 1, 1], [], []>} : vector<3x4xbf16>, vector<4x128xbf16>, vector<3x128xf32> -> vector<3x128xf32>
    %364 = arith.truncf %363 : vector<3x128xf32> to vector<3x128xbf16>
    %c3_282 = arith.constant 3 : index
    %c0_283 = arith.constant 0 : index
    %c0_284 = arith.constant 0 : index
    %365 = vector.load %arg18[%c3_282, %c0_283, %c0_284] : memref<4x128x192xbf16, #tpu.memory_space<vmem>>, vector<1x128x192xbf16>
    %366 = vector.shape_cast %365 : vector<1x128x192xbf16> to vector<128x192xbf16>
    %cst_285 = arith.constant dense<0.000000e+00> : vector<3x192xf32>
    %367 = tpu.matmul %364, %366, %cst_285 {dimension_numbers = #tpu.dot_dimension_numbers<[1], [0], [0], [1], [0, 0, 1, 1], [], []>} : vector<3x128xbf16>, vector<128x192xbf16>, vector<3x192xf32> -> vector<3x192xf32>
    %368 = arith.addf %360, %367 : vector<3x192xf32>
    %369 = vector.broadcast %335 : vector<1x192xf32> to vector<3x192xf32>
    %370 = arith.addf %368, %369 : vector<3x192xf32>
    %cst_286 = arith.constant 0.000000e+00 : f32
    %371 = vector.broadcast %cst_286 : f32 to vector<3x192xf32>
    %c0_287 = arith.constant 0 : index
    %c0_288 = arith.constant 0 : index
    %c0_289 = arith.constant 0 : index
    %372 = vector.load %arg17[%c0_287, %c0_288, %c0_289] : memref<4x3x4xbf16, #tpu.memory_space<vmem>>, vector<1x3x4xbf16>
    %373 = vector.shape_cast %372 : vector<1x3x4xbf16> to vector<3x4xbf16>
    %cst_290 = arith.constant dense<0.000000e+00> : vector<3x128xf32>
    %374 = tpu.matmul %373, %334, %cst_290 {dimension_numbers = #tpu.dot_dimension_numbers<[1], [0], [0], [1], [0, 0, 1, 1], [], []>} : vector<3x4xbf16>, vector<4x128xbf16>, vector<3x128xf32> -> vector<3x128xf32>
    %375 = arith.truncf %374 : vector<3x128xf32> to vector<3x128xbf16>
    %c0_291 = arith.constant 0 : index
    %c0_292 = arith.constant 0 : index
    %c0_293 = arith.constant 0 : index
    %376 = vector.load %arg18[%c0_291, %c0_292, %c0_293] : memref<4x128x192xbf16, #tpu.memory_space<vmem>>, vector<1x128x192xbf16>
    %377 = vector.shape_cast %376 : vector<1x128x192xbf16> to vector<128x192xbf16>
    %cst_294 = arith.constant dense<0.000000e+00> : vector<3x192xf32>
    %378 = tpu.matmul %375, %377, %cst_294 {dimension_numbers = #tpu.dot_dimension_numbers<[1], [0], [0], [1], [0, 0, 1, 1], [], []>} : vector<3x128xbf16>, vector<128x192xbf16>, vector<3x192xf32> -> vector<3x192xf32>
    %379 = arith.addf %371, %378 : vector<3x192xf32>
    %c1_295 = arith.constant 1 : index
    %c0_296 = arith.constant 0 : index
    %c0_297 = arith.constant 0 : index
    %380 = vector.load %arg17[%c1_295, %c0_296, %c0_297] : memref<4x3x4xbf16, #tpu.memory_space<vmem>>, vector<1x3x4xbf16>
    %381 = vector.shape_cast %380 : vector<1x3x4xbf16> to vector<3x4xbf16>
    %cst_298 = arith.constant dense<0.000000e+00> : vector<3x128xf32>
    %382 = tpu.matmul %381, %334, %cst_298 {dimension_numbers = #tpu.dot_dimension_numbers<[1], [0], [0], [1], [0, 0, 1, 1], [], []>} : vector<3x4xbf16>, vector<4x128xbf16>, vector<3x128xf32> -> vector<3x128xf32>
    %383 = arith.truncf %382 : vector<3x128xf32> to vector<3x128xbf16>
    %c1_299 = arith.constant 1 : index
    %c0_300 = arith.constant 0 : index
    %c0_301 = arith.constant 0 : index
    %384 = vector.load %arg18[%c1_299, %c0_300, %c0_301] : memref<4x128x192xbf16, #tpu.memory_space<vmem>>, vector<1x128x192xbf16>
    %385 = vector.shape_cast %384 : vector<1x128x192xbf16> to vector<128x192xbf16>
    %cst_302 = arith.constant dense<0.000000e+00> : vector<3x192xf32>
    %386 = tpu.matmul %383, %385, %cst_302 {dimension_numbers = #tpu.dot_dimension_numbers<[1], [0], [0], [1], [0, 0, 1, 1], [], []>} : vector<3x128xbf16>, vector<128x192xbf16>, vector<3x192xf32> -> vector<3x192xf32>
    %387 = arith.addf %379, %386 : vector<3x192xf32>
    %c2_303 = arith.constant 2 : index
    %c0_304 = arith.constant 0 : index
    %c0_305 = arith.constant 0 : index
    %388 = vector.load %arg17[%c2_303, %c0_304, %c0_305] : memref<4x3x4xbf16, #tpu.memory_space<vmem>>, vector<1x3x4xbf16>
    %389 = vector.shape_cast %388 : vector<1x3x4xbf16> to vector<3x4xbf16>
    %cst_306 = arith.constant dense<0.000000e+00> : vector<3x128xf32>
    %390 = tpu.matmul %389, %334, %cst_306 {dimension_numbers = #tpu.dot_dimension_numbers<[1], [0], [0], [1], [0, 0, 1, 1], [], []>} : vector<3x4xbf16>, vector<4x128xbf16>, vector<3x128xf32> -> vector<3x128xf32>
    %391 = arith.truncf %390 : vector<3x128xf32> to vector<3x128xbf16>
    %c2_307 = arith.constant 2 : index
    %c0_308 = arith.constant 0 : index
    %c0_309 = arith.constant 0 : index
    %392 = vector.load %arg18[%c2_307, %c0_308, %c0_309] : memref<4x128x192xbf16, #tpu.memory_space<vmem>>, vector<1x128x192xbf16>
    %393 = vector.shape_cast %392 : vector<1x128x192xbf16> to vector<128x192xbf16>
    %cst_310 = arith.constant dense<0.000000e+00> : vector<3x192xf32>
    %394 = tpu.matmul %391, %393, %cst_310 {dimension_numbers = #tpu.dot_dimension_numbers<[1], [0], [0], [1], [0, 0, 1, 1], [], []>} : vector<3x128xbf16>, vector<128x192xbf16>, vector<3x192xf32> -> vector<3x192xf32>
    %395 = arith.addf %387, %394 : vector<3x192xf32>
    %c3_311 = arith.constant 3 : index
    %c0_312 = arith.constant 0 : index
    %c0_313 = arith.constant 0 : index
    %396 = vector.load %arg17[%c3_311, %c0_312, %c0_313] : memref<4x3x4xbf16, #tpu.memory_space<vmem>>, vector<1x3x4xbf16>
    %397 = vector.shape_cast %396 : vector<1x3x4xbf16> to vector<3x4xbf16>
    %cst_314 = arith.constant dense<0.000000e+00> : vector<3x128xf32>
    %398 = tpu.matmul %397, %334, %cst_314 {dimension_numbers = #tpu.dot_dimension_numbers<[1], [0], [0], [1], [0, 0, 1, 1], [], []>} : vector<3x4xbf16>, vector<4x128xbf16>, vector<3x128xf32> -> vector<3x128xf32>
    %399 = arith.truncf %398 : vector<3x128xf32> to vector<3x128xbf16>
    %c3_315 = arith.constant 3 : index
    %c0_316 = arith.constant 0 : index
    %c0_317 = arith.constant 0 : index
    %400 = vector.load %arg18[%c3_315, %c0_316, %c0_317] : memref<4x128x192xbf16, #tpu.memory_space<vmem>>, vector<1x128x192xbf16>
    %401 = vector.shape_cast %400 : vector<1x128x192xbf16> to vector<128x192xbf16>
    %cst_318 = arith.constant dense<0.000000e+00> : vector<3x192xf32>
    %402 = tpu.matmul %399, %401, %cst_318 {dimension_numbers = #tpu.dot_dimension_numbers<[1], [0], [0], [1], [0, 0, 1, 1], [], []>} : vector<3x128xbf16>, vector<128x192xbf16>, vector<3x192xf32> -> vector<3x192xf32>
    %403 = arith.addf %395, %402 : vector<3x192xf32>
    %404 = vector.broadcast %335 : vector<1x192xf32> to vector<3x192xf32>
    %405 = arith.addf %403, %404 : vector<3x192xf32>
    %cst_319 = arith.constant 0.000000e+00 : f32
    %406 = vector.broadcast %cst_319 : f32 to vector<1x192xf32>
    %cst_320 = arith.constant 0.000000e+00 : f32
    %407 = vector.broadcast %cst_320 : f32 to vector<1x192xf32>
    %cst_321 = arith.constant dense<0.000000e+00> : vector<192xf32>
    %408 = vector.multi_reduction <add>, %370, %cst_321 [0] : vector<3x192xf32> to vector<192xf32>
    %409 = vector.shape_cast %408 : vector<192xf32> to vector<1x192xf32>
    %410 = arith.addf %406, %409 : vector<1x192xf32>
    %411 = arith.mulf %370, %370 : vector<3x192xf32>
    %cst_322 = arith.constant dense<0.000000e+00> : vector<192xf32>
    %412 = vector.multi_reduction <add>, %411, %cst_322 [0] : vector<3x192xf32> to vector<192xf32>
    %413 = vector.shape_cast %412 : vector<192xf32> to vector<1x192xf32>
    %414 = arith.addf %407, %413 : vector<1x192xf32>
    %cst_323 = arith.constant dense<0.000000e+00> : vector<192xf32>
    %415 = vector.multi_reduction <add>, %405, %cst_323 [0] : vector<3x192xf32> to vector<192xf32>
    %416 = vector.shape_cast %415 : vector<192xf32> to vector<1x192xf32>
    %417 = arith.addf %410, %416 : vector<1x192xf32>
    %418 = arith.mulf %405, %405 : vector<3x192xf32>
    %cst_324 = arith.constant dense<0.000000e+00> : vector<192xf32>
    %419 = vector.multi_reduction <add>, %418, %cst_324 [0] : vector<3x192xf32> to vector<192xf32>
    %420 = vector.shape_cast %419 : vector<192xf32> to vector<1x192xf32>
    %421 = arith.addf %414, %420 : vector<1x192xf32>
    %c0_325 = arith.constant 0 : index
    %c0_326 = arith.constant 0 : index
    %422 = vector.load %arg20[%c0_325, %c0_326] : memref<192x192xf32, #tpu.memory_space<vmem>>, vector<192x192xf32>
    %cst_327 = arith.constant dense<0.000000e+00> : vector<1x192xf32>
    %423 = tpu.matmul %417, %422, %cst_327 {dimension_numbers = #tpu.dot_dimension_numbers<[1], [0], [0], [1], [0, 0, 1, 1], [], []>} : vector<1x192xf32>, vector<192x192xf32>, vector<1x192xf32> -> vector<1x192xf32>
    %cst_328 = arith.constant 0.055555556 : f32
    %424 = vector.broadcast %cst_328 : f32 to vector<1x192xf32>
    %425 = arith.mulf %423, %424 : vector<1x192xf32>
    %cst_329 = arith.constant dense<0.000000e+00> : vector<1x192xf32>
    %426 = tpu.matmul %421, %422, %cst_329 {dimension_numbers = #tpu.dot_dimension_numbers<[1], [0], [0], [1], [0, 0, 1, 1], [], []>} : vector<1x192xf32>, vector<192x192xf32>, vector<1x192xf32> -> vector<1x192xf32>
    %cst_330 = arith.constant 0.055555556 : f32
    %427 = vector.broadcast %cst_330 : f32 to vector<1x192xf32>
    %428 = arith.mulf %426, %427 : vector<1x192xf32>
    %429 = arith.mulf %425, %425 : vector<1x192xf32>
    %430 = arith.subf %428, %429 : vector<1x192xf32>
    %cst_331 = arith.constant 9.99999974E-6 : f32
    %431 = vector.broadcast %cst_331 : f32 to vector<1x192xf32>
    %432 = arith.addf %430, %431 : vector<1x192xf32>
    %433 = math.rsqrt %432 : vector<1x192xf32>
    %c0_332 = arith.constant 0 : index
    %c0_333 = arith.constant 0 : index
    %434 = vector.load %arg21[%c0_332, %c0_333] : memref<1x192xf32, #tpu.memory_space<vmem>>, vector<1x192xf32>
    %435 = arith.mulf %433, %434 : vector<1x192xf32>
    %c0_334 = arith.constant 0 : index
    %c0_335 = arith.constant 0 : index
    %436 = vector.load %arg22[%c0_334, %c0_335] : memref<1x192xf32, #tpu.memory_space<vmem>>, vector<1x192xf32>
    %437 = arith.mulf %425, %435 : vector<1x192xf32>
    %438 = arith.subf %436, %437 : vector<1x192xf32>
    %439 = vector.broadcast %435 : vector<1x192xf32> to vector<3x192xf32>
    %440 = arith.mulf %370, %439 : vector<3x192xf32>
    %441 = vector.broadcast %438 : vector<1x192xf32> to vector<3x192xf32>
    %442 = arith.addf %440, %441 : vector<3x192xf32>
    %443 = vector.broadcast %435 : vector<1x192xf32> to vector<3x192xf32>
    %444 = arith.mulf %405, %443 : vector<3x192xf32>
    %445 = vector.broadcast %438 : vector<1x192xf32> to vector<3x192xf32>
    %446 = arith.addf %444, %445 : vector<3x192xf32>
    %cst_336 = arith.constant 0.000000e+00 : f32
    %447 = vector.broadcast %cst_336 : f32 to vector<3x192xf32>
    %448 = arith.cmpf ogt, %442, %447 : vector<3x192xf32>
    %cst_337 = arith.constant 2.000000e-01 : f32
    %449 = vector.broadcast %cst_337 : f32 to vector<3x192xf32>
    %450 = arith.mulf %449, %442 : vector<3x192xf32>
    %451 = arith.select %448, %442, %450 : vector<3x192xi1>, vector<3x192xf32>
    %452 = arith.truncf %451 : vector<3x192xf32> to vector<3x192xbf16>
    %cst_338 = arith.constant 0.000000e+00 : f32
    %453 = vector.broadcast %cst_338 : f32 to vector<3x192xf32>
    %454 = arith.cmpf ogt, %446, %453 : vector<3x192xf32>
    %cst_339 = arith.constant 2.000000e-01 : f32
    %455 = vector.broadcast %cst_339 : f32 to vector<3x192xf32>
    %456 = arith.mulf %455, %446 : vector<3x192xf32>
    %457 = arith.select %454, %446, %456 : vector<3x192xi1>, vector<3x192xf32>
    %458 = arith.truncf %457 : vector<3x192xf32> to vector<3x192xbf16>
    %c0_340 = arith.constant 0 : index
    %c0_341 = arith.constant 0 : index
    %459 = vector.load %arg25[%c0_340, %c0_341] : memref<1x2xf32, #tpu.memory_space<vmem>>, vector<1x2xf32>
    %cst_342 = arith.constant 0.000000e+00 : f32
    %460 = vector.broadcast %cst_342 : f32 to vector<2x2xf32>
    %c0_343 = arith.constant 0 : index
    %c0_344 = arith.constant 0 : index
    %c0_345 = arith.constant 0 : index
    %461 = vector.load %arg23[%c0_343, %c0_344, %c0_345] : memref<4x2x3xbf16, #tpu.memory_space<vmem>>, vector<1x2x3xbf16>
    %462 = vector.shape_cast %461 : vector<1x2x3xbf16> to vector<2x3xbf16>
    %cst_346 = arith.constant dense<0.000000e+00> : vector<2x192xf32>
    %463 = tpu.matmul %462, %452, %cst_346 {dimension_numbers = #tpu.dot_dimension_numbers<[1], [0], [0], [1], [0, 0, 1, 1], [], []>} : vector<2x3xbf16>, vector<3x192xbf16>, vector<2x192xf32> -> vector<2x192xf32>
    %464 = arith.truncf %463 : vector<2x192xf32> to vector<2x192xbf16>
    %c0_347 = arith.constant 0 : index
    %c0_348 = arith.constant 0 : index
    %c0_349 = arith.constant 0 : index
    %465 = vector.load %arg24[%c0_347, %c0_348, %c0_349] : memref<4x192x2xbf16, #tpu.memory_space<vmem>>, vector<1x192x2xbf16>
    %466 = vector.shape_cast %465 : vector<1x192x2xbf16> to vector<192x2xbf16>
    %cst_350 = arith.constant dense<0.000000e+00> : vector<2x2xf32>
    %467 = tpu.matmul %464, %466, %cst_350 {dimension_numbers = #tpu.dot_dimension_numbers<[1], [0], [0], [1], [0, 0, 1, 1], [], []>} : vector<2x192xbf16>, vector<192x2xbf16>, vector<2x2xf32> -> vector<2x2xf32>
    %468 = arith.addf %460, %467 : vector<2x2xf32>
    %c1_351 = arith.constant 1 : index
    %c0_352 = arith.constant 0 : index
    %c0_353 = arith.constant 0 : index
    %469 = vector.load %arg23[%c1_351, %c0_352, %c0_353] : memref<4x2x3xbf16, #tpu.memory_space<vmem>>, vector<1x2x3xbf16>
    %470 = vector.shape_cast %469 : vector<1x2x3xbf16> to vector<2x3xbf16>
    %cst_354 = arith.constant dense<0.000000e+00> : vector<2x192xf32>
    %471 = tpu.matmul %470, %452, %cst_354 {dimension_numbers = #tpu.dot_dimension_numbers<[1], [0], [0], [1], [0, 0, 1, 1], [], []>} : vector<2x3xbf16>, vector<3x192xbf16>, vector<2x192xf32> -> vector<2x192xf32>
    %472 = arith.truncf %471 : vector<2x192xf32> to vector<2x192xbf16>
    %c1_355 = arith.constant 1 : index
    %c0_356 = arith.constant 0 : index
    %c0_357 = arith.constant 0 : index
    %473 = vector.load %arg24[%c1_355, %c0_356, %c0_357] : memref<4x192x2xbf16, #tpu.memory_space<vmem>>, vector<1x192x2xbf16>
    %474 = vector.shape_cast %473 : vector<1x192x2xbf16> to vector<192x2xbf16>
    %cst_358 = arith.constant dense<0.000000e+00> : vector<2x2xf32>
    %475 = tpu.matmul %472, %474, %cst_358 {dimension_numbers = #tpu.dot_dimension_numbers<[1], [0], [0], [1], [0, 0, 1, 1], [], []>} : vector<2x192xbf16>, vector<192x2xbf16>, vector<2x2xf32> -> vector<2x2xf32>
    %476 = arith.addf %468, %475 : vector<2x2xf32>
    %c2_359 = arith.constant 2 : index
    %c0_360 = arith.constant 0 : index
    %c0_361 = arith.constant 0 : index
    %477 = vector.load %arg23[%c2_359, %c0_360, %c0_361] : memref<4x2x3xbf16, #tpu.memory_space<vmem>>, vector<1x2x3xbf16>
    %478 = vector.shape_cast %477 : vector<1x2x3xbf16> to vector<2x3xbf16>
    %cst_362 = arith.constant dense<0.000000e+00> : vector<2x192xf32>
    %479 = tpu.matmul %478, %452, %cst_362 {dimension_numbers = #tpu.dot_dimension_numbers<[1], [0], [0], [1], [0, 0, 1, 1], [], []>} : vector<2x3xbf16>, vector<3x192xbf16>, vector<2x192xf32> -> vector<2x192xf32>
    %480 = arith.truncf %479 : vector<2x192xf32> to vector<2x192xbf16>
    %c2_363 = arith.constant 2 : index
    %c0_364 = arith.constant 0 : index
    %c0_365 = arith.constant 0 : index
    %481 = vector.load %arg24[%c2_363, %c0_364, %c0_365] : memref<4x192x2xbf16, #tpu.memory_space<vmem>>, vector<1x192x2xbf16>
    %482 = vector.shape_cast %481 : vector<1x192x2xbf16> to vector<192x2xbf16>
    %cst_366 = arith.constant dense<0.000000e+00> : vector<2x2xf32>
    %483 = tpu.matmul %480, %482, %cst_366 {dimension_numbers = #tpu.dot_dimension_numbers<[1], [0], [0], [1], [0, 0, 1, 1], [], []>} : vector<2x192xbf16>, vector<192x2xbf16>, vector<2x2xf32> -> vector<2x2xf32>
    %484 = arith.addf %476, %483 : vector<2x2xf32>
    %c3_367 = arith.constant 3 : index
    %c0_368 = arith.constant 0 : index
    %c0_369 = arith.constant 0 : index
    %485 = vector.load %arg23[%c3_367, %c0_368, %c0_369] : memref<4x2x3xbf16, #tpu.memory_space<vmem>>, vector<1x2x3xbf16>
    %486 = vector.shape_cast %485 : vector<1x2x3xbf16> to vector<2x3xbf16>
    %cst_370 = arith.constant dense<0.000000e+00> : vector<2x192xf32>
    %487 = tpu.matmul %486, %452, %cst_370 {dimension_numbers = #tpu.dot_dimension_numbers<[1], [0], [0], [1], [0, 0, 1, 1], [], []>} : vector<2x3xbf16>, vector<3x192xbf16>, vector<2x192xf32> -> vector<2x192xf32>
    %488 = arith.truncf %487 : vector<2x192xf32> to vector<2x192xbf16>
    %c3_371 = arith.constant 3 : index
    %c0_372 = arith.constant 0 : index
    %c0_373 = arith.constant 0 : index
    %489 = vector.load %arg24[%c3_371, %c0_372, %c0_373] : memref<4x192x2xbf16, #tpu.memory_space<vmem>>, vector<1x192x2xbf16>
    %490 = vector.shape_cast %489 : vector<1x192x2xbf16> to vector<192x2xbf16>
    %cst_374 = arith.constant dense<0.000000e+00> : vector<2x2xf32>
    %491 = tpu.matmul %488, %490, %cst_374 {dimension_numbers = #tpu.dot_dimension_numbers<[1], [0], [0], [1], [0, 0, 1, 1], [], []>} : vector<2x192xbf16>, vector<192x2xbf16>, vector<2x2xf32> -> vector<2x2xf32>
    %492 = arith.addf %484, %491 : vector<2x2xf32>
    %493 = vector.broadcast %459 : vector<1x2xf32> to vector<2x2xf32>
    %494 = arith.addf %492, %493 : vector<2x2xf32>
    %cst_375 = arith.constant 0.000000e+00 : f32
    %495 = vector.broadcast %cst_375 : f32 to vector<2x2xf32>
    %c0_376 = arith.constant 0 : index
    %c0_377 = arith.constant 0 : index
    %c0_378 = arith.constant 0 : index
    %496 = vector.load %arg23[%c0_376, %c0_377, %c0_378] : memref<4x2x3xbf16, #tpu.memory_space<vmem>>, vector<1x2x3xbf16>
    %497 = vector.shape_cast %496 : vector<1x2x3xbf16> to vector<2x3xbf16>
    %cst_379 = arith.constant dense<0.000000e+00> : vector<2x192xf32>
    %498 = tpu.matmul %497, %458, %cst_379 {dimension_numbers = #tpu.dot_dimension_numbers<[1], [0], [0], [1], [0, 0, 1, 1], [], []>} : vector<2x3xbf16>, vector<3x192xbf16>, vector<2x192xf32> -> vector<2x192xf32>
    %499 = arith.truncf %498 : vector<2x192xf32> to vector<2x192xbf16>
    %c0_380 = arith.constant 0 : index
    %c0_381 = arith.constant 0 : index
    %c0_382 = arith.constant 0 : index
    %500 = vector.load %arg24[%c0_380, %c0_381, %c0_382] : memref<4x192x2xbf16, #tpu.memory_space<vmem>>, vector<1x192x2xbf16>
    %501 = vector.shape_cast %500 : vector<1x192x2xbf16> to vector<192x2xbf16>
    %cst_383 = arith.constant dense<0.000000e+00> : vector<2x2xf32>
    %502 = tpu.matmul %499, %501, %cst_383 {dimension_numbers = #tpu.dot_dimension_numbers<[1], [0], [0], [1], [0, 0, 1, 1], [], []>} : vector<2x192xbf16>, vector<192x2xbf16>, vector<2x2xf32> -> vector<2x2xf32>
    %503 = arith.addf %495, %502 : vector<2x2xf32>
    %c1_384 = arith.constant 1 : index
    %c0_385 = arith.constant 0 : index
    %c0_386 = arith.constant 0 : index
    %504 = vector.load %arg23[%c1_384, %c0_385, %c0_386] : memref<4x2x3xbf16, #tpu.memory_space<vmem>>, vector<1x2x3xbf16>
    %505 = vector.shape_cast %504 : vector<1x2x3xbf16> to vector<2x3xbf16>
    %cst_387 = arith.constant dense<0.000000e+00> : vector<2x192xf32>
    %506 = tpu.matmul %505, %458, %cst_387 {dimension_numbers = #tpu.dot_dimension_numbers<[1], [0], [0], [1], [0, 0, 1, 1], [], []>} : vector<2x3xbf16>, vector<3x192xbf16>, vector<2x192xf32> -> vector<2x192xf32>
    %507 = arith.truncf %506 : vector<2x192xf32> to vector<2x192xbf16>
    %c1_388 = arith.constant 1 : index
    %c0_389 = arith.constant 0 : index
    %c0_390 = arith.constant 0 : index
    %508 = vector.load %arg24[%c1_388, %c0_389, %c0_390] : memref<4x192x2xbf16, #tpu.memory_space<vmem>>, vector<1x192x2xbf16>
    %509 = vector.shape_cast %508 : vector<1x192x2xbf16> to vector<192x2xbf16>
    %cst_391 = arith.constant dense<0.000000e+00> : vector<2x2xf32>
    %510 = tpu.matmul %507, %509, %cst_391 {dimension_numbers = #tpu.dot_dimension_numbers<[1], [0], [0], [1], [0, 0, 1, 1], [], []>} : vector<2x192xbf16>, vector<192x2xbf16>, vector<2x2xf32> -> vector<2x2xf32>
    %511 = arith.addf %503, %510 : vector<2x2xf32>
    %c2_392 = arith.constant 2 : index
    %c0_393 = arith.constant 0 : index
    %c0_394 = arith.constant 0 : index
    %512 = vector.load %arg23[%c2_392, %c0_393, %c0_394] : memref<4x2x3xbf16, #tpu.memory_space<vmem>>, vector<1x2x3xbf16>
    %513 = vector.shape_cast %512 : vector<1x2x3xbf16> to vector<2x3xbf16>
    %cst_395 = arith.constant dense<0.000000e+00> : vector<2x192xf32>
    %514 = tpu.matmul %513, %458, %cst_395 {dimension_numbers = #tpu.dot_dimension_numbers<[1], [0], [0], [1], [0, 0, 1, 1], [], []>} : vector<2x3xbf16>, vector<3x192xbf16>, vector<2x192xf32> -> vector<2x192xf32>
    %515 = arith.truncf %514 : vector<2x192xf32> to vector<2x192xbf16>
    %c2_396 = arith.constant 2 : index
    %c0_397 = arith.constant 0 : index
    %c0_398 = arith.constant 0 : index
    %516 = vector.load %arg24[%c2_396, %c0_397, %c0_398] : memref<4x192x2xbf16, #tpu.memory_space<vmem>>, vector<1x192x2xbf16>
    %517 = vector.shape_cast %516 : vector<1x192x2xbf16> to vector<192x2xbf16>
    %cst_399 = arith.constant dense<0.000000e+00> : vector<2x2xf32>
    %518 = tpu.matmul %515, %517, %cst_399 {dimension_numbers = #tpu.dot_dimension_numbers<[1], [0], [0], [1], [0, 0, 1, 1], [], []>} : vector<2x192xbf16>, vector<192x2xbf16>, vector<2x2xf32> -> vector<2x2xf32>
    %519 = arith.addf %511, %518 : vector<2x2xf32>
    %c3_400 = arith.constant 3 : index
    %c0_401 = arith.constant 0 : index
    %c0_402 = arith.constant 0 : index
    %520 = vector.load %arg23[%c3_400, %c0_401, %c0_402] : memref<4x2x3xbf16, #tpu.memory_space<vmem>>, vector<1x2x3xbf16>
    %521 = vector.shape_cast %520 : vector<1x2x3xbf16> to vector<2x3xbf16>
    %cst_403 = arith.constant dense<0.000000e+00> : vector<2x192xf32>
    %522 = tpu.matmul %521, %458, %cst_403 {dimension_numbers = #tpu.dot_dimension_numbers<[1], [0], [0], [1], [0, 0, 1, 1], [], []>} : vector<2x3xbf16>, vector<3x192xbf16>, vector<2x192xf32> -> vector<2x192xf32>
    %523 = arith.truncf %522 : vector<2x192xf32> to vector<2x192xbf16>
    %c3_404 = arith.constant 3 : index
    %c0_405 = arith.constant 0 : index
    %c0_406 = arith.constant 0 : index
    %524 = vector.load %arg24[%c3_404, %c0_405, %c0_406] : memref<4x192x2xbf16, #tpu.memory_space<vmem>>, vector<1x192x2xbf16>
    %525 = vector.shape_cast %524 : vector<1x192x2xbf16> to vector<192x2xbf16>
    %cst_407 = arith.constant dense<0.000000e+00> : vector<2x2xf32>
    %526 = tpu.matmul %523, %525, %cst_407 {dimension_numbers = #tpu.dot_dimension_numbers<[1], [0], [0], [1], [0, 0, 1, 1], [], []>} : vector<2x192xbf16>, vector<192x2xbf16>, vector<2x2xf32> -> vector<2x2xf32>
    %527 = arith.addf %519, %526 : vector<2x2xf32>
    %528 = vector.broadcast %459 : vector<1x2xf32> to vector<2x2xf32>
    %529 = arith.addf %527, %528 : vector<2x2xf32>
    %530 = arith.negf %494 : vector<2x2xf32>
    %531 = math.exp %530 : vector<2x2xf32>
    %cst_408 = arith.constant 1.000000e+00 : f32
    %532 = vector.broadcast %cst_408 : f32 to vector<2x2xf32>
    %533 = arith.addf %532, %531 : vector<2x2xf32>
    %534 = arith.divf %532, %533 : vector<2x2xf32>
    %c0_409 = arith.constant 0 : index
    %c0_410 = arith.constant 0 : index
    %535 = vector.load %arg26[%c0_409, %c0_410] : memref<4x2xf32, #tpu.memory_space<vmem>>, vector<2x2xf32>
    tpu.vector_store %arg26[%c0_409, %c0_410], %534 {strides = array<i32>} : memref<4x2xf32, #tpu.memory_space<vmem>>, vector<2x2xf32>,
    %536 = arith.negf %529 : vector<2x2xf32>
    %537 = math.exp %536 : vector<2x2xf32>
    %cst_411 = arith.constant 1.000000e+00 : f32
    %538 = vector.broadcast %cst_411 : f32 to vector<2x2xf32>
    %539 = arith.addf %538, %537 : vector<2x2xf32>
    %540 = arith.divf %538, %539 : vector<2x2xf32>
    %c2_412 = arith.constant 2 : index
    %c0_413 = arith.constant 0 : index
    %541 = vector.load %arg26[%c2_412, %c0_413] : memref<4x2xf32, #tpu.memory_space<vmem>>, vector<2x2xf32>
    tpu.vector_store %arg26[%c2_412, %c0_413], %540 {strides = array<i32>} : memref<4x2xf32, #tpu.memory_space<vmem>>, vector<2x2xf32>,
    return
  }
  func.func @transform_0(%arg0: i32) -> (i32, i32, i32) {
    %c0_i32 = arith.constant 0 : i32
    %c0_i32_0 = arith.constant 0 : i32
    %c0_i32_1 = arith.constant 0 : i32
    %c0_i32_2 = arith.constant 0 : i32
    return %c0_i32, %c0_i32_0, %c0_i32_1 : i32, i32, i32
  }
  func.func @transform_1(%arg0: i32) -> (i32, i32, i32) {
    %c0_i32 = arith.constant 0 : i32
    %c0_i32_0 = arith.constant 0 : i32
    %c0_i32_1 = arith.constant 0 : i32
    %c0_i32_2 = arith.constant 0 : i32
    return %c0_i32, %c0_i32_0, %c0_i32_1 : i32, i32, i32
  }
  func.func @transform_2(%arg0: i32) -> (i32, i32, i32) {
    %c0_i32 = arith.constant 0 : i32
    %c0_i32_0 = arith.constant 0 : i32
    %c0_i32_1 = arith.constant 0 : i32
    %c0_i32_2 = arith.constant 0 : i32
    return %c0_i32, %c0_i32_0, %c0_i32_1 : i32, i32, i32
  }
  func.func @transform_3(%arg0: i32) -> (i32, i32) {
    %c0_i32 = arith.constant 0 : i32
    %c0_i32_0 = arith.constant 0 : i32
    %c0_i32_1 = arith.constant 0 : i32
    return %c0_i32, %c0_i32_0 : i32, i32
  }
  func.func @transform_4(%arg0: i32) -> (i32, i32, i32) {
    %c0_i32 = arith.constant 0 : i32
    %c0_i32_0 = arith.constant 0 : i32
    %c0_i32_1 = arith.constant 0 : i32
    %c0_i32_2 = arith.constant 0 : i32
    return %c0_i32, %c0_i32_0, %c0_i32_1 : i32, i32, i32
  }
  func.func @transform_5(%arg0: i32) -> (i32, i32, i32) {
    %c0_i32 = arith.constant 0 : i32
    %c0_i32_0 = arith.constant 0 : i32
    %c0_i32_1 = arith.constant 0 : i32
    %c0_i32_2 = arith.constant 0 : i32
    return %c0_i32, %c0_i32_0, %c0_i32_1 : i32, i32, i32
  }
  func.func @transform_6(%arg0: i32) -> (i32, i32) {
    %c0_i32 = arith.constant 0 : i32
    %c0_i32_0 = arith.constant 0 : i32
    %c0_i32_1 = arith.constant 0 : i32
    return %c0_i32, %c0_i32_0 : i32, i32
  }
  func.func @transform_7(%arg0: i32) -> (i32, i32) {
    %c0_i32 = arith.constant 0 : i32
    %c0_i32_0 = arith.constant 0 : i32
    %c0_i32_1 = arith.constant 0 : i32
    return %c0_i32, %c0_i32_0 : i32, i32
  }
  func.func @transform_8(%arg0: i32) -> (i32, i32) {
    %c0_i32 = arith.constant 0 : i32
    %c0_i32_0 = arith.constant 0 : i32
    %c0_i32_1 = arith.constant 0 : i32
    return %c0_i32, %c0_i32_0 : i32, i32
  }
  func.func @transform_9(%arg0: i32) -> (i32, i32) {
    %c0_i32 = arith.constant 0 : i32
    %c0_i32_0 = arith.constant 0 : i32
    %c0_i32_1 = arith.constant 0 : i32
    return %c0_i32, %c0_i32_0 : i32, i32
  }
  func.func @transform_10(%arg0: i32) -> (i32, i32, i32) {
    %c0_i32 = arith.constant 0 : i32
    %c0_i32_0 = arith.constant 0 : i32
    %c0_i32_1 = arith.constant 0 : i32
    %c0_i32_2 = arith.constant 0 : i32
    return %c0_i32, %c0_i32_0, %c0_i32_1 : i32, i32, i32
  }
  func.func @transform_11(%arg0: i32) -> (i32, i32, i32) {
    %c0_i32 = arith.constant 0 : i32
    %c0_i32_0 = arith.constant 0 : i32
    %c0_i32_1 = arith.constant 0 : i32
    %c0_i32_2 = arith.constant 0 : i32
    return %c0_i32, %c0_i32_0, %c0_i32_1 : i32, i32, i32
  }
  func.func @transform_12(%arg0: i32) -> (i32, i32) {
    %c0_i32 = arith.constant 0 : i32
    %c0_i32_0 = arith.constant 0 : i32
    %c0_i32_1 = arith.constant 0 : i32
    return %c0_i32, %c0_i32_0 : i32, i32
  }
  func.func @transform_13(%arg0: i32) -> (i32, i32) {
    %c0_i32 = arith.constant 0 : i32
    %c0_i32_0 = arith.constant 0 : i32
    %c0_i32_1 = arith.constant 0 : i32
    return %c0_i32, %c0_i32_0 : i32, i32
  }
  func.func @transform_14(%arg0: i32) -> (i32, i32) {
    %c0_i32 = arith.constant 0 : i32
    %c0_i32_0 = arith.constant 0 : i32
    %c0_i32_1 = arith.constant 0 : i32
    return %c0_i32, %c0_i32_0 : i32, i32
  }
  func.func @transform_15(%arg0: i32) -> (i32, i32) {
    %c0_i32 = arith.constant 0 : i32
    %c0_i32_0 = arith.constant 0 : i32
    %c0_i32_1 = arith.constant 0 : i32
    return %c0_i32, %c0_i32_0 : i32, i32
  }
  func.func @transform_16(%arg0: i32) -> (i32, i32, i32) {
    %c0_i32 = arith.constant 0 : i32
    %c0_i32_0 = arith.constant 0 : i32
    %c0_i32_1 = arith.constant 0 : i32
    %c0_i32_2 = arith.constant 0 : i32
    return %c0_i32, %c0_i32_0, %c0_i32_1 : i32, i32, i32
  }
  func.func @transform_17(%arg0: i32) -> (i32, i32, i32) {
    %c0_i32 = arith.constant 0 : i32
    %c0_i32_0 = arith.constant 0 : i32
    %c0_i32_1 = arith.constant 0 : i32
    %c0_i32_2 = arith.constant 0 : i32
    return %c0_i32, %c0_i32_0, %c0_i32_1 : i32, i32, i32
  }
  func.func @transform_18(%arg0: i32) -> (i32, i32) {
    %c0_i32 = arith.constant 0 : i32
    %c0_i32_0 = arith.constant 0 : i32
    %c0_i32_1 = arith.constant 0 : i32
    return %c0_i32, %c0_i32_0 : i32, i32
  }
  func.func @transform_19(%arg0: i32) -> (i32, i32) {
    %c0_i32 = arith.constant 0 : i32
    %c0_i32_0 = arith.constant 0 : i32
    %c0_i32_1 = arith.constant 0 : i32
    return %c0_i32, %c0_i32_0 : i32, i32
  }
  func.func @transform_20(%arg0: i32) -> (i32, i32) {
    %c0_i32 = arith.constant 0 : i32
    %c0_i32_0 = arith.constant 0 : i32
    %c0_i32_1 = arith.constant 0 : i32
    return %c0_i32, %c0_i32_0 : i32, i32
  }
  func.func @transform_21(%arg0: i32) -> (i32, i32) {
    %c0_i32 = arith.constant 0 : i32
    %c0_i32_0 = arith.constant 0 : i32
    %c0_i32_1 = arith.constant 0 : i32
    return %c0_i32, %c0_i32_0 : i32, i32
  }
  func.func @transform_22(%arg0: i32) -> (i32, i32, i32) {
    %c0_i32 = arith.constant 0 : i32
    %c0_i32_0 = arith.constant 0 : i32
    %c0_i32_1 = arith.constant 0 : i32
    %c0_i32_2 = arith.constant 0 : i32
    return %c0_i32, %c0_i32_0, %c0_i32_1 : i32, i32, i32
  }
  func.func @transform_23(%arg0: i32) -> (i32, i32, i32) {
    %c0_i32 = arith.constant 0 : i32
    %c0_i32_0 = arith.constant 0 : i32
    %c0_i32_1 = arith.constant 0 : i32
    %c0_i32_2 = arith.constant 0 : i32
    return %c0_i32, %c0_i32_0, %c0_i32_1 : i32, i32, i32
  }
  func.func @transform_24(%arg0: i32) -> (i32, i32) {
    %c0_i32 = arith.constant 0 : i32
    %c0_i32_0 = arith.constant 0 : i32
    %c0_i32_1 = arith.constant 0 : i32
    return %c0_i32, %c0_i32_0 : i32, i32
  }
  func.func @transform_25(%arg0: i32) -> (i32, i32) {
    %c0_i32 = arith.constant 0 : i32
    %c0_i32_0 = arith.constant 0 : i32
    %c0_i32_1 = arith.constant 0 : i32
    return %c0_i32, %c0_i32_0 : i32, i32
  }
}

</mosaic_0001>

<bundles_post_ra>
// kernel: tpu_custom_call.1
= control target key start
LH: loop header
LB: loop body
LE: loop exit
PB: predicated region body
PF: predicated region fallthrough
CT: control target
= control target key end

     0   :  { %s11110_s0 = inlined_call_operand.vmem [shape: bf16[2,32,128], index: 0, kind: input, shape index: {}]   ;;  %s11111_s1 = inlined_call_operand.hbm [shape: bf16[4,16,32], index: 1, kind: input, shape index: {}]   ;;  %s11112_s2 = inlined_call_operand.vmem [shape: bf16[4,128,128], index: 2, kind: input, shape index: {}]   ;;  %s11113_s3 = inlined_call_operand.hbm [shape: f32[1,128], index: 3, kind: input, shape index: {}]   ;;  %s11114_s4 = inlined_call_operand.vmem [shape: bf16[4,8,16], index: 4, kind: input, shape index: {}]   ;;  %s11115_s5 = inlined_call_operand.vmem [shape: bf16[4,128,128], index: 5, kind: input, shape index: {}]   ;;  %s11116_s6 = inlined_call_operand.hbm [shape: f32[1,128], index: 6, kind: input, shape index: {}]   ;;  %s11117_s7 = inlined_call_operand.hbm [shape: f32[128,128], index: 7, kind: input, shape index: {}]   ;;  %s11118_s8 = inlined_call_operand.hbm [shape: f32[1,128], index: 8, kind: input, shape index: {}]   ;;  %s11119_s9 = inlined_call_operand.hbm [shape: f32[1,128], index: 9, kind: input, shape index: {}]   ;;  %s11120_s10 = inlined_call_operand.hbm [shape: bf16[4,4,8], index: 10, kind: input, shape index: {}]   ;;  %s11121_s11 = inlined_call_operand.hbm [shape: bf16[4,128,128], index: 11, kind: input, shape index: {}]   ;;  %s11122_s12 = inlined_call_operand.hbm [shape: f32[1,128], index: 12, kind: input, shape index: {}]   ;;  %s11123_s13 = inlined_call_operand.hbm [shape: f32[128,128], index: 13, kind: input, shape index: {}]   ;;  %s11124_s14 = inlined_call_operand.hbm [shape: f32[1,128], index: 14, kind: input, shape index: {}]   ;;  %s11125_s15 = inlined_call_operand.hbm [shape: f32[1,128], index: 15, kind: input, shape index: {}]   ;;  %s11126_s16 = inlined_call_operand.vmem [shape: bf16[4,3,4], index: 16, kind: input, shape index: {}]   ;;  %s11127_s17 = inlined_call_operand.vmem [shape: bf16[4,128,192], index: 17, kind: input, shape index: {}]   ;;  %s11128_s18 = inlined_call_operand.vmem [shape: f32[1,192], index: 18, kind: input, shape index: {}]   ;;  %s11129_s19 = inlined_call_operand.vmem [shape: f32[192,192], index: 19, kind: input, shape index: {}]   ;;  %s11130_s20 = inlined_call_operand.vmem [shape: f32[1,192], index: 20, kind: input, shape index: {}]   ;;  %s11131_s21 = inlined_call_operand.vmem [shape: f32[1,192], index: 21, kind: input, shape index: {}]   ;;  %s11132_s22 = inlined_call_operand.vmem [shape: bf16[4,2,3], index: 22, kind: input, shape index: {}]   ;;  %s11133_s23 = inlined_call_operand.vmem [shape: bf16[4,192,2], index: 23, kind: input, shape index: {}]   ;;  %s11134_s24 = inlined_call_operand.hbm [shape: f32[1,2], index: 24, kind: input, shape index: {}]   ;;  %s11135_s25 = inlined_call_operand.vmem [shape: f32[4,2], index: 25, kind: output, shape index: {}]  }
   0x1   :  { %11175 = sst [smem:[#allocation52_spill]] %s11110_s0 }
   0x2   :  { %11176 = sst [smem:[#allocation53_spill]] %s11111_s1 }
   0x3   :  { %11177 = sst [smem:[#allocation54_spill]] %s11112_s2 }
   0x4   :  { %11178 = sst [smem:[#allocation55_spill]] %s11113_s3 }
   0x5   :  { %11179 = sst [smem:[#allocation56_spill]] %s11114_s4 }
   0x6   :  { %11180 = sst [smem:[#allocation57_spill]] %s11115_s5 }
   0x7   :  { %11181 = sst [smem:[#allocation58_spill]] %s11116_s6 }
   0x8   :  { %11182 = sst [smem:[#allocation59_spill]] %s11117_s7 }
   0x9   :  { %11183 = sst [smem:[#allocation60_spill]] %s11118_s8 }
   0xa   :  { %11184 = sst [smem:[#allocation61_spill]] %s11119_s9 }
   0xb   :  { %30 = vsyncpa [#allocation3], 0 }
   0xc   :  { %31 = vsyncpa [#allocation5], 0 }
   0xd   :  { %32 = vsyncpa [#allocation8], 0 }
   0xe   :  { %33 = vsyncpa [#allocation11], 0 }
   0xf   :  { %34 = vsyncpa [#allocation14], 0 }
  0x10   :  { %35 = vsyncpa [#allocation17], 0 }
  0x11   :  { %36 = vsyncpa [#allocation20], 0  ;;  %s8457_s29 = smov [#allocation4]   ;;  %s8458_s6 = smov [#allocation7]  }
  0x12   :  { %s59_s2 = sshll.u32 %s8457_s29, 4  ;;  %s82_s30 = sshll.u32 %s8458_s6, 4  ;;  %s60_s2 = int_to_ptr.vmem [resolvable:$true] %s59_s2  ;;  %s83_s30 = int_to_ptr.vmem [resolvable:$true] %s82_s30 }
  0x13   :  { %s8191_s7 = scalar_lea.vmem %s60_s2, 16  ;;  %s8195_s3 = scalar_lea.vmem %s60_s2, 32 }
  0x14   :  { %p8192_p0 = scmp.ne.s32.totalorder %s60_s2, %s8191_s7  ;;  %p8196_p1 = scmp.lt.s32.totalorder %s60_s2, %s60_s2 }
  0x15   :  { %p8197_p2 = scmp.lt.s32.totalorder %s8195_s3, %s8191_s7 }
  0x17   :  { %p8198_p3 = por %p8197_p2, %p8196_p1 }
  0x19   :  { %p8199_p4 = pnand %p8198_p3, %p8192_p0 }
  0x1b   :  { %8202 = shalt.err (!%p8199_p4)
}
  0x1c   :  { %s11185_s8 = sld [smem:[#allocation55_spill]]  ;;  %s8211_s27 = scalar_lea.vmem %s83_s30, 2048 }
  0x1d   :  { %p8212_p5 = scmp.ne.s32.totalorder %s83_s30, %s8211_s27  ;;  %p8216_p6 = scmp.lt.s32.totalorder %s83_s30, %s83_s30 }
  0x1e   :  { %p8217_p7 = scmp.lt.s32.totalorder %s8211_s27, %s8211_s27 }
  0x20   :  { %p8218_p8 = por %p8217_p7, %p8216_p6 }
  0x22   :  { %62 = dma.hbm_to_vmem [thread:$0]  %s11185_s8, 16, %s60_s2, [#allocation5]  }
  0x23   :  { %p8219_p9 = pnand %p8218_p8, %p8212_p5 }
  0x25   :  { %8222 = shalt.err (!%p8219_p9)
}
  0x26   :  { %s8459_s4 = smov 128   ;;  %s8460_s28 = smov 8  }
  0x27   :  { %s11186_s0 = sld [smem:[#allocation59_spill]]  ;;  %s8461_s29 = smov [#allocation10]  }
  0x28   :  { %s105_s6 = sshll.u32 %s8461_s29, 4  ;;  %s106_s6 = int_to_ptr.vmem [resolvable:$true] %s105_s6 }
  0x29   :  { %s8231_s2 = scalar_lea.vmem %s106_s6, 16  ;;  %s8235_s7 = scalar_lea.vmem %s106_s6, 32 }
  0x2a   :  { %p8232_p10 = scmp.ne.s32.totalorder %s106_s6, %s8231_s2  ;;  %p8236_p11 = scmp.lt.s32.totalorder %s106_s6, %s106_s6 }
  0x2b   :  { %p8237_p12 = scmp.lt.s32.totalorder %s8235_s7, %s8231_s2 }
  0x2d   :  { %88 = dma.hbm_to_vmem [thread:$0]  %s11186_s0, 2048, %s83_s30, [#allocation8], %s8459_s4, %s8459_s4, %s8460_s28  }
  0x2e   :  { %p8238_p13 = por %p8237_p12, %p8236_p11 }
  0x30   :  { %p8239_p0 = pnand %p8238_p13, %p8232_p10 }
  0x32   :  { %8242 = shalt.err (!%p8239_p0)
}
  0x33   :  { %s11187_s1 = sld [smem:[#allocation61_spill]]  ;;  %s8462_s8 = smov [#allocation13]  }
  0x34   :  { %s126_s27 = sshll.u32 %s8462_s8, 4  ;;  %s8463_s9 = smov [#allocation16]   ;;  %s127_s27 = int_to_ptr.vmem [resolvable:$true] %s126_s27 }
  0x35   :  { %s148_s30 = sshll.u32 %s8463_s9, 4  ;;  %s8251_s5 = scalar_lea.vmem %s127_s27, 4096  ;;  %s149_s30 = int_to_ptr.vmem [resolvable:$true] %s148_s30 }
  0x36   :  { %p8252_p1 = scmp.ne.s32.totalorder %s127_s27, %s8251_s5  ;;  %p8256_p2 = scmp.lt.s32.totalorder %s127_s27, %s127_s27 }
  0x37   :  { %p8257_p3 = scmp.lt.s32.totalorder %s8251_s5, %s8251_s5 }
  0x39   :  { %108 = dma.hbm_to_vmem [thread:$0]  %s11187_s1, 16, %s106_s6, [#allocation11]  }
  0x3a   :  { %p8258_p4 = por %p8257_p3, %p8256_p2 }
  0x3c   :  { %p8259_p5 = pnand %p8258_p4, %p8252_p1 }
  0x3e   :  { %8262 = shalt.err (!%p8259_p5)
}
  0x3f   :  { %s8464_s0 = smov 64   ;;  %s8465_s29 = smov 4  }
  0x40   :  { %132 = dma.hbm_to_vmem [thread:$0]  %s11121_s11, 4096, %s127_s27, [#allocation14], %s8464_s0, %s8464_s0, %s8465_s29  }
  0x41   :  { %s8271_s6 = scalar_lea.vmem %s149_s30, 2048  ;;  %p8276_p7 = scmp.lt.s32.totalorder %s149_s30, %s149_s30 }
  0x42   :  { %p8272_p6 = scmp.ne.s32.totalorder %s149_s30, %s8271_s6  ;;  %p8277_p8 = scmp.lt.s32.totalorder %s8271_s6, %s8271_s6 }
  0x44   :  { %p8278_p9 = por %p8277_p8, %p8276_p7 }
  0x46   :  { %p8279_p10 = pnand %p8278_p9, %p8272_p6 }
  0x48   :  { %8282 = shalt.err (!%p8279_p10)
}
  0x49   :  { %154 = dma.hbm_to_vmem [thread:$0]  %s11123_s13, 2048, %s149_s30, [#allocation17], %s8459_s4, %s8459_s4, %s8460_s28  }
  0x4a   :  { %s8466_s1 = smov [#allocation19]   ;;  %s8467_s9 = smov [#allocation2]  }
  0x4b   :  { %s171_s8 = sshll.u32 %s8466_s1, 4  ;;  %s44_s11 = sshll.u32 %s8467_s9, 4  ;;  %s172_s8 = int_to_ptr.vmem [resolvable:$true] %s171_s8  ;;  %s45_s11 = int_to_ptr.vmem [resolvable:$true] %s44_s11 }
  0x4c   :  { %s8291_s27 = scalar_lea.vmem %s172_s8, 16  ;;  %s8295_s5 = scalar_lea.vmem %s172_s8, 32 }
  0x4d   :  { %p8292_p11 = scmp.ne.s32.totalorder %s172_s8, %s8291_s27  ;;  %p8296_p12 = scmp.lt.s32.totalorder %s172_s8, %s172_s8 }
  0x4e   :  { %p8297_p13 = scmp.lt.s32.totalorder %s8295_s5, %s8291_s27 }
  0x50   :  { %p8298_p0 = por %p8297_p13, %p8296_p12 }
  0x52   :  { %p8299_p1 = pnand %p8298_p0, %p8292_p11 }
  0x54   :  { %8302 = shalt.err (!%p8299_p1)
}
  0x55   :  { %174 = dma.hbm_to_vmem [thread:$0]  %s11125_s15, 16, %s172_s8, [#allocation20]  }
  0x56   :  { %s8311_s6 = scalar_lea.vmem %s45_s11, 512  ;;  %p8316_p3 = scmp.lt.s32.totalorder %s45_s11, %s45_s11 }
  0x57   :  { %p8312_p2 = scmp.ne.s32.totalorder %s45_s11, %s8311_s6  ;;  %p8317_p4 = scmp.lt.s32.totalorder %s8311_s6, %s8311_s6 }
  0x59   :  { %p8318_p5 = por %p8317_p4, %p8316_p3 }
  0x5b   :  { %p8319_p6 = pnand %p8318_p5, %p8312_p2 }
  0x5d   :  { %8322 = shalt.err (!%p8319_p6)
}
  0x5e   :  { %s11188_s28 = sld [smem:[#allocation53_spill]]  ;;  %s8468_s30 = smov [#allocation6]  }
  0x5f   :  { %s73_s3 = sshll.u32 %s8468_s30, 4  ;;  %s8469_s26 = smov [#allocation9]   ;;  %s74_s3 = int_to_ptr.vmem [resolvable:$true] %s73_s3 }
  0x60   :  { %s95_s15 = sshll.u32 %s8469_s26, 4  ;;  %s8331_s1 = scalar_lea.vmem %s74_s3, 16  ;;  %s96_s15 = int_to_ptr.vmem [resolvable:$true] %s95_s15 }
  0x61   :  { %p8332_p7 = scmp.ne.s32.totalorder %s74_s3, %s8331_s1  ;;  %s8335_s8 = scalar_lea.vmem %s74_s3, 32 }
  0x62   :  { %p8336_p8 = scmp.lt.s32.totalorder %s74_s3, %s74_s3  ;;  %p8337_p9 = scmp.lt.s32.totalorder %s8335_s8, %s8331_s1 }
  0x64   :  { %50 = dma.hbm_to_vmem [thread:$0]  %s11188_s28, 512, %s45_s11, [#allocation3], %s8464_s0, %s8464_s0, %s8465_s29  }
  0x65   :  { %p8338_p10 = por %p8337_p9, %p8336_p8 }
  0x67   :  { %p8339_p11 = pnand %p8338_p10, %p8332_p7 }
  0x69   :  { %8342 = shalt.err (!%p8339_p11)
}
  0x6a   :  { %s11189_s5 = sld [smem:[#allocation58_spill]]  ;;  %s8351_s2 = scalar_lea.vmem %s96_s15, 16 }
  0x6b   :  { %p8352_p12 = scmp.ne.s32.totalorder %s96_s15, %s8351_s2  ;;  %s8355_s0 = scalar_lea.vmem %s96_s15, 32 }
  0x6c   :  { %p8356_p13 = scmp.lt.s32.totalorder %s96_s15, %s96_s15  ;;  %p8357_p0 = scmp.lt.s32.totalorder %s8355_s0, %s8351_s2 }
  0x6e   :  { %p8358_p1 = por %p8357_p0, %p8356_p13 }
  0x70   :  { %76 = dma.hbm_to_vmem [thread:$0]  %s11189_s5, 16, %s74_s3, [#allocation5]  }
  0x71   :  { %p8359_p2 = pnand %p8358_p1, %p8352_p12 }
  0x73   :  { %8362 = shalt.err (!%p8359_p2)
}
  0x74   :  { %s11190_s7 = sld [smem:[#allocation60_spill]]  ;;  %s8470_s6 = smov [#allocation12]  }
  0x75   :  { %s114_s13 = sshll.u32 %s8470_s6, 4  ;;  %s115_s13 = int_to_ptr.vmem [resolvable:$true] %s114_s13 }
  0x76   :  { %s8371_s4 = scalar_lea.vmem %s115_s13, 128  ;;  %p8376_p4 = scmp.lt.s32.totalorder %s115_s13, %s115_s13 }
  0x77   :  { %p8372_p3 = scmp.ne.s32.totalorder %s115_s13, %s8371_s4  ;;  %p8377_p5 = scmp.lt.s32.totalorder %s8371_s4, %s8371_s4 }
  0x79   :  { %p8378_p6 = por %p8377_p5, %p8376_p4 }
  0x7a   :  { %98 = dma.hbm_to_vmem [thread:$0]  %s11190_s7, 16, %s96_s15, [#allocation8]  }
  0x7b   :  { %p8379_p7 = pnand %p8378_p6, %p8372_p3 }
  0x7d   :  { %8382 = shalt.err (!%p8379_p7)
}
  0x7e   :  { %s8471_s28 = smov 32   ;;  %s8472_s30 = smov 2  }
  0x7f   :  { %120 = dma.hbm_to_vmem [thread:$0]  %s11120_s10, 128, %s115_s13, [#allocation11], %s8471_s28, %s8471_s28, %s8472_s30  }
  0x80   :  { %s8473_s1 = smov [#allocation15]   ;;  %s8474_s9 = smov [#allocation18]  }
  0x81   :  { %s139_s8 = sshll.u32 %s8473_s1, 4  ;;  %s161_s15 = sshll.u32 %s8474_s9, 4  ;;  %s140_s8 = int_to_ptr.vmem [resolvable:$true] %s139_s8  ;;  %s162_s15 = int_to_ptr.vmem [resolvable:$true] %s161_s15 }
  0x82   :  { %s8391_s27 = scalar_lea.vmem %s140_s8, 16  ;;  %s8395_s5 = scalar_lea.vmem %s140_s8, 32 }
  0x83   :  { %p8392_p8 = scmp.ne.s32.totalorder %s140_s8, %s8391_s27  ;;  %p8396_p9 = scmp.lt.s32.totalorder %s140_s8, %s140_s8 }
  0x84   :  { %p8397_p10 = scmp.lt.s32.totalorder %s8395_s5, %s8391_s27 }
  0x86   :  { %p8398_p11 = por %p8397_p10, %p8396_p9 }
  0x88   :  { %p8399_p12 = pnand %p8398_p11, %p8392_p8 }
  0x8a   :  { %8402 = shalt.err (!%p8399_p12)
}
  0x8b   :  { %142 = dma.hbm_to_vmem [thread:$0]  %s11122_s12, 16, %s140_s8, [#allocation14]  }
  0x8c   :  { %s8411_s29 = scalar_lea.vmem %s162_s15, 16  ;;  %s8415_s10 = scalar_lea.vmem %s162_s15, 32 }
  0x8d   :  { %p8412_p13 = scmp.ne.s32.totalorder %s162_s15, %s8411_s29  ;;  %p8416_p0 = scmp.lt.s32.totalorder %s162_s15, %s162_s15 }
  0x8e   :  { %p8417_p1 = scmp.lt.s32.totalorder %s8415_s10, %s8411_s29 }
  0x90   :  { %p8418_p2 = por %p8417_p1, %p8416_p0 }
  0x92   :  { %p8419_p3 = pnand %p8418_p2, %p8412_p13 }
  0x94   :  { %8422 = shalt.err (!%p8419_p3)
}
  0x95   :  { %164 = dma.hbm_to_vmem [thread:$0]  %s11124_s14, 16, %s162_s15, [#allocation17]  }
  0x96   :  { %s8475_s6 = smov [#allocation21]  }
  0x97   :  { %s197_s13 = sshll.u32 %s8475_s6, 4  ;;  %s198_s13 = int_to_ptr.vmem [resolvable:$true] %s197_s13 }
  0x98   :  { %s8431_s4 = scalar_lea.vmem %s198_s13, 16  ;;  %s8435_s28 = scalar_lea.vmem %s198_s13, 32 }
  0x99   :  { %p8432_p4 = scmp.ne.s32.totalorder %s198_s13, %s8431_s4  ;;  %p8436_p5 = scmp.lt.s32.totalorder %s198_s13, %s198_s13 }
  0x9a   :  { %p8437_p6 = scmp.lt.s32.totalorder %s8435_s28, %s8431_s4 }
  0x9c   :  { %p8438_p7 = por %p8437_p6, %p8436_p5 }
  0x9e   :  { %p8439_p8 = pnand %p8438_p7, %p8432_p4 }
  0xa0   :  { %8442 = shalt.err (!%p8439_p8)
}
  0xa1   :  { %200 = dma.hbm_to_vmem [thread:$0]  %s11134_s24, 16, %s198_s13, [#allocation20]  }
  0xa2   :  { %8443 = dma.done.wait [#allocation3], 512  }
  0xa3   :  { %8444 = vsyncadd [#allocation3], 4294966784 }
  0xa4   :  { %8445 = dma.done.wait [#allocation5], 32  }
  0xa5   :  { %8446 = vsyncadd [#allocation5], 4294967264 }
  0xa6   :  { %8447 = dma.done.wait [#allocation8], 2064  }
  0xa7   :  { %8448 = vsyncadd [#allocation8], 4294965232 }
  0xa8   :  { %8449 = dma.done.wait [#allocation11], 144  }
  0xa9   :  { %8450 = vsyncadd [#allocation11], 4294967152 }
  0xaa   :  { %8451 = dma.done.wait [#allocation14], 4112  }
  0xab   :  { %8452 = vsyncadd [#allocation14], 4294963184 }
  0xac   :  { %8453 = dma.done.wait [#allocation17], 2064  }
  0xad   :  { %8454 = vsyncadd [#allocation17], 4294965232 }
  0xae   :  { %8455 = dma.done.wait [#allocation20], 32  }
  0xaf   :  { %8456 = vsyncadd [#allocation20], 4294967264  ;;  %v11142_v0 = vmov 0.0   ;;  %vm8477_vm0 = vmmov 0   ;;  %s11191_s3 = sld [smem:[#allocation52_spill]]  ;;  %v7915_v3 = vld [vmem:[#allocation2] sm:$0xff]  }
  0xb0   :  { %7061 = vmatprep.subr.bf16.mxu0 %v11142_v0  ;;  %7069 = vmatprep.subr.bf16.mxu1 %v11142_v0  ;;  %v7916_v4 = vld [vmem:[#allocation2 + $0x8] sm:$0xff]   ;;  %s11192_s15 = sld [smem:[#allocation54_spill]]  ;;  %vm270_vm1 = vcmask 261120   ;;  %v8810_v33 = vld [vmem:[#allocation2 + $0x10] sm:$0xff]   ;;  %v8834_v36 = vld [vmem:[#allocation2 + $0x18] sm:$0xff]   ;;  %vm1276_vm4 = vcmask 130048  }
  0xb1   :  { %7065 = vmatprep.mubr.msk.bf16.mxu0 %vm8477_vm0, %v11142_v0  ;;  %7073 = vmatprep.mubr.msk.bf16.mxu1 %vm8477_vm0, %v11142_v0  ;;  %s11193_s14 = sld [smem:[#allocation56_spill]]  ;;  %vm2439_vm8 = vcmask 1043456   ;;  %vm2435_vm9 = vcmask 64512   ;;  %vm3609_vm12 = vcmask 1041408   ;;  %vm3605_vm13 = vcmask 31744  }
  0xb2   :  { %s11194_s1 = sld [smem:[#allocation57_spill]]  ;;  %vm4705_vm15 = vcmask 518144  }
  0xb5   :  { %v8671_v1 = vld [vmem:[%s11191_s3 + $0x8] sm:$0xff]   ;;  %v8678_v2 = vld [vmem:[%s11191_s3] sm:$0xff]   ;;  %v8935_v62 = vld [vmem:[%s11191_s3 + $0x18] sm:$0xff]  }
  0xb6   :  { %7062 = vmatpush3.bf16.msra.mxu0 %v8671_v1  ;;  %7070 = vmatpush3.bf16.msra.mxu1 %v8671_v1  ;;  %v7917_v5 = vld [vmem:[%s11192_s15 + $0x78] sm:$0xff]   ;;  %v7919_v7 = vld [vmem:[%s11192_s15 + $0x70] sm:$0xff]   ;;  %v8709_v9 = vld [vmem:[%s11192_s15 + $0x68] sm:$0xff]  }
  0xb7   :  { %7063 = vmatprep.subr.bf16.mxu0 %v11142_v0  ;;  %7071 = vmatprep.subr.bf16.mxu1 %v11142_v0  ;;  %v7918_v6 = vld [vmem:[%s11192_s15 + $0x38] sm:$0xff]   ;;  %v7920_v8 = vld [vmem:[%s11192_s15 + $0x30] sm:$0xff]   ;;  %v8714_v10 = vld [vmem:[%s11192_s15 + $0x28] sm:$0xff]  }
  0xb8   :  { %v8721_v11 = vld [vmem:[%s11192_s15 + $0x60] sm:$0xff]   ;;  %v8735_v13 = vld [vmem:[%s11192_s15 + $0x58] sm:$0xff]   ;;  %v8749_v15 = vld [vmem:[%s11192_s15 + $0x50] sm:$0xff]  }
  0xb9   :  { %v8726_v12 = vld [vmem:[%s11192_s15 + $0x20] sm:$0xff]   ;;  %v8740_v14 = vld [vmem:[%s11192_s15 + $0x18] sm:$0xff]   ;;  %v8754_v16 = vld [vmem:[%s11192_s15 + $0x10] sm:$0xff]  }
  0xba   :  { %7064 = vmatpush3.bf16.msra.mxu0 %v8678_v2  ;;  %7072 = vmatpush3.bf16.msra.mxu1 %v8678_v2  ;;  %v8767_v17 = vld [vmem:[%s11192_s15 + $0x48] sm:$0xff]   ;;  %v8781_v19 = vld [vmem:[%s11192_s15 + $0x40] sm:$0xff]   ;;  %v8795_v29 = vld [vmem:[%s11192_s15 + $0xb8] sm:$0xff]  }
  0xbb   :  { %7077 = vmatprep.subr.bf16.mxu0 %v11142_v0  ;;  %7097 = vmatprep.subr.bf16.mxu1 %v11142_v0  ;;  %v8772_v18 = vld [vmem:[%s11192_s15 + $0x8] sm:$0xff]   ;;  %v8786_v20 = vld [vmem:[%s11192_s15] sm:$0xff]   ;;  %v8805_v32 = vld [vmem:[%s11192_s15 + $0xb0] sm:$0xff]  }
  0xbc   :  { %v8818_v34 = vld [vmem:[%s11192_s15 + $0xa8] sm:$0xff]   ;;  %v8831_v35 = vld [vmem:[%s11192_s15 + $0xa0] sm:$0xff]   ;;  %v8840_v37 = vld [vmem:[%s11192_s15 + $0xf8] sm:$0xff]  }
  0xbd   :  { %7066 = vmatmul.mubr.msk.bf16.vlgmr.msra.gmra.mxu0 %vm270_vm1, %v7915_v3  ;;  %7074 = vmatmul.mubr.msk.bf16.vlgmr.msra.gmra.mxu1 %vm270_vm1, %v7916_v4  ;;  %v8851_v38 = vld [vmem:[%s11192_s15 + $0xf0] sm:$0xff]   ;;  %v8861_v39 = vld [vmem:[%s11192_s15 + $0x98] sm:$0xff]   ;;  %v8866_v40 = vld [vmem:[%s11192_s15 + $0xe8] sm:$0xff]  }
  0xbe   :  { %7078 = vmatpush3.bf16.msra.mxu0 %v7917_v5  ;;  %7098 = vmatpush3.bf16.msra.mxu1 %v7918_v6  ;;  %v8875_v41 = vld [vmem:[%s11192_s15 + $0x90] sm:$0xff]   ;;  %v8880_v42 = vld [vmem:[%s11192_s15 + $0xe0] sm:$0xff]   ;;  %v8889_v43 = vld [vmem:[%s11192_s15 + $0x88] sm:$0xff]  }
  0xbf   :  { %7079 = vmatprep.subr.bf16.mxu0 %v11142_v0  ;;  %7099 = vmatprep.subr.bf16.mxu1 %v11142_v0  ;;  %v8894_v44 = vld [vmem:[%s11192_s15 + $0xd8] sm:$0xff]   ;;  %v8903_v45 = vld [vmem:[%s11192_s15 + $0x80] sm:$0xff]   ;;  %v8908_v46 = vld [vmem:[%s11192_s15 + $0xd0] sm:$0xff]  }
  0xc0   :  { %7093 = vmatprep.mubr.msk.bf16.mxu0 %vm8477_vm0, %v11142_v0  ;;  %7113 = vmatprep.mubr.msk.bf16.mxu1 %vm8477_vm0, %v11142_v0  ;;  %v8917_v47 = vld [vmem:[%s11192_s15 + $0xc8] sm:$0xff]   ;;  %v8924_v48 = vld [vmem:[%s11192_s15 + $0xc0] sm:$0xff]   ;;  %v8941_v3 = vld [vmem:[%s11191_s3 + $0x10] sm:$0xff]  }
  0xc2   :  { %7080 = vmatpush3.bf16.msra.mxu0 %v7919_v7  ;;  %7100 = vmatpush3.bf16.msra.mxu1 %v7920_v8  ;;  %v8177_v8 = vld [vmem:[#allocation2] sm:$0xff]  }
  0xc3   :  { %7081 = vmatprep.subr.bf16.mxu0 %v11142_v0  ;;  %7101 = vmatprep.subr.bf16.mxu1 %v11142_v0 }
  0xc6   :  { %7082 = vmatpush3.bf16.msra.mxu0 %v8709_v9  ;;  %7102 = vmatpush3.bf16.msra.mxu1 %v8714_v10 }
  0xc7   :  { %7083 = vmatprep.subr.bf16.mxu0 %v11142_v0  ;;  %7103 = vmatprep.subr.bf16.mxu1 %v11142_v0 }
  0xca   :  { %7084 = vmatpush3.bf16.msra.mxu0 %v8721_v11  ;;  %7104 = vmatpush3.bf16.msra.mxu1 %v8726_v12 }
  0xcb   :  { %7085 = vmatprep.subr.bf16.mxu0 %v11142_v0  ;;  %7105 = vmatprep.subr.bf16.mxu1 %v11142_v0 }
  0xce   :  { %7086 = vmatpush3.bf16.msra.mxu0 %v8735_v13  ;;  %7106 = vmatpush3.bf16.msra.mxu1 %v8740_v14 }
  0xcf   :  { %7087 = vmatprep.subr.bf16.mxu0 %v11142_v0  ;;  %7107 = vmatprep.subr.bf16.mxu1 %v11142_v0 }
  0xd2   :  { %7088 = vmatpush3.bf16.msra.mxu0 %v8749_v15  ;;  %7108 = vmatpush3.bf16.msra.mxu1 %v8754_v16 }
  0xd3   :  { %7089 = vmatprep.subr.bf16.mxu0 %v11142_v0  ;;  %7109 = vmatprep.subr.bf16.mxu1 %v11142_v0 }
  0xd6   :  { %7090 = vmatpush3.bf16.msra.mxu0 %v8767_v17  ;;  %7110 = vmatpush3.bf16.msra.mxu1 %v8772_v18 }
  0xd7   :  { %7091 = vmatprep.subr.bf16.mxu0 %v11142_v0  ;;  %7111 = vmatprep.subr.bf16.mxu1 %v11142_v0 }
  0xda   :  { %7092 = vmatpush3.bf16.msra.mxu0 %v8781_v19  ;;  %7112 = vmatpush3.bf16.msra.mxu1 %v8786_v20 }
  0xdb   :  { %7117 = vmatprep.subr.bf16.mxu0 %v11142_v0  ;;  %7125 = vmatprep.subr.bf16.mxu1 %v11142_v0 }
 0x17d   :  { %v308_v21 = vpop.f32.mrf.mxu0  ;;  %v377_v22 = vpop.f32.mrf.mxu1 }
 0x17f   :  { %v7067_v23 = vpop.f32.mrf.mxu0  ;;  %v7075_v24 = vpop.f32.mrf.mxu1 }
 0x180   :  { %v8180_v23 = vld [vmem:[#allocation2 + $0x8] sm:$0xff]   ;;  %v8181_v24 = vld [vmem:[%s11192_s15 + $0x38] sm:$0xff]  }
 0x181   :  { %v311_v25 = vpop.f32.mrf.mxu0  ;;  %v380_v26 = vpop.f32.mrf.mxu1 }
 0x182   :  { %v315_v27 = vpack.c.bf16 %v311_v25, %v308_v21  ;;  %v384_v28 = vpack.c.bf16 %v380_v26, %v377_v22  ;;  %v8178_v21 = vld [vmem:[%s11192_s15 + $0x78] sm:$0xff]   ;;  %v8179_v22 = vld [vmem:[%s11192_s15 + $0x70] sm:$0xff]  }
 0x183   :  { %v7076_v30 = vpop.f32.mrf.mxu1  ;;  %v7068_v31 = vpop.f32.mrf.mxu0  ;;  %v8182_v25 = vld [vmem:[%s11192_s15 + $0x30] sm:$0xff]  }
 0x184   :  { %7094 = vmatmul.mubr.bf16.vlgmr.msra.gmra.mxu0 %v384_v28  ;;  %7114 = vmatmul.mubr.bf16.vlgmr.msra.gmra.mxu1 %v315_v27 }
 0x185   :  { %7118 = vmatpush3.bf16.msra.mxu0 %v8671_v1  ;;  %7121 = vmatprep.mubr.msk.bf16.mxu0 %vm8477_vm0, %v11142_v0 }
 0x186   :  { %7119 = vmatprep.subr.bf16.mxu0 %v11142_v0  ;;  %7126 = vmatpush3.bf16.msra.mxu1 %v8795_v29 }
 0x187   :  { %7127 = vmatprep.subr.bf16.mxu1 %v11142_v0  ;;  %7141 = vmatprep.mubr.msk.bf16.mxu1 %vm8477_vm0, %v11142_v0 }
 0x189   :  { %7120 = vmatpush3.bf16.msra.mxu0 %v8678_v2 }
 0x18a   :  { %7145 = vmatprep.subr.bf16.mxu0 %v11142_v0  ;;  %7128 = vmatpush3.bf16.msra.mxu1 %v8805_v32 }
 0x18b   :  { %7129 = vmatprep.subr.bf16.mxu1 %v11142_v0 }
 0x18c   :  { %7122 = vmatmul.mubr.msk.bf16.vlgmr.msra.gmra.mxu0 %vm270_vm1, %v8810_v33 }
 0x18d   :  { %7146 = vmatpush3.bf16.msra.mxu0 %v8671_v1  ;;  %7149 = vmatprep.mubr.msk.bf16.mxu0 %vm8477_vm0, %v11142_v0 }
 0x18e   :  { %7147 = vmatprep.subr.bf16.mxu0 %v11142_v0  ;;  %7130 = vmatpush3.bf16.msra.mxu1 %v8818_v34 }
 0x18f   :  { %7131 = vmatprep.subr.bf16.mxu1 %v11142_v0 }
 0x191   :  { %7148 = vmatpush3.bf16.msra.mxu0 %v8678_v2 }
 0x192   :  { %7153 = vmatprep.subr.bf16.mxu0 %v11142_v0  ;;  %7132 = vmatpush3.bf16.msra.mxu1 %v8831_v35 }
 0x193   :  { %7133 = vmatprep.subr.bf16.mxu1 %v11142_v0 }
 0x194   :  { %7150 = vmatmul.mubr.msk.bf16.vlgmr.msra.gmra.mxu0 %vm270_vm1, %v8834_v36 }
 0x195   :  { %7154 = vmatpush3.bf16.msra.mxu0 %v8840_v37  ;;  %7169 = vmatprep.mubr.msk.bf16.mxu0 %vm8477_vm0, %v11142_v0 }
 0x196   :  { %7155 = vmatprep.subr.bf16.mxu0 %v11142_v0  ;;  %7134 = vmatpush3.bf16.msra.mxu1 %v8861_v39 }
 0x197   :  { %7135 = vmatprep.subr.bf16.mxu1 %v11142_v0 }
 0x199   :  { %7156 = vmatpush3.bf16.msra.mxu0 %v8851_v38 }
 0x19a   :  { %7157 = vmatprep.subr.bf16.mxu0 %v11142_v0  ;;  %7136 = vmatpush3.bf16.msra.mxu1 %v8875_v41 }
 0x19b   :  { %7137 = vmatprep.subr.bf16.mxu1 %v11142_v0 }
 0x19d   :  { %7158 = vmatpush3.bf16.msra.mxu0 %v8866_v40 }
 0x19e   :  { %7159 = vmatprep.subr.bf16.mxu0 %v11142_v0  ;;  %7138 = vmatpush3.bf16.msra.mxu1 %v8889_v43 }
 0x19f   :  { %7139 = vmatprep.subr.bf16.mxu1 %v11142_v0 }
 0x1a1   :  { %7160 = vmatpush3.bf16.msra.mxu0 %v8880_v42 }
 0x1a2   :  { %7161 = vmatprep.subr.bf16.mxu0 %v11142_v0  ;;  %7140 = vmatpush3.bf16.msra.mxu1 %v8903_v45 }
 0x1a3   :  { %7173 = vmatprep.subr.bf16.mxu1 %v11142_v0 }
 0x1a5   :  { %7162 = vmatpush3.bf16.msra.mxu0 %v8894_v44 }
 0x1a6   :  { %7163 = vmatprep.subr.bf16.mxu0 %v11142_v0 }
 0x1a9   :  { %7164 = vmatpush3.bf16.msra.mxu0 %v8908_v46 }
 0x1aa   :  { %7165 = vmatprep.subr.bf16.mxu0 %v11142_v0 }
 0x1ad   :  { %7166 = vmatpush3.bf16.msra.mxu0 %v8917_v47 }
 0x1ae   :  { %7167 = vmatprep.subr.bf16.mxu0 %v11142_v0 }
 0x1b1   :  { %7168 = vmatpush3.bf16.msra.mxu0 %v8924_v48 }
 0x1b2   :  { %7189 = vmatprep.subr.bf16.mxu0 %v11142_v0 }
 0x244   :  { %v484_v49 = vpop.f32.mrf.mxu0  ;;  %v573_v50 = vpop.f32.mrf.mxu1 }
 0x245   :  { %v8928_v51 = vadd.f32 %v573_v50, %v484_v49 }
 0x246   :  { %v7095_v52 = vpop.f32.mrf.mxu0  ;;  %v7115_v53 = vpop.f32.mrf.mxu1 }
 0x248   :  { %v487_v54 = vpop.f32.mrf.mxu0  ;;  %v576_v55 = vpop.f32.mrf.mxu1 }
 0x249   :  { %v8930_v56 = vadd.f32 %v576_v55, %v487_v54 }
 0x24a   :  { %v7096_v57 = vpop.f32.mrf.mxu0  ;;  %v7116_v58 = vpop.f32.mrf.mxu1 }
 0x24c   :  { %v625_v59 = vpop.f32.mrf.mxu0 }
 0x24e   :  { %v7123_v60 = vpop.f32.mrf.mxu0 }
 0x250   :  { %v628_v61 = vpop.f32.mrf.mxu0 }
 0x251   :  { %v632_v63 = vpack.c.bf16 %v628_v61, %v625_v59 }
 0x252   :  { %v7124_v1 = vpop.f32.mrf.mxu0 }
 0x253   :  { %7142 = vmatmul.mubr.bf16.vlgmr.msra.gmra.mxu1 %v632_v63  ;;  %v9076_v1 = vld [vmem:[%s11194_s1 + $0x78] sm:$0xff]  }
 0x254   :  { %v786_v2 = vpop.f32.mrf.mxu0  ;;  %7174 = vmatpush3.bf16.msra.mxu1 %v8935_v62  ;;  %7177 = vmatprep.mubr.msk.bf16.mxu1 %vm8477_vm0, %v11142_v0 }
 0x255   :  { %7175 = vmatprep.subr.bf16.mxu1 %v11142_v0 }
 0x256   :  { %v7151_v4 = vpop.f32.mrf.mxu0 }
 0x257   :  { %v9096_v4 = vld [vmem:[%s11193_s14 + $0x4] sm:$0xf] }
 0x258   :  { %v789_v5 = vpop.f32.mrf.mxu0  ;;  %7176 = vmatpush3.bf16.msra.mxu1 %v8941_v3 }
 0x259   :  { %v793_v6 = vpack.c.bf16 %v789_v5, %v786_v2  ;;  %7181 = vmatprep.subr.bf16.mxu1 %v11142_v0  ;;  %v9101_v5 = vld [vmem:[%s11194_s1 + $0x38] sm:$0xff]  }
 0x25a   :  { %v7152_v7 = vpop.f32.mrf.mxu0 }
 0x25b   :  { %7170 = vmatmul.mubr.bf16.vlgmr.msra.gmra.mxu0 %v793_v6  ;;  %7178 = vmatmul.mubr.msk.bf16.vlgmr.msra.gmra.mxu1 %vm270_vm1, %v8177_v8  ;;  %v9107_v6 = vld [vmem:[%s11194_s1 + $0x68] sm:$0xff]   ;;  %v9116_v7 = vld [vmem:[%s11194_s1 + $0x30] sm:$0xff]   ;;  %v9125_v8 = vld [vmem:[%s11194_s1 + $0x60] sm:$0xff]  }
 0x25c   :  { %7182 = vmatpush3.bf16.msra.mxu1 %v8935_v62  ;;  %7185 = vmatprep.mubr.msk.bf16.mxu1 %vm8477_vm0, %v11142_v0 }
 0x25d   :  { %7183 = vmatprep.subr.bf16.mxu1 %v11142_v0  ;;  %7190 = vmatpush3.bf16.msra.mxu0 %v8178_v21  ;;  %v9132_v21 = vld [vmem:[%s11194_s1 + $0x28] sm:$0xff]  }
 0x25e   :  { %7191 = vmatprep.subr.bf16.mxu0 %v11142_v0  ;;  %7205 = vmatprep.mubr.msk.bf16.mxu0 %vm8477_vm0, %v11142_v0 }
 0x260   :  { %7184 = vmatpush3.bf16.msra.mxu1 %v8941_v3 }
 0x261   :  { %7209 = vmatprep.subr.bf16.mxu1 %v11142_v0  ;;  %7192 = vmatpush3.bf16.msra.mxu0 %v8179_v22  ;;  %v9141_v22 = vld [vmem:[%s11194_s1 + $0x20] sm:$0xff]  }
 0x262   :  { %7193 = vmatprep.subr.bf16.mxu0 %v11142_v0 }
 0x263   :  { %7186 = vmatmul.mubr.msk.bf16.vlgmr.msra.gmra.mxu1 %vm270_vm1, %v8180_v23  ;;  %v9148_v23 = vld [vmem:[%s11194_s1 + $0x18] sm:$0xff]  }
 0x264   :  { %7210 = vmatpush3.bf16.msra.mxu1 %v8181_v24  ;;  %7225 = vmatprep.mubr.msk.bf16.mxu1 %vm8477_vm0, %v11142_v0  ;;  %v9156_v24 = vld [vmem:[%s11194_s1 + $0x10] sm:$0xff]  }
 0x265   :  { %7211 = vmatprep.subr.bf16.mxu1 %v11142_v0  ;;  %7194 = vmatpush3.bf16.msra.mxu0 %v8709_v9 }
 0x266   :  { %7195 = vmatprep.subr.bf16.mxu0 %v11142_v0 }
 0x268   :  { %7212 = vmatpush3.bf16.msra.mxu1 %v8182_v25  ;;  %v9162_v25 = vld [vmem:[%s11194_s1 + $0x58] sm:$0xff]  }
 0x269   :  { %7213 = vmatprep.subr.bf16.mxu1 %v11142_v0  ;;  %7196 = vmatpush3.bf16.msra.mxu0 %v8721_v11 }
 0x26a   :  { %7197 = vmatprep.subr.bf16.mxu0 %v11142_v0 }
 0x26c   :  { %7214 = vmatpush3.bf16.msra.mxu1 %v8714_v10 }
 0x26d   :  { %7215 = vmatprep.subr.bf16.mxu1 %v11142_v0  ;;  %7198 = vmatpush3.bf16.msra.mxu0 %v8735_v13 }
 0x26e   :  { %7199 = vmatprep.subr.bf16.mxu0 %v11142_v0 }
 0x270   :  { %7216 = vmatpush3.bf16.msra.mxu1 %v8726_v12 }
 0x271   :  { %7217 = vmatprep.subr.bf16.mxu1 %v11142_v0  ;;  %7200 = vmatpush3.bf16.msra.mxu0 %v8749_v15  ;;  %v9002_v15 = vld [vmem:[#allocation4] ss:$0 sm:$0xff] }
 0x272   :  { %7201 = vmatprep.subr.bf16.mxu0 %v11142_v0 }
 0x274   :  { %7218 = vmatpush3.bf16.msra.mxu1 %v8740_v14 }
 0x275   :  { %7219 = vmatprep.subr.bf16.mxu1 %v11142_v0  ;;  %7202 = vmatpush3.bf16.msra.mxu0 %v8767_v17 }
 0x276   :  { %7203 = vmatprep.subr.bf16.mxu0 %v11142_v0 }
 0x278   :  { %7220 = vmatpush3.bf16.msra.mxu1 %v8754_v16 }
 0x279   :  { %7221 = vmatprep.subr.bf16.mxu1 %v11142_v0  ;;  %7204 = vmatpush3.bf16.msra.mxu0 %v8781_v19 }
 0x27a   :  { %7229 = vmatprep.subr.bf16.mxu0 %v11142_v0 }
 0x27c   :  { %7222 = vmatpush3.bf16.msra.mxu1 %v8772_v18 }
 0x27d   :  { %7223 = vmatprep.subr.bf16.mxu1 %v11142_v0 }
 0x280   :  { %7224 = vmatpush3.bf16.msra.mxu1 %v8786_v20 }
 0x281   :  { %7237 = vmatprep.subr.bf16.mxu1 %v11142_v0 }
 0x313   :  { %v732_v9 = vpop.f32.mrf.mxu1 }
 0x314   :  { %v739_v10 = vadd.f32 %v732_v9, %v8928_v51  ;;  %v9168_v9 = vld [vmem:[%s11194_s1 + $0x8] sm:$0xff]  }
 0x315   :  { %v7143_v11 = vpop.f32.mrf.mxu1 }
 0x316   :  { %v9182_v11 = vld [vmem:[%s11194_s1] sm:$0xff]  }
 0x317   :  { %v735_v12 = vpop.f32.mrf.mxu1 }
 0x318   :  { %v740_v13 = vadd.f32 %v735_v12, %v8930_v56  ;;  %v9190_v12 = vld [vmem:[%s11194_s1 + $0x48] sm:$0xff]  }
 0x319   :  { %v7144_v14 = vpop.f32.mrf.mxu1 }
 0x31b   :  { %v893_v16 = vpop.f32.mrf.mxu0  ;;  %v956_v17 = vpop.f32.mrf.mxu1 }
 0x31c   :  { %v900_v19 = vadd.f32 %v893_v16, %v739_v10  ;;  %v9176_v10 = vld [vmem:[%s11194_s1 + $0x50] sm:$0xff]  }
 0x31d   :  { %v7171_v18 = vpop.f32.mrf.mxu0  ;;  %v7179_v26 = vpop.f32.mrf.mxu1 }
 0x31e   :  { %v908_v27 = vadd.f32 %v9002_v15, %v900_v19 }
 0x31f   :  { %v896_v20 = vpop.f32.mrf.mxu0  ;;  %v959_v28 = vpop.f32.mrf.mxu1 }
 0x320   :  { %v901_v30 = vadd.f32 %v896_v20, %v740_v13  ;;  %v963_v31 = vpack.c.bf16 %v959_v28, %v956_v17  ;;  %v1262_v51 = vmul.f32 0.2, %v908_v27  ;;  %vm1260_vm2 = vcmp.gt.f32.partialorder %v908_v27, 0.0  ;;  %v9198_v13 = vld [vmem:[%s11194_s1 + $0x40] sm:$0xff]   ;;  %v9207_v28 = vld [vmem:[%s11194_s1 + $0xb8] sm:$0xff]  }
 0x321   :  { %v7180_v49 = vpop.f32.mrf.mxu1  ;;  %v7172_v50 = vpop.f32.mrf.mxu0 }
 0x322   :  { %v909_v52 = vadd.f32 %v9002_v15, %v901_v30  ;;  %7226 = vmatmul.mubr.bf16.vlgmr.msra.gmra.mxu1 %v963_v31  ;;  %v1264_v56 = vsel %vm1260_vm2, %v908_v27, %v1262_v51  ;;  %vm5061_vm2 = vcmask 1040384  }
 0x323   :  { %v998_v53 = vpop.f32.mrf.mxu1  ;;  %7238 = vmatpush3.bf16.msra.mxu1 %v8795_v29  ;;  %7253 = vmatprep.mubr.msk.bf16.mxu1 %vm8477_vm0, %v11142_v0 }
 0x324   :  { %vm1261_vm3 = vcmp.gt.f32.partialorder %v909_v52, 0.0  ;;  %v1263_v54 = vmul.f32 0.2, %v909_v52  ;;  %7239 = vmatprep.subr.bf16.mxu1 %v11142_v0 }
 0x325   :  { %v7187_v55 = vpop.f32.mrf.mxu1 }
 0x326   :  { %v1265_v57 = vsel %vm1261_vm3, %v909_v52, %v1263_v54  ;;  %v9214_v54 = vld [vmem:[%s11194_s1 + $0xb0] sm:$0xff]  }
 0x327   :  { %v1001_v58 = vpop.f32.mrf.mxu1  ;;  %7240 = vmatpush3.bf16.msra.mxu1 %v8805_v32  ;;  %v9011_v59 = vpack.c.bf16 %v1265_v57, %v1264_v56 }
 0x328   :  { %v1005_v60 = vpack.c.bf16 %v1001_v58, %v998_v53  ;;  %7241 = vmatprep.subr.bf16.mxu1 %v11142_v0 }
 0x329   :  { %v7188_v61 = vpop.f32.mrf.mxu1 }
 0x32a   :  { %7206 = vmatmul.mubr.bf16.vlgmr.msra.gmra.mxu0 %v1005_v60 }
 0x32b   :  { %7230 = vmatpush3.bf16.msra.mxu0 %v8935_v62  ;;  %7233 = vmatprep.mubr.msk.bf16.mxu0 %vm8477_vm0, %v11142_v0 }
 0x32c   :  { %7231 = vmatprep.subr.bf16.mxu0 %v11142_v0  ;;  %7242 = vmatpush3.bf16.msra.mxu1 %v8818_v34 }
 0x32d   :  { %7243 = vmatprep.subr.bf16.mxu1 %v11142_v0 }
 0x32f   :  { %7232 = vmatpush3.bf16.msra.mxu0 %v8941_v3 }
 0x330   :  { %7257 = vmatprep.subr.bf16.mxu0 %v11142_v0  ;;  %7244 = vmatpush3.bf16.msra.mxu1 %v8831_v35 }
 0x331   :  { %7245 = vmatprep.subr.bf16.mxu1 %v11142_v0 }
 0x332   :  { %7234 = vmatmul.mubr.msk.bf16.vlgmr.msra.gmra.mxu0 %vm270_vm1, %v8810_v33 }
 0x333   :  { %7258 = vmatpush3.bf16.msra.mxu0 %v8935_v62  ;;  %7261 = vmatprep.mubr.msk.bf16.mxu0 %vm8477_vm0, %v11142_v0  ;;  %v9071_v62 = vld [vmem:[%s11193_s14] sm:$0xf] }
 0x334   :  { %7259 = vmatprep.subr.bf16.mxu0 %v11142_v0  ;;  %7246 = vmatpush3.bf16.msra.mxu1 %v8861_v39 }
 0x335   :  { %7247 = vmatprep.subr.bf16.mxu1 %v11142_v0 }
 0x337   :  { %7260 = vmatpush3.bf16.msra.mxu0 %v8941_v3  ;;  %v9088_v3 = vld [vmem:[%s11194_s1 + $0x70] sm:$0xff]  }
 0x338   :  { %7265 = vmatprep.subr.bf16.mxu0 %v11142_v0  ;;  %7248 = vmatpush3.bf16.msra.mxu1 %v8875_v41 }
 0x339   :  { %7249 = vmatprep.subr.bf16.mxu1 %v11142_v0 }
 0x33a   :  { %7262 = vmatmul.mubr.msk.bf16.vlgmr.msra.gmra.mxu0 %vm270_vm1, %v8834_v36  ;;  %vm4815_vm1 = vcmask 523264  }
 0x33b   :  { %7266 = vmatpush3.bf16.msra.mxu0 %v8840_v37  ;;  %7281 = vmatprep.mubr.msk.bf16.mxu0 %vm8477_vm0, %v11142_v0 }
 0x33c   :  { %7267 = vmatprep.subr.bf16.mxu0 %v11142_v0  ;;  %7250 = vmatpush3.bf16.msra.mxu1 %v8889_v43 }
 0x33d   :  { %7251 = vmatprep.subr.bf16.mxu1 %v11142_v0 }
 0x33f   :  { %7268 = vmatpush3.bf16.msra.mxu0 %v8851_v38 }
 0x340   :  { %7269 = vmatprep.subr.bf16.mxu0 %v11142_v0  ;;  %7252 = vmatpush3.bf16.msra.mxu1 %v8903_v45 }
 0x341   :  { %7285 = vmatprep.subr.bf16.mxu1 %v11142_v0 }
 0x343   :  { %7270 = vmatpush3.bf16.msra.mxu0 %v8866_v40 }
 0x344   :  { %7271 = vmatprep.subr.bf16.mxu0 %v11142_v0 }
 0x347   :  { %7272 = vmatpush3.bf16.msra.mxu0 %v8880_v42 }
 0x348   :  { %7273 = vmatprep.subr.bf16.mxu0 %v11142_v0 }
 0x34b   :  { %7274 = vmatpush3.bf16.msra.mxu0 %v8894_v44 }
 0x34c   :  { %7275 = vmatprep.subr.bf16.mxu0 %v11142_v0 }
 0x34f   :  { %7276 = vmatpush3.bf16.msra.mxu0 %v8908_v46 }
 0x350   :  { %7277 = vmatprep.subr.bf16.mxu0 %v11142_v0 }
 0x353   :  { %7278 = vmatpush3.bf16.msra.mxu0 %v8917_v47 }
 0x354   :  { %7279 = vmatprep.subr.bf16.mxu0 %v11142_v0 }
 0x357   :  { %7280 = vmatpush3.bf16.msra.mxu0 %v8924_v48 }
 0x358   :  { %7297 = vmatprep.subr.bf16.mxu0 %v11142_v0 }
 0x3e2   :  { %v1081_v29 = vpop.f32.mrf.mxu1 }
 0x3e4   :  { %v7227_v32 = vpop.f32.mrf.mxu1 }
 0x3e6   :  { %v1084_v33 = vpop.f32.mrf.mxu1 }
 0x3e8   :  { %v7228_v34 = vpop.f32.mrf.mxu1 }
 0x3ea   :  { %v1040_v35 = vpop.f32.mrf.mxu0 }
 0x3eb   :  { %v9060_v36 = vadd.f32 %v1081_v29, %v1040_v35 }
 0x3ec   :  { %v7207_v37 = vpop.f32.mrf.mxu0 }
 0x3ee   :  { %v1043_v38 = vpop.f32.mrf.mxu0 }
 0x3ef   :  { %v9062_v39 = vadd.f32 %v1084_v33, %v1043_v38  ;;  %v9225_v33 = vld [vmem:[%s11194_s1 + $0xa8] sm:$0xff]   ;;  %v9237_v38 = vld [vmem:[%s11194_s1 + $0xa0] sm:$0xff]  }
 0x3f0   :  { %v7208_v40 = vpop.f32.mrf.mxu0 }
 0x3f1   :  { %v9243_v40 = vld [vmem:[%s11193_s14 + $0x8] sm:$0xf] }
 0x3f2   :  { %v1122_v41 = vpop.f32.mrf.mxu0 }
 0x3f4   :  { %v7235_v42 = vpop.f32.mrf.mxu0 }
 0x3f5   :  { %v9261_v42 = vld [vmem:[%s11194_s1 + $0xf8] sm:$0xff]  }
 0x3f6   :  { %v1125_v43 = vpop.f32.mrf.mxu0 }
 0x3f7   :  { %v1129_v44 = vpack.c.bf16 %v1125_v43, %v1122_v41  ;;  %v9256_v41 = vld [vmem:[%s11193_s14 + $0xc] sm:$0xf]  ;;  %v9278_v43 = vld [vmem:[%s11194_s1 + $0x98] sm:$0xff]  }
 0x3f8   :  { %v7236_v45 = vpop.f32.mrf.mxu0 }
 0x3f9   :  { %7254 = vmatmul.mubr.bf16.vlgmr.msra.gmra.mxu1 %v1129_v44  ;;  %v9284_v44 = vld [vmem:[%s11194_s1 + $0xe8] sm:$0xff]   ;;  %v9292_v45 = vld [vmem:[%s11194_s1 + $0x90] sm:$0xff]  }
 0x3fa   :  { %7286 = vmatpush3.bf16.msra.mxu1 %v9011_v59  ;;  %v1207_v46 = vpop.f32.mrf.mxu0  ;;  %7287 = vmatprep.mubr.msk.bf16.mxu1 %vm8477_vm0, %v11142_v0 }
 0x3fb   :  { %7291 = vmatprep.subr.bf16.mxu1 %v11142_v0 }
 0x3fc   :  { %v7263_v47 = vpop.f32.mrf.mxu0 }
 0x3fd   :  { %v9306_v47 = vld [vmem:[%s11194_s1 + $0x88] sm:$0xff]  }
 0x3fe   :  { %v1210_v48 = vpop.f32.mrf.mxu0 }
 0x3ff   :  { %v1214_v63 = vpack.c.bf16 %v1210_v48, %v1207_v46  ;;  %v9298_v46 = vld [vmem:[%s11194_s1 + $0xe0] sm:$0xff]   ;;  %v9312_v48 = vld [vmem:[%s11194_s1 + $0xd8] sm:$0xff]  }
 0x400   :  { %v7264_v2 = vpop.f32.mrf.mxu0 }
 0x401   :  { %7282 = vmatmul.mubr.bf16.vlgmr.msra.gmra.mxu0 %v1214_v63  ;;  %7288 = vmatmul.mubr.msk.bf16.vlgmr.msra.gmra.mxu1 %vm1276_vm4, %v9071_v62  ;;  %v9320_v63 = vld [vmem:[%s11194_s1 + $0x80] sm:$0xff]   ;;  %v9326_v2 = vld [vmem:[%s11194_s1 + $0xd0] sm:$0xff]  }
 0x402   :  { %7292 = vmatpush3.bf16.msra.mxu1 %v9011_v59  ;;  %7293 = vmatprep.mubr.msk.bf16.mxu1 %vm8477_vm0, %v11142_v0 }
 0x403   :  { %7317 = vmatprep.subr.bf16.mxu1 %v11142_v0  ;;  %7298 = vmatpush3.bf16.msra.mxu0 %v9076_v1 }
 0x404   :  { %7299 = vmatprep.subr.bf16.mxu0 %v11142_v0  ;;  %7313 = vmatprep.mubr.msk.bf16.mxu0 %vm8477_vm0, %v11142_v0 }
 0x407   :  { %7300 = vmatpush3.bf16.msra.mxu0 %v9088_v3 }
 0x408   :  { %7301 = vmatprep.subr.bf16.mxu0 %v11142_v0 }
 0x409   :  { %7294 = vmatmul.mubr.msk.bf16.vlgmr.msra.gmra.mxu1 %vm1276_vm4, %v9096_v4 }
 0x40a   :  { %7318 = vmatpush3.bf16.msra.mxu1 %v9101_v5  ;;  %7333 = vmatprep.mubr.msk.bf16.mxu1 %vm8477_vm0, %v11142_v0 }
 0x40b   :  { %7319 = vmatprep.subr.bf16.mxu1 %v11142_v0  ;;  %7302 = vmatpush3.bf16.msra.mxu0 %v9107_v6 }
 0x40c   :  { %7303 = vmatprep.subr.bf16.mxu0 %v11142_v0 }
 0x40e   :  { %7320 = vmatpush3.bf16.msra.mxu1 %v9116_v7 }
 0x40f   :  { %7321 = vmatprep.subr.bf16.mxu1 %v11142_v0  ;;  %7304 = vmatpush3.bf16.msra.mxu0 %v9125_v8 }
 0x410   :  { %7305 = vmatprep.subr.bf16.mxu0 %v11142_v0 }
 0x412   :  { %7322 = vmatpush3.bf16.msra.mxu1 %v9132_v21 }
 0x413   :  { %7323 = vmatprep.subr.bf16.mxu1 %v11142_v0  ;;  %7306 = vmatpush3.bf16.msra.mxu0 %v9162_v25 }
 0x414   :  { %7307 = vmatprep.subr.bf16.mxu0 %v11142_v0 }
 0x416   :  { %7324 = vmatpush3.bf16.msra.mxu1 %v9141_v22 }
 0x417   :  { %7325 = vmatprep.subr.bf16.mxu1 %v11142_v0  ;;  %7308 = vmatpush3.bf16.msra.mxu0 %v9176_v10 }
 0x418   :  { %7309 = vmatprep.subr.bf16.mxu0 %v11142_v0 }
 0x41a   :  { %7326 = vmatpush3.bf16.msra.mxu1 %v9148_v23 }
 0x41b   :  { %7327 = vmatprep.subr.bf16.mxu1 %v11142_v0  ;;  %7310 = vmatpush3.bf16.msra.mxu0 %v9190_v12 }
 0x41c   :  { %7311 = vmatprep.subr.bf16.mxu0 %v11142_v0 }
 0x41e   :  { %7328 = vmatpush3.bf16.msra.mxu1 %v9156_v24 }
 0x41f   :  { %7329 = vmatprep.subr.bf16.mxu1 %v11142_v0  ;;  %7312 = vmatpush3.bf16.msra.mxu0 %v9198_v13 }
 0x420   :  { %7337 = vmatprep.subr.bf16.mxu0 %v11142_v0 }
 0x422   :  { %7330 = vmatpush3.bf16.msra.mxu1 %v9168_v9 }
 0x423   :  { %7331 = vmatprep.subr.bf16.mxu1 %v11142_v0 }
 0x426   :  { %7332 = vmatpush3.bf16.msra.mxu1 %v9182_v11 }
 0x427   :  { %7343 = vmatprep.subr.bf16.mxu1 %v11142_v0 }
 0x4b9   :  { %v1164_v14 = vpop.f32.mrf.mxu1 }
 0x4ba   :  { %v1171_v16 = vadd.f32 %v1164_v14, %v9060_v36  ;;  %v9335_v14 = vld [vmem:[%s11194_s1 + $0xc8] sm:$0xff]  }
 0x4bb   :  { %v7255_v17 = vpop.f32.mrf.mxu1 }
 0x4bd   :  { %v1167_v19 = vpop.f32.mrf.mxu1 }
 0x4be   :  { %v1172_v18 = vadd.f32 %v1167_v19, %v9062_v39 }
 0x4bf   :  { %v7256_v26 = vpop.f32.mrf.mxu1 }
 0x4c1   :  { %v1249_v27 = vpop.f32.mrf.mxu0  ;;  %v1314_v20 = vpop.f32.mrf.mxu1 }
 0x4c2   :  { %v1256_v30 = vadd.f32 %v1249_v27, %v1171_v16  ;;  %v1320_v31 = vpack.c.bf16 %v1314_v20, %v1314_v20  ;;  %v9342_v16 = vld [vmem:[%s11194_s1 + $0xc0] sm:$0xff]  }
 0x4c3   :  { %v7283_v49 = vpop.f32.mrf.mxu0  ;;  %v7289_v50 = vpop.f32.mrf.mxu1 }
 0x4c4   :  { %v1258_v51 = vadd.f32 %v9002_v15, %v1256_v30  ;;  %7334 = vmatmul.mubr.bf16.vlgmr.msra.gmra.mxu1 %v1320_v31 }
 0x4c5   :  { %v1252_v52 = vpop.f32.mrf.mxu0  ;;  %v1317_v53 = vpop.f32.mrf.mxu1  ;;  %7344 = vmatpush3.bf16.msra.mxu1 %v9207_v28  ;;  %7359 = vmatprep.mubr.msk.bf16.mxu1 %vm8477_vm0, %v11142_v0 }
 0x4c6   :  { %v1257_v55 = vadd.f32 %v1252_v52, %v1172_v18  ;;  %7345 = vmatprep.subr.bf16.mxu1 %v11142_v0  ;;  %v1269_v58 = vmul.f32 0.2, %v1258_v51  ;;  %vm1267_vm5 = vcmp.gt.f32.partialorder %v1258_v51, 0.0 }
 0x4c7   :  { %v7290_v56 = vpop.f32.mrf.mxu1  ;;  %v7284_v57 = vpop.f32.mrf.mxu0 }
 0x4c8   :  { %v1259_v60 = vadd.f32 %v9002_v15, %v1257_v55  ;;  %v1271_v35 = vsel %vm1267_vm5, %v1258_v51, %v1269_v58 }
 0x4c9   :  { %v1376_v61 = vpop.f32.mrf.mxu1  ;;  %7346 = vmatpush3.bf16.msra.mxu1 %v9214_v54 }
 0x4ca   :  { %vm1268_vm6 = vcmp.gt.f32.partialorder %v1259_v60, 0.0  ;;  %v1270_v29 = vmul.f32 0.2, %v1259_v60  ;;  %v1382_v32 = vpack.c.bf16 %v1376_v61, %v1376_v61  ;;  %7347 = vmatprep.subr.bf16.mxu1 %v11142_v0 }
 0x4cb   :  { %v7295_v34 = vpop.f32.mrf.mxu1 }
 0x4cc   :  { %v1272_v36 = vsel %vm1268_vm6, %v1259_v60, %v1270_v29  ;;  %7314 = vmatmul.mubr.bf16.vlgmr.msra.gmra.mxu0 %v1382_v32 }
 0x4cd   :  { %7338 = vmatpush3.bf16.msra.mxu0 %v9011_v59  ;;  %v1379_v15 = vpop.f32.mrf.mxu1  ;;  %7339 = vmatprep.mubr.msk.bf16.mxu0 %vm8477_vm0, %v11142_v0  ;;  %v9230_v37 = vpack.c.bf16 %v1272_v36, %v1271_v35 }
 0x4ce   :  { %7363 = vmatprep.subr.bf16.mxu0 %v11142_v0  ;;  %7348 = vmatpush3.bf16.msra.mxu1 %v9225_v33 }
 0x4cf   :  { %v7296_v39 = vpop.f32.mrf.mxu1  ;;  %7349 = vmatprep.subr.bf16.mxu1 %v11142_v0 }
 0x4d2   :  { %7350 = vmatpush3.bf16.msra.mxu1 %v9237_v38 }
 0x4d3   :  { %7351 = vmatprep.subr.bf16.mxu1 %v11142_v0 }
 0x4d4   :  { %7340 = vmatmul.mubr.msk.bf16.vlgmr.msra.gmra.mxu0 %vm1276_vm4, %v9243_v40 }
 0x4d5   :  { %7364 = vmatpush3.bf16.msra.mxu0 %v9011_v59  ;;  %7365 = vmatprep.mubr.msk.bf16.mxu0 %vm8477_vm0, %v11142_v0  ;;  %v9272_v59 = vld [vmem:[%s11194_s1 + $0xf0] sm:$0xff]  }
 0x4d6   :  { %7369 = vmatprep.subr.bf16.mxu0 %v11142_v0  ;;  %7352 = vmatpush3.bf16.msra.mxu1 %v9278_v43 }
 0x4d7   :  { %7353 = vmatprep.subr.bf16.mxu1 %v11142_v0 }
 0x4da   :  { %7354 = vmatpush3.bf16.msra.mxu1 %v9292_v45 }
 0x4db   :  { %7355 = vmatprep.subr.bf16.mxu1 %v11142_v0 }
 0x4dc   :  { %7366 = vmatmul.mubr.msk.bf16.vlgmr.msra.gmra.mxu0 %vm1276_vm4, %v9256_v41 }
 0x4dd   :  { %7370 = vmatpush3.bf16.msra.mxu0 %v9261_v42  ;;  %7385 = vmatprep.mubr.msk.bf16.mxu0 %vm8477_vm0, %v11142_v0 }
 0x4de   :  { %7371 = vmatprep.subr.bf16.mxu0 %v11142_v0  ;;  %7356 = vmatpush3.bf16.msra.mxu1 %v9306_v47 }
 0x4df   :  { %7357 = vmatprep.subr.bf16.mxu1 %v11142_v0 }
 0x4e1   :  { %7372 = vmatpush3.bf16.msra.mxu0 %v9272_v59 }
 0x4e2   :  { %7373 = vmatprep.subr.bf16.mxu0 %v11142_v0  ;;  %7358 = vmatpush3.bf16.msra.mxu1 %v9320_v63 }
 0x4e3   :  { %7389 = vmatprep.subr.bf16.mxu1 %v11142_v0 }
 0x4e5   :  { %7374 = vmatpush3.bf16.msra.mxu0 %v9284_v44 }
 0x4e6   :  { %7375 = vmatprep.subr.bf16.mxu0 %v11142_v0 }
 0x4e9   :  { %7376 = vmatpush3.bf16.msra.mxu0 %v9298_v46 }
 0x4ea   :  { %7377 = vmatprep.subr.bf16.mxu0 %v11142_v0 }
 0x4ed   :  { %7378 = vmatpush3.bf16.msra.mxu0 %v9312_v48 }
 0x4ee   :  { %7379 = vmatprep.subr.bf16.mxu0 %v11142_v0 }
 0x4f1   :  { %7380 = vmatpush3.bf16.msra.mxu0 %v9326_v2 }
 0x4f2   :  { %7381 = vmatprep.subr.bf16.mxu0 %v11142_v0 }
 0x4f5   :  { %7382 = vmatpush3.bf16.msra.mxu0 %v9335_v14 }
 0x4f6   :  { %7383 = vmatprep.subr.bf16.mxu0 %v11142_v0 }
 0x4f9   :  { %7384 = vmatpush3.bf16.msra.mxu0 %v9342_v16 }
 0x4fa   :  { %7401 = vmatprep.subr.bf16.mxu0 %v11142_v0 }
 0x584   :  { %v1570_v17 = vpop.f32.mrf.mxu1 }
 0x586   :  { %v7335_v19 = vpop.f32.mrf.mxu1 }
 0x587   :  { %v2253_v19 = vld [vmem:[#allocation7 + $0x48] sm:$0xff] }
 0x588   :  { %v1573_v18 = vpop.f32.mrf.mxu1 }
 0x589   :  { %v2252_v18 = vld [vmem:[#allocation7 + $0x40] sm:$0xff] }
 0x58a   :  { %v7336_v26 = vpop.f32.mrf.mxu1 }
 0x58b   :  { %v2251_v26 = vld [vmem:[#allocation7 + $0x38] sm:$0xff] }
 0x58c   :  { %v1482_v27 = vpop.f32.mrf.mxu0 }
 0x58d   :  { %v1571_v20 = vadd.f32 %v1570_v17, %v1482_v27  ;;  %v2254_v17 = vld [vmem:[#allocation7 + $0x50] sm:$0xff] }
 0x58e   :  { %v7315_v30 = vpop.f32.mrf.mxu0  ;;  %v2250_v27 = vld [vmem:[#allocation7 + $0x30] sm:$0xff] }
 0x58f   :  { %v2248_v30 = vld [vmem:[#allocation7 + $0x20] sm:$0xff] }
 0x590   :  { %v1485_v31 = vpop.f32.mrf.mxu0 }
 0x591   :  { %v2247_v31 = vld [vmem:[#allocation7 + $0x18] sm:$0xff] }
 0x592   :  { %v7316_v49 = vpop.f32.mrf.mxu0 }
 0x593   :  { %v2246_v49 = vld [vmem:[#allocation7 + $0x10] sm:$0xff] }
 0x594   :  { %v1615_v50 = vpop.f32.mrf.mxu0 }
 0x595   :  { %v1621_v51 = vpack.c.bf16 %v1615_v50, %v1615_v50  ;;  %v2245_v50 = vld [vmem:[#allocation7 + $0x8] sm:$0xff] }
 0x596   :  { %v7341_v52 = vpop.f32.mrf.mxu0 }
 0x597   :  { %7360 = vmatmul.mubr.bf16.vlgmr.msra.gmra.mxu1 %v1621_v51  ;;  %v2244_v51 = vld [vmem:[#allocation7] sm:$0xff]  ;;  %v6392_v52 = vld [vmem:[#allocation6] ss:$0 sm:$0xff] }
 0x598   :  { %7390 = vmatpush3.bf16.msra.mxu1 %v9230_v37  ;;  %v1618_v53 = vpop.f32.mrf.mxu0  ;;  %7391 = vmatprep.mubr.msk.bf16.mxu1 %vm8477_vm0, %v11142_v0 }
 0x599   :  { %7395 = vmatprep.subr.bf16.mxu1 %v11142_v0 }
 0x59a   :  { %v7342_v55 = vpop.f32.mrf.mxu0 }
 0x59c   :  { %v1767_v56 = vpop.f32.mrf.mxu0 }
 0x59d   :  { %v1773_v57 = vpack.c.bf16 %v1767_v56, %v1767_v56 }
 0x59e   :  { %v7367_v58 = vpop.f32.mrf.mxu0 }
 0x59f   :  { %7386 = vmatmul.mubr.bf16.vlgmr.msra.gmra.mxu0 %v1773_v57  ;;  %7392 = vmatmul.mubr.msk.bf16.vlgmr.msra.gmra.mxu1 %vm1276_vm4, %v9071_v62 }
 0x5a0   :  { %7396 = vmatpush3.bf16.msra.mxu1 %v9230_v37  ;;  %7397 = vmatprep.mubr.msk.bf16.mxu1 %vm8477_vm0, %v11142_v0  ;;  %v1770_v60 = vpop.f32.mrf.mxu0 }
 0x5a1   :  { %7421 = vmatprep.subr.bf16.mxu1 %v11142_v0  ;;  %7402 = vmatpush3.bf16.msra.mxu0 %v9076_v1 }
 0x5a2   :  { %v7368_v61 = vpop.f32.mrf.mxu0  ;;  %7403 = vmatprep.subr.bf16.mxu0 %v11142_v0  ;;  %7417 = vmatprep.mubr.msk.bf16.mxu0 %vm8477_vm0, %v11142_v0 }
 0x5a5   :  { %7404 = vmatpush3.bf16.msra.mxu0 %v9088_v3 }
 0x5a6   :  { %7405 = vmatprep.subr.bf16.mxu0 %v11142_v0 }
 0x5a7   :  { %7398 = vmatmul.mubr.msk.bf16.vlgmr.msra.gmra.mxu1 %vm1276_vm4, %v9096_v4 }
 0x5a8   :  { %7422 = vmatpush3.bf16.msra.mxu1 %v9101_v5  ;;  %7437 = vmatprep.mubr.msk.bf16.mxu1 %vm8477_vm0, %v11142_v0 }
 0x5a9   :  { %7423 = vmatprep.subr.bf16.mxu1 %v11142_v0  ;;  %7406 = vmatpush3.bf16.msra.mxu0 %v9107_v6 }
 0x5aa   :  { %7407 = vmatprep.subr.bf16.mxu0 %v11142_v0 }
 0x5ac   :  { %7424 = vmatpush3.bf16.msra.mxu1 %v9116_v7 }
 0x5ad   :  { %7425 = vmatprep.subr.bf16.mxu1 %v11142_v0  ;;  %7408 = vmatpush3.bf16.msra.mxu0 %v9125_v8 }
 0x5ae   :  { %7409 = vmatprep.subr.bf16.mxu0 %v11142_v0 }
 0x5b0   :  { %7426 = vmatpush3.bf16.msra.mxu1 %v9132_v21 }
 0x5b1   :  { %7427 = vmatprep.subr.bf16.mxu1 %v11142_v0  ;;  %7410 = vmatpush3.bf16.msra.mxu0 %v9162_v25 }
 0x5b2   :  { %7411 = vmatprep.subr.bf16.mxu0 %v11142_v0 }
 0x5b4   :  { %7428 = vmatpush3.bf16.msra.mxu1 %v9141_v22 }
 0x5b5   :  { %7429 = vmatprep.subr.bf16.mxu1 %v11142_v0  ;;  %7412 = vmatpush3.bf16.msra.mxu0 %v9176_v10 }
 0x5b6   :  { %7413 = vmatprep.subr.bf16.mxu0 %v11142_v0 }
 0x5b8   :  { %7430 = vmatpush3.bf16.msra.mxu1 %v9148_v23 }
 0x5b9   :  { %7431 = vmatprep.subr.bf16.mxu1 %v11142_v0  ;;  %7414 = vmatpush3.bf16.msra.mxu0 %v9190_v12 }
 0x5ba   :  { %7415 = vmatprep.subr.bf16.mxu0 %v11142_v0 }
 0x5bc   :  { %7432 = vmatpush3.bf16.msra.mxu1 %v9156_v24 }
 0x5bd   :  { %7433 = vmatprep.subr.bf16.mxu1 %v11142_v0  ;;  %7416 = vmatpush3.bf16.msra.mxu0 %v9198_v13 }
 0x5be   :  { %7441 = vmatprep.subr.bf16.mxu0 %v11142_v0 }
 0x5c0   :  { %7434 = vmatpush3.bf16.msra.mxu1 %v9168_v9 }
 0x5c1   :  { %7435 = vmatprep.subr.bf16.mxu1 %v11142_v0 }
 0x5c4   :  { %7436 = vmatpush3.bf16.msra.mxu1 %v9182_v11 }
 0x5c5   :  { %7447 = vmatprep.subr.bf16.mxu1 %v11142_v0 }
 0x657   :  { %v1721_v62 = vpop.f32.mrf.mxu1 }
 0x658   :  { %v1727_v1 = vadd.f32 %v1721_v62, %v1571_v20  ;;  %v2249_v20 = vld [vmem:[#allocation7 + $0x28] sm:$0xff] }
 0x659   :  { %v7361_v3 = vpop.f32.mrf.mxu1 }
 0x65b   :  { %v1724_v4 = vpop.f32.mrf.mxu1 }
 0x65d   :  { %v7362_v5 = vpop.f32.mrf.mxu1 }
 0x65f   :  { %v1873_v6 = vpop.f32.mrf.mxu0  ;;  %v1921_v7 = vpop.f32.mrf.mxu1 }
 0x660   :  { %v9394_v8 = vadd.f32 %v1873_v6, %v1727_v1  ;;  %v1927_v21 = vpack.c.bf16 %v1921_v7, %v1921_v7 }
 0x661   :  { %v7393_v22 = vpop.f32.mrf.mxu1  ;;  %v7387_v23 = vpop.f32.mrf.mxu0 }
 0x662   :  { %7438 = vmatmul.mubr.bf16.vlgmr.msra.gmra.mxu1 %v1927_v21  ;;  %v9483_v53 = vadd.f32 %v6392_v52, %v9394_v8 }
 0x663   :  { %v1924_v24 = vpop.f32.mrf.mxu1  ;;  %v1876_v25 = vpop.f32.mrf.mxu0  ;;  %7448 = vmatpush3.bf16.msra.mxu1 %v9207_v28  ;;  %7463 = vmatprep.mubr.msk.bf16.mxu1 %vm8477_vm0, %v11142_v0 }
 0x664   :  { %7449 = vmatprep.subr.bf16.mxu1 %v11142_v0  ;;  %v2221_v56 = vmul.f32 %v9483_v53, %v9483_v53  ;;  %v2214_v58 = vrot.slane %v9483_v53, 4 }
 0x665   :  { %v7394_v9 = vpop.f32.mrf.mxu1  ;;  %v7388_v10 = vpop.f32.mrf.mxu0 }
 0x666   :  { %v2222_v61 = vrot.slane %v2221_v56, 4  ;;  %v2215_v1 = vadd.f32 %v2214_v58, %v9483_v53 }
 0x667   :  { %v1962_v11 = vpop.f32.mrf.mxu1  ;;  %7450 = vmatpush3.bf16.msra.mxu1 %v9214_v54 }
 0x668   :  { %v1968_v12 = vpack.c.bf16 %v1962_v11, %v1962_v11  ;;  %7451 = vmatprep.subr.bf16.mxu1 %v11142_v0  ;;  %v2223_v5 = vadd.f32 %v2222_v61, %v2221_v56  ;;  %v2216_v8 = vrot.slane %v2215_v1, 2  ;;  %v9507_v61 = vld [vmem:[#allocation12] sm:$0x3] }
 0x669   :  { %v7399_v13 = vpop.f32.mrf.mxu1 }
 0x66a   :  { %7418 = vmatmul.mubr.bf16.vlgmr.msra.gmra.mxu0 %v1968_v12  ;;  %v2224_v25 = vrot.slane %v2223_v5, 2  ;;  %v2217_v12 = vadd.f32 %v2216_v8, %v2215_v1  ;;  %v9515_v1 = vld [vmem:[#allocation13 + $0x38] sm:$0xff]   ;;  %v9547_v8 = vld [vmem:[#allocation13 + $0x20] sm:$0xff]  }
 0x66b   :  { %7442 = vmatpush3.bf16.msra.mxu0 %v9230_v37  ;;  %v1965_v29 = vpop.f32.mrf.mxu1  ;;  %7443 = vmatprep.mubr.msk.bf16.mxu0 %vm8477_vm0, %v11142_v0 }
 0x66c   :  { %7467 = vmatprep.subr.bf16.mxu0 %v11142_v0  ;;  %7452 = vmatpush3.bf16.msra.mxu1 %v9225_v33 }
 0x66d   :  { %v7400_v28 = vpop.f32.mrf.mxu1  ;;  %7453 = vmatprep.subr.bf16.mxu1 %v11142_v0 }
 0x66e   :  { %v2225_v28 = vadd.f32 %v2224_v25, %v2223_v5  ;;  %v9537_v5 = vld [vmem:[#allocation13 + $0x68] sm:$0xff]  }
 0x66f   :  { %v9569_v25 = vld [vmem:[#allocation13 + $0x48] sm:$0xff]  }
 0x670   :  { %7454 = vmatpush3.bf16.msra.mxu1 %v9237_v38 }
 0x671   :  { %7455 = vmatprep.subr.bf16.mxu1 %v11142_v0 }
 0x672   :  { %7444 = vmatmul.mubr.msk.bf16.vlgmr.msra.gmra.mxu0 %vm1276_vm4, %v9243_v40 }
 0x673   :  { %7468 = vmatpush3.bf16.msra.mxu0 %v9230_v37  ;;  %7469 = vmatprep.mubr.msk.bf16.mxu0 %vm8477_vm0, %v11142_v0 }
 0x674   :  { %7473 = vmatprep.subr.bf16.mxu0 %v11142_v0  ;;  %7456 = vmatpush3.bf16.msra.mxu1 %v9278_v43 }
 0x675   :  { %7457 = vmatprep.subr.bf16.mxu1 %v11142_v0 }
 0x678   :  { %7458 = vmatpush3.bf16.msra.mxu1 %v9292_v45 }
 0x679   :  { %7459 = vmatprep.subr.bf16.mxu1 %v11142_v0 }
 0x67a   :  { %7470 = vmatmul.mubr.msk.bf16.vlgmr.msra.gmra.mxu0 %vm1276_vm4, %v9256_v41  ;;  %v2259_v41 = vld [vmem:[#allocation7 + $0x78] sm:$0xff] }
 0x67b   :  { %7474 = vmatpush3.bf16.msra.mxu0 %v9261_v42  ;;  %7489 = vmatprep.mubr.msk.bf16.mxu0 %vm8477_vm0, %v11142_v0 }
 0x67c   :  { %7475 = vmatprep.subr.bf16.mxu0 %v11142_v0  ;;  %7460 = vmatpush3.bf16.msra.mxu1 %v9306_v47 }
 0x67d   :  { %7461 = vmatprep.subr.bf16.mxu1 %v11142_v0 }
 0x67f   :  { %7476 = vmatpush3.bf16.msra.mxu0 %v9272_v59  ;;  %v2258_v59 = vld [vmem:[#allocation7 + $0x70] sm:$0xff] }
 0x680   :  { %7477 = vmatprep.subr.bf16.mxu0 %v11142_v0  ;;  %7462 = vmatpush3.bf16.msra.mxu1 %v9320_v63 }
 0x681   :  { %7493 = vmatprep.subr.mxu1 %v11142_v0 }
 0x683   :  { %7478 = vmatpush3.bf16.msra.mxu0 %v9284_v44 }
 0x684   :  { %7479 = vmatprep.subr.bf16.mxu0 %v11142_v0 }
 0x687   :  { %7480 = vmatpush3.bf16.msra.mxu0 %v9298_v46 }
 0x688   :  { %7481 = vmatprep.subr.bf16.mxu0 %v11142_v0 }
 0x68b   :  { %7482 = vmatpush3.bf16.msra.mxu0 %v9312_v48 }
 0x68c   :  { %7483 = vmatprep.subr.bf16.mxu0 %v11142_v0 }
 0x68f   :  { %7484 = vmatpush3.bf16.msra.mxu0 %v9326_v2  ;;  %v2257_v2 = vld [vmem:[#allocation7 + $0x68] sm:$0xff] }
 0x690   :  { %7485 = vmatprep.subr.bf16.mxu0 %v11142_v0 }
 0x693   :  { %7486 = vmatpush3.bf16.msra.mxu0 %v9335_v14  ;;  %v2256_v14 = vld [vmem:[#allocation7 + $0x60] sm:$0xff] }
 0x694   :  { %7487 = vmatprep.subr.bf16.mxu0 %v11142_v0 }
 0x697   :  { %7488 = vmatpush3.bf16.msra.mxu0 %v9342_v16  ;;  %v2255_v16 = vld [vmem:[#allocation7 + $0x58] sm:$0xff] }
 0x698   :  { %7528 = vmatprep.subr.mxu0 %v11142_v0 }
 0x722   :  { %v2043_v54 = vpop.f32.mrf.mxu1 }
 0x724   :  { %v7439_v32 = vpop.f32.mrf.mxu1 }
 0x726   :  { %v2046_v33 = vpop.f32.mrf.mxu1 }
 0x728   :  { %v7440_v34 = vpop.f32.mrf.mxu1 }
 0x72a   :  { %v2003_v35 = vpop.f32.mrf.mxu0 }
 0x72b   :  { %v9444_v36 = vadd.f32 %v2043_v54, %v2003_v35  ;;  %v2218_v54 = vrot.slane %v2217_v12, 1  ;;  %v2226_v35 = vrot.slane %v2225_v28, 1 }
 0x72c   :  { %v7419_v15 = vpop.f32.mrf.mxu0 }
 0x72d   :  { %v2219_v15 = vadd.f32 %v2218_v54, %v2217_v12  ;;  %v9587_v54 = vld [vmem:[#allocation13 + $0xb8] sm:$0xff]  }
 0x72e   :  { %v2006_v37 = vpop.f32.mrf.mxu0 }
 0x730   :  { %v7420_v38 = vpop.f32.mrf.mxu0 }
 0x732   :  { %v2083_v39 = vpop.f32.mrf.mxu0 }
 0x733   :  { %v2089_v40 = vpack.c.bf16 %v2083_v39, %v2083_v39 }
 0x734   :  { %v7445_v42 = vpop.f32.mrf.mxu0 }
 0x735   :  { %7464 = vmatmul.mubr.bf16.vlgmr.msra.gmra.mxu1 %v2089_v40  ;;  %v2227_v40 = vadd.f32 %v2226_v35, %v2225_v28 }
 0x736   :  { %v2086_v43 = vpop.f32.mrf.mxu0  ;;  %7494 = vmatpush3.msra.mxu1 %v2259_v41  ;;  %7525 = vmatprep.mubr.msk.f32.mxu1 %vm8477_vm0, %v11142_v0 }
 0x737   :  { %7495 = vmatprep.subr.mxu1 %v11142_v0 }
 0x738   :  { %v7446_v44 = vpop.f32.mrf.mxu0  ;;  %7496 = vmatpush3.msra.mxu1 %v2258_v59 }
 0x739   :  { %7497 = vmatprep.subr.mxu1 %v11142_v0 }
 0x73a   :  { %v2165_v45 = vpop.f32.mrf.mxu0  ;;  %7498 = vmatpush3.msra.mxu1 %v2257_v2 }
 0x73b   :  { %v2171_v46 = vpack.c.bf16 %v2165_v45, %v2165_v45  ;;  %7499 = vmatprep.subr.mxu1 %v11142_v0 }
 0x73c   :  { %v7471_v47 = vpop.f32.mrf.mxu0  ;;  %7500 = vmatpush3.msra.mxu1 %v2256_v14 }
 0x73d   :  { %7490 = vmatmul.mubr.bf16.vlgmr.msra.gmra.mxu0 %v2171_v46  ;;  %7501 = vmatprep.subr.mxu1 %v11142_v0 }
 0x73e   :  { %v2168_v48 = vpop.f32.mrf.mxu0  ;;  %7529 = vmatpush3.msra.mxu0 %v2259_v41  ;;  %7560 = vmatprep.mubr.msk.f32.mxu0 %vm8477_vm0, %v11142_v0 }
 0x73f   :  { %7530 = vmatprep.subr.mxu0 %v11142_v0  ;;  %7502 = vmatpush3.msra.mxu1 %v2255_v16 }
 0x740   :  { %v7472_v63 = vpop.f32.mrf.mxu0  ;;  %7531 = vmatpush3.msra.mxu0 %v2258_v59  ;;  %7503 = vmatprep.subr.mxu1 %v11142_v0 }
 0x741   :  { %7532 = vmatprep.subr.mxu0 %v11142_v0  ;;  %7504 = vmatpush3.msra.mxu1 %v2254_v17 }
 0x742   :  { %7533 = vmatpush3.msra.mxu0 %v2257_v2  ;;  %7505 = vmatprep.subr.mxu1 %v11142_v0 }
 0x743   :  { %7534 = vmatprep.subr.mxu0 %v11142_v0  ;;  %7506 = vmatpush3.msra.mxu1 %v2253_v19 }
 0x744   :  { %7535 = vmatpush3.msra.mxu0 %v2256_v14  ;;  %7507 = vmatprep.subr.mxu1 %v11142_v0  ;;  %v2411_v14 = vlaneseq }
 0x745   :  { %7536 = vmatprep.subr.mxu0 %v11142_v0  ;;  %7508 = vmatpush3.msra.mxu1 %v2252_v18 }
 0x746   :  { %7537 = vmatpush3.msra.mxu0 %v2255_v16  ;;  %7509 = vmatprep.subr.mxu1 %v11142_v0  ;;  %v9494_v16 = vshrl.u32 %v2411_v14, 7  ;;  %v9663_v14 = vld [vmem:[#allocation13 + $0xc8] sm:$0xff]  }
 0x747   :  { %7538 = vmatprep.subr.mxu0 %v11142_v0  ;;  %7510 = vmatpush3.msra.mxu1 %v2251_v26 }
 0x748   :  { %7539 = vmatpush3.msra.mxu0 %v2254_v17  ;;  %7511 = vmatprep.subr.mxu1 %v11142_v0  ;;  %11195 = vst [vmem:[#allocation29_spill] sm:$0xff] %v9494_v16  ;;  %v2406_v17 = vld [vmem:[#allocation9] sm:$0x1] }
 0x749   :  { %7540 = vmatprep.subr.mxu0 %v11142_v0  ;;  %7512 = vmatpush3.msra.mxu1 %v2250_v27 }
 0x74a   :  { %7541 = vmatpush3.msra.mxu0 %v2253_v19  ;;  %7513 = vmatprep.subr.mxu1 %v11142_v0  ;;  %v9497_v19 = vsub.s32 0, %v9494_v16  ;;  %v10236_v16 = vld [vmem:[%s11127_s17 + $0x1a0] ss:$8 sps:$4 sm:$0xff]  }
 0x74b   :  { %7542 = vmatprep.subr.mxu0 %v11142_v0  ;;  %7514 = vmatpush3.msra.mxu1 %v2249_v20  ;;  %11212 = vst [vmem:[#allocation46_spill] sm:$0xff] %v10236_v16 }
 0x74c   :  { %7543 = vmatpush3.msra.mxu0 %v2252_v18  ;;  %7515 = vmatprep.subr.mxu1 %v11142_v0  ;;  %11196 = vst [vmem:[#allocation30_spill] sm:$0xff] %v9497_v19 }
 0x74d   :  { %7544 = vmatprep.subr.mxu0 %v11142_v0  ;;  %7516 = vmatpush3.msra.mxu1 %v2248_v30 }
 0x74e   :  { %7545 = vmatpush3.msra.mxu0 %v2251_v26  ;;  %7517 = vmatprep.subr.mxu1 %v11142_v0 }
 0x74f   :  { %7546 = vmatprep.subr.mxu0 %v11142_v0  ;;  %7518 = vmatpush3.msra.mxu1 %v2247_v31 }
 0x750   :  { %7547 = vmatpush3.msra.mxu0 %v2250_v27  ;;  %7519 = vmatprep.subr.mxu1 %v11142_v0  ;;  %v2408_v27 = vld [vmem:[#allocation10] sm:$0x1] }
 0x751   :  { %7548 = vmatprep.subr.mxu0 %v11142_v0  ;;  %7520 = vmatpush3.msra.mxu1 %v2246_v49 }
 0x752   :  { %7549 = vmatpush3.msra.mxu0 %v2249_v20  ;;  %7521 = vmatprep.subr.mxu1 %v11142_v0 }
 0x753   :  { %7550 = vmatprep.subr.mxu0 %v11142_v0  ;;  %7522 = vmatpush3.msra.mxu1 %v2245_v50 }
 0x754   :  { %7551 = vmatpush3.msra.mxu0 %v2248_v30  ;;  %7523 = vmatprep.subr.mxu1 %v11142_v0 }
 0x755   :  { %7552 = vmatprep.subr.mxu0 %v11142_v0  ;;  %7524 = vmatpush3.msra.mxu1 %v2244_v51 }
 0x756   :  { %7553 = vmatpush3.msra.mxu0 %v2247_v31  ;;  %7569 = vmatprep.subr.bf16.mxu1 %v11142_v0 }
 0x757   :  { %7554 = vmatprep.subr.mxu0 %v11142_v0 }
 0x758   :  { %7555 = vmatpush3.msra.mxu0 %v2246_v49 }
 0x759   :  { %7556 = vmatprep.subr.mxu0 %v11142_v0 }
 0x75a   :  { %7557 = vmatpush3.msra.mxu0 %v2245_v50 }
 0x75b   :  { %7558 = vmatprep.subr.mxu0 %v11142_v0 }
 0x75c   :  { %7559 = vmatpush3.msra.mxu0 %v2244_v51 }
 0x75d   :  { %7563 = vmatprep.subr.bf16.mxu0 %v11142_v0 }
 0x7f5   :  { %v2124_v55 = vpop.f32.mrf.mxu1 }
 0x7f6   :  { %v2130_v3 = vadd.f32 %v2124_v55, %v9444_v36 }
 0x7f7   :  { %v7465_v57 = vpop.f32.mrf.mxu1 }
 0x7f9   :  { %v2127_v60 = vpop.f32.mrf.mxu1 }
 0x7fb   :  { %v7466_v62 = vpop.f32.mrf.mxu1 }
 0x7fc   :  { %v9513_v62 = vld [vmem:[#allocation13 + $0x78] sm:$0xff]  }
 0x7fd   :  { %v2206_v4 = vpop.f32.mrf.mxu0 }
 0x7fe   :  { %v2212_v6 = vadd.f32 %v2206_v4, %v2130_v3  ;;  %v9525_v3 = vld [vmem:[#allocation13 + $0x70] sm:$0xff]  }
 0x7ff   :  { %v7491_v7 = vpop.f32.mrf.mxu0  ;;  %v9527_v4 = vld [vmem:[#allocation13 + $0x30] sm:$0xff]  }
 0x800   :  { %v2213_v21 = vadd.f32 %v6392_v52, %v2212_v6  ;;  %v9539_v6 = vld [vmem:[#allocation13 + $0x28] sm:$0xff]   ;;  %v9545_v7 = vld [vmem:[#allocation13 + $0x60] sm:$0xff]  }
 0x801   :  { %v2209_v22 = vpop.f32.mrf.mxu0 }
 0x802   :  { %v2229_v23 = vrot.slane %v2213_v21, 4  ;;  %v2236_v24 = vmul.f32 %v2213_v21, %v2213_v21  ;;  %v9555_v22 = vld [vmem:[#allocation13 + $0x18] sm:$0xff]  }
 0x803   :  { %v7492_v9 = vpop.f32.mrf.mxu0 }
 0x804   :  { %v2230_v10 = vadd.f32 %v2229_v23, %v2213_v21  ;;  %v2237_v11 = vrot.slane %v2236_v24, 4  ;;  %v9561_v23 = vld [vmem:[#allocation13 + $0x50] sm:$0xff]   ;;  %v9571_v9 = vld [vmem:[#allocation13 + $0x8] sm:$0xff]  }
 0x806   :  { %v2231_v13 = vrot.slane %v2230_v10, 2  ;;  %v2238_v29 = vadd.f32 %v2237_v11, %v2236_v24  ;;  %v9563_v24 = vld [vmem:[#allocation13 + $0x10] sm:$0xff]   ;;  %v9583_v11 = vld [vmem:[#allocation13] sm:$0xff]  }
 0x808   :  { %v2232_v32 = vadd.f32 %v2231_v13, %v2230_v10  ;;  %v2239_v33 = vrot.slane %v2238_v29, 2  ;;  %v9577_v10 = vld [vmem:[#allocation13 + $0x40] sm:$0xff]  }
 0x80a   :  { %v2233_v34 = vrot.slane %v2232_v32, 1  ;;  %v2240_v36 = vadd.f32 %v2239_v33, %v2238_v29 }
 0x80c   :  { %v2234_v37 = vadd.f32 %v2233_v34, %v2232_v32  ;;  %v2241_v38 = vrot.slane %v2240_v36, 1 }
 0x80e   :  { %v2235_v39 = vadd.f32 %v2234_v37, %v2219_v15  ;;  %v2242_v41 = vadd.f32 %v2241_v38, %v2240_v36  ;;  %v9594_v36 = vld [vmem:[#allocation13 + $0xb0] sm:$0xff]   ;;  %v9599_v38 = vld [vmem:[#allocation12 + $0x4] sm:$0x3] }
 0x810   :  { %7526 = vmatmul.mubr.f32.vlgmr.msra.gmra.mxu1 %v2235_v39  ;;  %v2243_v42 = vadd.f32 %v2242_v41, %v2227_v40  ;;  %v9602_v39 = vld [vmem:[#allocation13 + $0xa8] sm:$0xff]   ;;  %v9612_v40 = vld [vmem:[#allocation13 + $0xa0] sm:$0xff]   ;;  %v9615_v41 = vld [vmem:[#allocation12 + $0x6] sm:$0x3] }
 0x811   :  { %7571 = vmatprep.mubr.msk.bf16.mxu1 %vm8477_vm0, %v11142_v0 }
 0x812   :  { %7561 = vmatmul.mubr.f32.vlgmr.msra.gmra.mxu0 %v2243_v42  ;;  %v9617_v42 = vld [vmem:[#allocation13 + $0xf8] sm:$0xff]  }
 0x813   :  { %7565 = vmatprep.mubr.msk.bf16.mxu0 %vm8477_vm0, %v11142_v0 }
 0x8d0   :  { %v2326_v59 = vpop.f32.mrf.mxu1 }
 0x8d1   :  { %v2330_v43 = vmul.f32 0.0078125, %v2326_v59  ;;  %v9620_v59 = vld [vmem:[#allocation13 + $0x98] sm:$0xff]  }
 0x8d2   :  { %v7527_v44 = vpop.f32.mrf.mxu1  ;;  %v2397_v45 = vpop.f32.mrf.mxu0 }
 0x8d3   :  { %v2402_v46 = vmul.f32 %v2330_v43, %v2330_v43  ;;  %v2401_v47 = vmul.f32 0.0078125, %v2397_v45  ;;  %v9632_v44 = vld [vmem:[#allocation13 + $0x90] sm:$0xff]   ;;  %v9636_v45 = vld [vmem:[#allocation13 + $0xe8] sm:$0xff]  }
 0x8d4   :  { %v7562_v48 = vpop.f32.mrf.mxu0 }
 0x8d5   :  { %v2403_v63 = vsub.f32 %v2401_v47, %v2402_v46  ;;  %v9643_v46 = vld [vmem:[#allocation13 + $0xe0] sm:$0xff]   ;;  %v9646_v47 = vld [vmem:[#allocation13 + $0x88] sm:$0xff]   ;;  %v9649_v48 = vld [vmem:[#allocation13 + $0xd8] sm:$0xff]  }
 0x8d7   :  { %v2404_v2 = vadd.f32 1e-05, %v2403_v63  ;;  %v9654_v63 = vld [vmem:[#allocation13 + $0x80] sm:$0xff]  }
 0x8d9   :  { %8161 = vrsqrt.f32 %v2404_v2  ;;  %v9657_v2 = vld [vmem:[#allocation13 + $0xd0] sm:$0xff]  }
 0x8e6   :  { %v8162_v18 = vpop.eup %8161 }
 0x8e7   :  { %v2407_v26 = vmul.f32 %v8162_v18, %v2406_v17  ;;  %v9667_v17 = vld [vmem:[#allocation13 + $0xc0] sm:$0xff]  }
 0x8e9   :  { %v2409_v20 = vmul.f32 %v2407_v26, %v2330_v43  ;;  %v2414_v30 = vrot.slane %v2407_v26, %v9497_v19  ;;  %v9626_v43 = vld [vmem:[#allocation13 + $0xf0] sm:$0xff]  }
 0x8eb   :  { %v2410_v31 = vsub.f32 %v2408_v27, %v2409_v20  ;;  %v2415_v49 = vmul.f32 %v2414_v30, %v9483_v53  ;;  %v2423_v51 = vmul.f32 %v2414_v30, %v2213_v21  ;;  %v9511_v53 = vld [vmem:[#allocation12 + $0x2] sm:$0x3] }
 0x8ec   :  { %v9553_v21 = vld [vmem:[#allocation13 + $0x58] sm:$0xff]  }
 0x8ed   :  { %v2420_v50 = vrot.slane %v2410_v31, %v9497_v19 }
 0x8ef   :  { %v2422_v52 = vadd.f32 %v2420_v50, %v2415_v49  ;;  %v9502_v55 = vadd.f32 %v2423_v51, %v2420_v50 }
 0x8f1   :  { %vm2425_vm7 = vcmp.gt.f32.partialorder %v2422_v52, 0.0  ;;  %v2426_v56 = vmul.f32 0.2, %v2422_v52  ;;  %v2430_v27 = vmul.f32 0.2, %v9502_v55  ;;  %vm2429_vm10 = vcmp.gt.f32.partialorder %v9502_v55, 0.0 }
 0x8f3   :  { %v2427_v57 = vsel %vm2425_vm7, %v2422_v52, %v2426_v56  ;;  %v2431_v50 = vsel %vm2429_vm10, %v9502_v55, %v2430_v27  ;;  %vm5057_vm7 = vcmask 23552  }
 0x8f4   :  { %v2428_v58 = vpack.c.bf16 %v2427_v57, %v2427_v57  ;;  %v2432_v57 = vpack.c.bf16 %v2431_v50, %v2431_v50  ;;  %v3423_v50 = vld [vmem:[#allocation16 + $0x48] sm:$0xff] }
 0x8f6   :  { %v9505_v60 = vsel %vm2439_vm8, %v2428_v58, 0 }
 0x8f7   :  { %7564 = vmatpush3.bf16.msra.mxu0 %v9505_v60  ;;  %7570 = vmatpush3.bf16.msra.mxu1 %v9505_v60 }
 0x8f8   :  { %7575 = vmatprep.subr.bf16.mxu1 %v11142_v0  ;;  %7595 = vmatprep.subr.bf16.mxu0 %v11142_v0 }
 0x8fa   :  { %7566 = vmatmul.mubr.msk.bf16.vlgmr.msra.gmra.mxu0 %vm2435_vm9, %v9507_v61  ;;  %7572 = vmatmul.mubr.msk.bf16.vlgmr.msra.gmra.mxu1 %vm2435_vm9, %v9511_v53 }
 0x8fb   :  { %7576 = vmatpush3.bf16.msra.mxu1 %v9513_v62  ;;  %7596 = vmatpush3.bf16.msra.mxu0 %v9515_v1 }
 0x8fc   :  { %7577 = vmatprep.subr.bf16.mxu1 %v11142_v0  ;;  %7597 = vmatprep.subr.bf16.mxu0 %v11142_v0 }
 0x8fd   :  { %7591 = vmatprep.mubr.msk.bf16.mxu1 %vm8477_vm0, %v11142_v0  ;;  %7611 = vmatprep.mubr.msk.bf16.mxu0 %vm8477_vm0, %v11142_v0 }
 0x8ff   :  { %7578 = vmatpush3.bf16.msra.mxu1 %v9525_v3  ;;  %7598 = vmatpush3.bf16.msra.mxu0 %v9527_v4 }
 0x900   :  { %7579 = vmatprep.subr.bf16.mxu1 %v11142_v0  ;;  %7599 = vmatprep.subr.bf16.mxu0 %v11142_v0 }
 0x903   :  { %7580 = vmatpush3.bf16.msra.mxu1 %v9537_v5  ;;  %7600 = vmatpush3.bf16.msra.mxu0 %v9539_v6 }
 0x904   :  { %7581 = vmatprep.subr.bf16.mxu1 %v11142_v0  ;;  %7601 = vmatprep.subr.bf16.mxu0 %v11142_v0 }
 0x907   :  { %7582 = vmatpush3.bf16.msra.mxu1 %v9545_v7  ;;  %7602 = vmatpush3.bf16.msra.mxu0 %v9547_v8 }
 0x908   :  { %7583 = vmatprep.subr.bf16.mxu1 %v11142_v0  ;;  %7603 = vmatprep.subr.bf16.mxu0 %v11142_v0 }
 0x90b   :  { %7584 = vmatpush3.bf16.msra.mxu1 %v9553_v21  ;;  %7604 = vmatpush3.bf16.msra.mxu0 %v9555_v22 }
 0x90c   :  { %7585 = vmatprep.subr.bf16.mxu1 %v11142_v0  ;;  %7605 = vmatprep.subr.bf16.mxu0 %v11142_v0 }
 0x90f   :  { %7586 = vmatpush3.bf16.msra.mxu1 %v9561_v23  ;;  %7606 = vmatpush3.bf16.msra.mxu0 %v9563_v24 }
 0x910   :  { %7587 = vmatprep.subr.bf16.mxu1 %v11142_v0  ;;  %7607 = vmatprep.subr.bf16.mxu0 %v11142_v0 }
 0x913   :  { %7588 = vmatpush3.bf16.msra.mxu1 %v9569_v25  ;;  %7608 = vmatpush3.bf16.msra.mxu0 %v9571_v9 }
 0x914   :  { %7589 = vmatprep.subr.bf16.mxu1 %v11142_v0  ;;  %7609 = vmatprep.subr.bf16.mxu0 %v11142_v0 }
 0x917   :  { %7590 = vmatpush3.bf16.msra.mxu1 %v9577_v10  ;;  %7610 = vmatpush3.bf16.msra.mxu0 %v9583_v11 }
 0x918   :  { %7615 = vmatprep.subr.bf16.mxu1 %v11142_v0  ;;  %7621 = vmatprep.subr.bf16.mxu0 %v11142_v0 }
 0x9ba   :  { %v2477_v12 = vpop.f32.mrf.mxu0  ;;  %v2539_v13 = vpop.f32.mrf.mxu1 }
 0x9bb   :  { %v2483_v29 = vpack.c.bf16 %v2477_v12, %v2477_v12  ;;  %v2545_v28 = vpack.c.bf16 %v2539_v13, %v2539_v13  ;;  %v9677_v13 = vsel %vm2439_vm8, %v2432_v57, 0  ;;  %v3419_v57 = vld [vmem:[#allocation16 + $0x28] sm:$0xff] }
 0x9bc   :  { %v7573_v32 = vpop.f32.mrf.mxu1  ;;  %v7567_v33 = vpop.f32.mrf.mxu0 }
 0x9bd   :  { %7592 = vmatmul.mubr.bf16.vlgmr.msra.gmra.mxu1 %v2545_v28  ;;  %7612 = vmatmul.mubr.bf16.vlgmr.msra.gmra.mxu0 %v2483_v29 }
 0x9be   :  { %7616 = vmatpush3.bf16.msra.mxu1 %v9505_v60  ;;  %v2542_v34 = vpop.f32.mrf.mxu1  ;;  %7617 = vmatprep.mubr.msk.bf16.mxu1 %vm8477_vm0, %v11142_v0  ;;  %v2480_v35 = vpop.f32.mrf.mxu0 }
 0x9bf   :  { %7641 = vmatprep.subr.bf16.mxu1 %v11142_v0  ;;  %7622 = vmatpush3.bf16.msra.mxu0 %v9587_v54 }
 0x9c0   :  { %v7574_v15 = vpop.f32.mrf.mxu1  ;;  %v7568_v37 = vpop.f32.mrf.mxu0  ;;  %7623 = vmatprep.subr.bf16.mxu0 %v11142_v0  ;;  %7637 = vmatprep.mubr.msk.bf16.mxu0 %vm8477_vm0, %v11142_v0 }
 0x9c3   :  { %7624 = vmatpush3.bf16.msra.mxu0 %v9594_v36 }
 0x9c4   :  { %7625 = vmatprep.subr.bf16.mxu0 %v11142_v0 }
 0x9c5   :  { %7618 = vmatmul.mubr.msk.bf16.vlgmr.msra.gmra.mxu1 %vm2435_vm9, %v9599_v38 }
 0x9c6   :  { %7642 = vmatpush3.bf16.msra.mxu1 %v9505_v60  ;;  %7643 = vmatprep.mubr.msk.bf16.mxu1 %vm8477_vm0, %v11142_v0 }
 0x9c7   :  { %7626 = vmatpush3.bf16.msra.mxu0 %v9602_v39  ;;  %7647 = vmatprep.subr.bf16.mxu1 %v11142_v0 }
 0x9c8   :  { %7627 = vmatprep.subr.bf16.mxu0 %v11142_v0 }
 0x9cb   :  { %7628 = vmatpush3.bf16.msra.mxu0 %v9612_v40 }
 0x9cc   :  { %7629 = vmatprep.subr.bf16.mxu0 %v11142_v0 }
 0x9cd   :  { %7644 = vmatmul.mubr.msk.bf16.vlgmr.msra.gmra.mxu1 %vm2435_vm9, %v9615_v41 }
 0x9ce   :  { %7648 = vmatpush3.bf16.msra.mxu1 %v9617_v42  ;;  %7663 = vmatprep.mubr.msk.bf16.mxu1 %vm8477_vm0, %v11142_v0 }
 0x9cf   :  { %7649 = vmatprep.subr.bf16.mxu1 %v11142_v0  ;;  %7630 = vmatpush3.bf16.msra.mxu0 %v9620_v59 }
 0x9d0   :  { %7631 = vmatprep.subr.bf16.mxu0 %v11142_v0 }
 0x9d2   :  { %7650 = vmatpush3.bf16.msra.mxu1 %v9626_v43 }
 0x9d3   :  { %7651 = vmatprep.subr.bf16.mxu1 %v11142_v0  ;;  %7632 = vmatpush3.bf16.msra.mxu0 %v9632_v44 }
 0x9d4   :  { %7633 = vmatprep.subr.bf16.mxu0 %v11142_v0 }
 0x9d6   :  { %7652 = vmatpush3.bf16.msra.mxu1 %v9636_v45 }
 0x9d7   :  { %7653 = vmatprep.subr.bf16.mxu1 %v11142_v0  ;;  %7634 = vmatpush3.bf16.msra.mxu0 %v9646_v47 }
 0x9d8   :  { %7635 = vmatprep.subr.bf16.mxu0 %v11142_v0 }
 0x9da   :  { %7654 = vmatpush3.bf16.msra.mxu1 %v9643_v46 }
 0x9db   :  { %7655 = vmatprep.subr.bf16.mxu1 %v11142_v0  ;;  %7636 = vmatpush3.bf16.msra.mxu0 %v9654_v63 }
 0x9dc   :  { %7667 = vmatprep.subr.bf16.mxu0 %v11142_v0 }
 0x9de   :  { %7656 = vmatpush3.bf16.msra.mxu1 %v9649_v48 }
 0x9df   :  { %7657 = vmatprep.subr.bf16.mxu1 %v11142_v0 }
 0x9e2   :  { %7658 = vmatpush3.bf16.msra.mxu1 %v9657_v2 }
 0x9e3   :  { %7659 = vmatprep.subr.bf16.mxu1 %v11142_v0 }
 0x9e6   :  { %7660 = vmatpush3.bf16.msra.mxu1 %v9663_v14 }
 0x9e7   :  { %7661 = vmatprep.subr.bf16.mxu1 %v11142_v0 }
 0x9ea   :  { %7662 = vmatpush3.bf16.msra.mxu1 %v9667_v17 }
 0x9eb   :  { %7679 = vmatprep.subr.bf16.mxu1 %v11142_v0 }
 0xa7d   :  { %v2645_v18 = vpop.f32.mrf.mxu1  ;;  %v2733_v26 = vpop.f32.mrf.mxu0 }
 0xa7e   :  { %v9672_v20 = vadd.f32 %v2733_v26, %v2645_v18 }
 0xa7f   :  { %v7593_v30 = vpop.f32.mrf.mxu1  ;;  %v7613_v31 = vpop.f32.mrf.mxu0 }
 0xa80   :  { %v3426_v30 = vld [vmem:[#allocation16 + $0x60] sm:$0xff]  ;;  %v3425_v31 = vld [vmem:[#allocation16 + $0x58] sm:$0xff] }
 0xa81   :  { %v2648_v49 = vpop.f32.mrf.mxu1  ;;  %v2736_v51 = vpop.f32.mrf.mxu0 }
 0xa82   :  { %v3424_v49 = vld [vmem:[#allocation16 + $0x50] sm:$0xff]  ;;  %v3422_v51 = vld [vmem:[#allocation16 + $0x40] sm:$0xff] }
 0xa83   :  { %v7594_v52 = vpop.f32.mrf.mxu1  ;;  %v7614_v56 = vpop.f32.mrf.mxu0 }
 0xa84   :  { %v3421_v52 = vld [vmem:[#allocation16 + $0x38] sm:$0xff]  ;;  %v3420_v56 = vld [vmem:[#allocation16 + $0x30] sm:$0xff] }
 0xa85   :  { %v2778_v58 = vpop.f32.mrf.mxu1 }
 0xa86   :  { %v2784_v60 = vpack.c.bf16 %v2778_v58, %v2778_v58  ;;  %v3418_v58 = vld [vmem:[#allocation16 + $0x20] sm:$0xff] }
 0xa87   :  { %v7619_v12 = vpop.f32.mrf.mxu1 }
 0xa88   :  { %7638 = vmatmul.mubr.bf16.vlgmr.msra.gmra.mxu0 %v2784_v60  ;;  %v3417_v60 = vld [vmem:[#allocation16 + $0x18] sm:$0xff]  ;;  %v3416_v12 = vld [vmem:[#allocation16 + $0x10] sm:$0xff] }
 0xa89   :  { %7668 = vmatpush3.bf16.msra.mxu0 %v9677_v13  ;;  %v2781_v29 = vpop.f32.mrf.mxu1  ;;  %7669 = vmatprep.mubr.msk.bf16.mxu0 %vm8477_vm0, %v11142_v0 }
 0xa8a   :  { %7673 = vmatprep.subr.bf16.mxu0 %v11142_v0  ;;  %v3414_v29 = vld [vmem:[#allocation16] sm:$0xff] }
 0xa8b   :  { %v7620_v55 = vpop.f32.mrf.mxu1 }
 0xa8c   :  { %v6433_v55 = vld [vmem:[#allocation15] ss:$0 sm:$0xff] }
 0xa8d   :  { %v2930_v28 = vpop.f32.mrf.mxu1 }
 0xa8e   :  { %v2936_v32 = vpack.c.bf16 %v2930_v28, %v2930_v28 }
 0xa8f   :  { %v7645_v33 = vpop.f32.mrf.mxu1 }
 0xa90   :  { %7664 = vmatmul.mubr.bf16.vlgmr.msra.gmra.mxu1 %v2936_v32  ;;  %7670 = vmatmul.mubr.msk.bf16.vlgmr.msra.gmra.mxu0 %vm2435_vm9, %v9507_v61 }
 0xa91   :  { %7674 = vmatpush3.bf16.msra.mxu0 %v9677_v13  ;;  %7675 = vmatprep.mubr.msk.bf16.mxu0 %vm8477_vm0, %v11142_v0  ;;  %v2933_v34 = vpop.f32.mrf.mxu1 }
 0xa92   :  { %7699 = vmatprep.subr.bf16.mxu0 %v11142_v0  ;;  %7680 = vmatpush3.bf16.msra.mxu1 %v9513_v62 }
 0xa93   :  { %v7646_v35 = vpop.f32.mrf.mxu1  ;;  %7681 = vmatprep.subr.bf16.mxu1 %v11142_v0  ;;  %7695 = vmatprep.mubr.msk.bf16.mxu1 %vm8477_vm0, %v11142_v0 }
 0xa96   :  { %7682 = vmatpush3.bf16.msra.mxu1 %v9525_v3 }
 0xa97   :  { %7683 = vmatprep.subr.bf16.mxu1 %v11142_v0 }
 0xa98   :  { %7676 = vmatmul.mubr.msk.bf16.vlgmr.msra.gmra.mxu0 %vm2435_vm9, %v9511_v53 }
 0xa99   :  { %7700 = vmatpush3.bf16.msra.mxu0 %v9515_v1  ;;  %7715 = vmatprep.mubr.msk.bf16.mxu0 %vm8477_vm0, %v11142_v0 }
 0xa9a   :  { %7701 = vmatprep.subr.bf16.mxu0 %v11142_v0  ;;  %7684 = vmatpush3.bf16.msra.mxu1 %v9537_v5 }
 0xa9b   :  { %7685 = vmatprep.subr.bf16.mxu1 %v11142_v0 }
 0xa9d   :  { %7702 = vmatpush3.bf16.msra.mxu0 %v9527_v4 }
 0xa9e   :  { %7703 = vmatprep.subr.bf16.mxu0 %v11142_v0  ;;  %7686 = vmatpush3.bf16.msra.mxu1 %v9545_v7 }
 0xa9f   :  { %7687 = vmatprep.subr.bf16.mxu1 %v11142_v0 }
 0xaa1   :  { %7704 = vmatpush3.bf16.msra.mxu0 %v9539_v6 }
 0xaa2   :  { %7705 = vmatprep.subr.bf16.mxu0 %v11142_v0  ;;  %7688 = vmatpush3.bf16.msra.mxu1 %v9553_v21 }
 0xaa3   :  { %7689 = vmatprep.subr.bf16.mxu1 %v11142_v0 }
 0xaa5   :  { %7706 = vmatpush3.bf16.msra.mxu0 %v9547_v8 }
 0xaa6   :  { %7707 = vmatprep.subr.bf16.mxu0 %v11142_v0  ;;  %7690 = vmatpush3.bf16.msra.mxu1 %v9561_v23 }
 0xaa7   :  { %7691 = vmatprep.subr.bf16.mxu1 %v11142_v0 }
 0xaa9   :  { %7708 = vmatpush3.bf16.msra.mxu0 %v9555_v22 }
 0xaaa   :  { %7709 = vmatprep.subr.bf16.mxu0 %v11142_v0  ;;  %7692 = vmatpush3.bf16.msra.mxu1 %v9569_v25 }
 0xaab   :  { %7693 = vmatprep.subr.bf16.mxu1 %v11142_v0 }
 0xaad   :  { %7710 = vmatpush3.bf16.msra.mxu0 %v9563_v24 }
 0xaae   :  { %7711 = vmatprep.subr.bf16.mxu0 %v11142_v0  ;;  %7694 = vmatpush3.bf16.msra.mxu1 %v9577_v10 }
 0xaaf   :  { %7719 = vmatprep.subr.bf16.mxu1 %v11142_v0 }
 0xab1   :  { %7712 = vmatpush3.bf16.msra.mxu0 %v9571_v9 }
 0xab2   :  { %7713 = vmatprep.subr.bf16.mxu0 %v11142_v0 }
 0xab5   :  { %7714 = vmatpush3.bf16.msra.mxu0 %v9583_v11 }
 0xab6   :  { %7725 = vmatprep.subr.bf16.mxu0 %v11142_v0 }
 0xb48   :  { %v2884_v61 = vpop.f32.mrf.mxu0 }
 0xb49   :  { %v2890_v53 = vadd.f32 %v2884_v61, %v9672_v20  ;;  %v3427_v20 = vld [vmem:[#allocation16 + $0x68] sm:$0xff] }
 0xb4a   :  { %v7639_v62 = vpop.f32.mrf.mxu0 }
 0xb4c   :  { %v2887_v1 = vpop.f32.mrf.mxu0 }
 0xb4e   :  { %v7640_v3 = vpop.f32.mrf.mxu0 }
 0xb50   :  { %v3036_v4 = vpop.f32.mrf.mxu1  ;;  %v3087_v5 = vpop.f32.mrf.mxu0 }
 0xb51   :  { %v9728_v6 = vadd.f32 %v3036_v4, %v2890_v53  ;;  %v3093_v7 = vpack.c.bf16 %v3087_v5, %v3087_v5 }
 0xb52   :  { %v7671_v8 = vpop.f32.mrf.mxu0  ;;  %v7665_v21 = vpop.f32.mrf.mxu1 }
 0xb53   :  { %7716 = vmatmul.mubr.bf16.vlgmr.msra.gmra.mxu0 %v3093_v7  ;;  %v9816_v28 = vadd.f32 %v6433_v55, %v9728_v6 }
 0xb54   :  { %v3090_v22 = vpop.f32.mrf.mxu0  ;;  %v3039_v23 = vpop.f32.mrf.mxu1  ;;  %7726 = vmatpush3.bf16.msra.mxu0 %v9587_v54  ;;  %7741 = vmatprep.mubr.msk.bf16.mxu0 %vm8477_vm0, %v11142_v0 }
 0xb55   :  { %7727 = vmatprep.subr.bf16.mxu0 %v11142_v0  ;;  %v3388_v32 = vmul.f32 %v9816_v28, %v9816_v28  ;;  %v3380_v34 = vsel %vm2439_vm8, %v9816_v28, 0.0 }
 0xb56   :  { %v7672_v24 = vpop.f32.mrf.mxu0  ;;  %v7666_v25 = vpop.f32.mrf.mxu1  ;;  %v3381_v53 = vrot.slane %v3380_v34, 4 }
 0xb57   :  { %v3389_v61 = vsel %vm2439_vm8, %v3388_v32, 0.0 }
 0xb58   :  { %v3128_v9 = vpop.f32.mrf.mxu0  ;;  %7728 = vmatpush3.bf16.msra.mxu0 %v9594_v36  ;;  %v3390_v1 = vrot.slane %v3389_v61, 4  ;;  %v3382_v5 = vadd.f32 %v3381_v53, %v3380_v34 }
 0xb59   :  { %v3134_v10 = vpack.c.bf16 %v3128_v9, %v3128_v9  ;;  %7729 = vmatprep.subr.bf16.mxu0 %v11142_v0 }
 0xb5a   :  { %v7677_v11 = vpop.f32.mrf.mxu0  ;;  %v3391_v8 = vadd.f32 %v3390_v1, %v3389_v61  ;;  %v3383_v23 = vrot.slane %v3382_v5, 2 }
 0xb5b   :  { %7696 = vmatmul.mubr.bf16.vlgmr.msra.gmra.mxu1 %v3134_v10 }
 0xb5c   :  { %7720 = vmatpush3.bf16.msra.mxu1 %v9677_v13  ;;  %v3131_v15 = vpop.f32.mrf.mxu0  ;;  %7721 = vmatprep.mubr.msk.bf16.mxu1 %vm8477_vm0, %v11142_v0  ;;  %v3392_v10 = vrot.slane %v3391_v8, 2 }
 0xb5d   :  { %7745 = vmatprep.subr.bf16.mxu1 %v11142_v0  ;;  %7730 = vmatpush3.bf16.msra.mxu0 %v9602_v39 }
 0xb5e   :  { %v7678_v54 = vpop.f32.mrf.mxu0  ;;  %7731 = vmatprep.subr.bf16.mxu0 %v11142_v0 }
 0xb61   :  { %7732 = vmatpush3.bf16.msra.mxu0 %v9612_v40 }
 0xb62   :  { %7733 = vmatprep.subr.bf16.mxu0 %v11142_v0 }
 0xb63   :  { %7722 = vmatmul.mubr.msk.bf16.vlgmr.msra.gmra.mxu1 %vm2435_vm9, %v9599_v38 }
 0xb64   :  { %7746 = vmatpush3.bf16.msra.mxu1 %v9677_v13  ;;  %7747 = vmatprep.mubr.msk.bf16.mxu1 %vm8477_vm0, %v11142_v0  ;;  %v3415_v13 = vld [vmem:[#allocation16 + $0x8] sm:$0xff] }
 0xb65   :  { %7751 = vmatprep.subr.bf16.mxu1 %v11142_v0  ;;  %7734 = vmatpush3.bf16.msra.mxu0 %v9620_v59 }
 0xb66   :  { %7735 = vmatprep.subr.bf16.mxu0 %v11142_v0 }
 0xb69   :  { %7736 = vmatpush3.bf16.msra.mxu0 %v9632_v44 }
 0xb6a   :  { %7737 = vmatprep.subr.bf16.mxu0 %v11142_v0 }
 0xb6b   :  { %7748 = vmatmul.mubr.msk.bf16.vlgmr.msra.gmra.mxu1 %vm2435_vm9, %v9615_v41 }
 0xb6c   :  { %7752 = vmatpush3.bf16.msra.mxu1 %v9617_v42  ;;  %7767 = vmatprep.mubr.msk.bf16.mxu1 %vm8477_vm0, %v11142_v0 }
 0xb6d   :  { %7753 = vmatprep.subr.bf16.mxu1 %v11142_v0  ;;  %7738 = vmatpush3.bf16.msra.mxu0 %v9646_v47 }
 0xb6e   :  { %7739 = vmatprep.subr.bf16.mxu0 %v11142_v0 }
 0xb70   :  { %7754 = vmatpush3.bf16.msra.mxu1 %v9626_v43 }
 0xb71   :  { %7755 = vmatprep.subr.bf16.mxu1 %v11142_v0  ;;  %7740 = vmatpush3.bf16.msra.mxu0 %v9654_v63 }
 0xb72   :  { %7771 = vmatprep.subr.mxu0 %v11142_v0 }
 0xb74   :  { %7756 = vmatpush3.bf16.msra.mxu1 %v9636_v45 }
 0xb75   :  { %7757 = vmatprep.subr.bf16.mxu1 %v11142_v0 }
 0xb78   :  { %7758 = vmatpush3.bf16.msra.mxu1 %v9643_v46  ;;  %v3429_v46 = vld [vmem:[#allocation16 + $0x78] sm:$0xff] }
 0xb79   :  { %7759 = vmatprep.subr.bf16.mxu1 %v11142_v0 }
 0xb7c   :  { %7760 = vmatpush3.bf16.msra.mxu1 %v9649_v48  ;;  %v3428_v48 = vld [vmem:[#allocation16 + $0x70] sm:$0xff] }
 0xb7d   :  { %7761 = vmatprep.subr.bf16.mxu1 %v11142_v0 }
 0xb80   :  { %7762 = vmatpush3.bf16.msra.mxu1 %v9657_v2 }
 0xb81   :  { %7763 = vmatprep.subr.bf16.mxu1 %v11142_v0 }
 0xb84   :  { %7764 = vmatpush3.bf16.msra.mxu1 %v9663_v14 }
 0xb85   :  { %7765 = vmatprep.subr.bf16.mxu1 %v11142_v0 }
 0xb88   :  { %7766 = vmatpush3.bf16.msra.mxu1 %v9667_v17 }
 0xb89   :  { %7806 = vmatprep.subr.mxu1 %v11142_v0 }
 0xc13   :  { %v3209_v36 = vpop.f32.mrf.mxu0 }
 0xc15   :  { %v7717_v37 = vpop.f32.mrf.mxu0 }
 0xc17   :  { %v3212_v38 = vpop.f32.mrf.mxu0 }
 0xc19   :  { %v7718_v39 = vpop.f32.mrf.mxu0 }
 0xc1b   :  { %v3169_v40 = vpop.f32.mrf.mxu1 }
 0xc1c   :  { %v9778_v41 = vadd.f32 %v3209_v36, %v3169_v40  ;;  %v3384_v36 = vadd.f32 %v3383_v23, %v3382_v5 }
 0xc1d   :  { %v7697_v42 = vpop.f32.mrf.mxu1 }
 0xc1f   :  { %v3172_v59 = vpop.f32.mrf.mxu1 }
 0xc21   :  { %v7698_v43 = vpop.f32.mrf.mxu1 }
 0xc22   :  { %v3385_v43 = vrot.slane %v3384_v36, 1 }
 0xc23   :  { %v3249_v44 = vpop.f32.mrf.mxu1 }
 0xc24   :  { %v3255_v45 = vpack.c.bf16 %v3249_v44, %v3249_v44 }
 0xc25   :  { %v7723_v47 = vpop.f32.mrf.mxu1 }
 0xc26   :  { %7742 = vmatmul.mubr.bf16.vlgmr.msra.gmra.mxu0 %v3255_v45  ;;  %v3386_v47 = vadd.f32 %v3385_v43, %v3384_v36  ;;  %v10001_v43 = vld [vmem:[%s11127_s17 + $0xc0] ss:$8 sps:$4 sm:$0xff]  }
 0xc27   :  { %v3252_v63 = vpop.f32.mrf.mxu1  ;;  %7772 = vmatpush3.msra.mxu0 %v3429_v46  ;;  %7803 = vmatprep.mubr.msk.f32.mxu0 %vm8477_vm0, %v11142_v0 }
 0xc28   :  { %7773 = vmatprep.subr.mxu0 %v11142_v0 }
 0xc29   :  { %v7724_v2 = vpop.f32.mrf.mxu1  ;;  %7774 = vmatpush3.msra.mxu0 %v3428_v48 }
 0xc2a   :  { %7775 = vmatprep.subr.mxu0 %v11142_v0 }
 0xc2b   :  { %v3331_v14 = vpop.f32.mrf.mxu1  ;;  %7776 = vmatpush3.msra.mxu0 %v3427_v20 }
 0xc2c   :  { %v3337_v17 = vpack.c.bf16 %v3331_v14, %v3331_v14  ;;  %7777 = vmatprep.subr.mxu0 %v11142_v0 }
 0xc2d   :  { %v7749_v18 = vpop.f32.mrf.mxu1  ;;  %7778 = vmatpush3.msra.mxu0 %v3426_v30 }
 0xc2e   :  { %7768 = vmatmul.mubr.bf16.vlgmr.msra.gmra.mxu1 %v3337_v17  ;;  %7779 = vmatprep.subr.mxu0 %v11142_v0 }
 0xc2f   :  { %v3334_v26 = vpop.f32.mrf.mxu1  ;;  %7807 = vmatpush3.msra.mxu1 %v3429_v46  ;;  %7838 = vmatprep.mubr.msk.f32.mxu1 %vm8477_vm0, %v11142_v0 }
 0xc30   :  { %7808 = vmatprep.subr.mxu1 %v11142_v0  ;;  %7780 = vmatpush3.msra.mxu0 %v3425_v31  ;;  %v9836_v26 = vld [vmem:[%s11127_s17 + $0x70] ss:$8 sps:$4 sm:$0xff]  }
 0xc31   :  { %v7750_v27 = vpop.f32.mrf.mxu1  ;;  %7809 = vmatpush3.msra.mxu1 %v3428_v48  ;;  %7781 = vmatprep.subr.mxu0 %v11142_v0 }
 0xc32   :  { %7810 = vmatprep.subr.mxu1 %v11142_v0  ;;  %7782 = vmatpush3.msra.mxu0 %v3424_v49  ;;  %v9841_v27 = vld [vmem:[%s11127_s17 + $0x74] ss:$8 sps:$4 sm:$0xff]  }
 0xc33   :  { %7811 = vmatpush3.msra.mxu1 %v3427_v20  ;;  %7783 = vmatprep.subr.mxu0 %v11142_v0  ;;  %v9846_v20 = vld [vmem:[%s11127_s17 + $0x64] ss:$8 sps:$4 sm:$0xff]  }
 0xc34   :  { %7812 = vmatprep.subr.mxu1 %v11142_v0  ;;  %7784 = vmatpush3.msra.mxu0 %v3423_v50 }
 0xc35   :  { %7813 = vmatpush3.msra.mxu1 %v3426_v30  ;;  %7785 = vmatprep.subr.mxu0 %v11142_v0  ;;  %v9853_v30 = vld [vmem:[%s11127_s17 + $0x60] ss:$8 sps:$4 sm:$0xff]  }
 0xc36   :  { %7814 = vmatprep.subr.mxu1 %v11142_v0  ;;  %7786 = vmatpush3.msra.mxu0 %v3422_v51 }
 0xc37   :  { %7815 = vmatpush3.msra.mxu1 %v3425_v31  ;;  %7787 = vmatprep.subr.mxu0 %v11142_v0  ;;  %v9859_v31 = vld [vmem:[%s11127_s17 + $0x54] ss:$8 sps:$4 sm:$0xff]  }
 0xc38   :  { %7816 = vmatprep.subr.mxu1 %v11142_v0  ;;  %7788 = vmatpush3.msra.mxu0 %v3421_v52 }
 0xc39   :  { %7817 = vmatpush3.msra.mxu1 %v3424_v49  ;;  %7789 = vmatprep.subr.mxu0 %v11142_v0  ;;  %v9865_v49 = vld [vmem:[%s11127_s17 + $0x50] ss:$8 sps:$4 sm:$0xff]  }
 0xc3a   :  { %7818 = vmatprep.subr.mxu1 %v11142_v0  ;;  %7790 = vmatpush3.msra.mxu0 %v3420_v56 }
 0xc3b   :  { %7819 = vmatpush3.msra.mxu1 %v3423_v50  ;;  %7791 = vmatprep.subr.mxu0 %v11142_v0  ;;  %v9871_v50 = vld [vmem:[%s11127_s17 + $0x44] ss:$8 sps:$4 sm:$0xff]  }
 0xc3c   :  { %7820 = vmatprep.subr.mxu1 %v11142_v0  ;;  %7792 = vmatpush3.msra.mxu0 %v3419_v57 }
 0xc3d   :  { %7821 = vmatpush3.msra.mxu1 %v3422_v51  ;;  %7793 = vmatprep.subr.mxu0 %v11142_v0  ;;  %v9877_v51 = vld [vmem:[%s11127_s17 + $0x40] ss:$8 sps:$4 sm:$0xff]  }
 0xc3e   :  { %7822 = vmatprep.subr.mxu1 %v11142_v0  ;;  %7794 = vmatpush3.msra.mxu0 %v3418_v58 }
 0xc3f   :  { %7823 = vmatpush3.msra.mxu1 %v3421_v52  ;;  %7795 = vmatprep.subr.mxu0 %v11142_v0  ;;  %v9883_v52 = vld [vmem:[%s11127_s17 + $0x34] ss:$8 sps:$4 sm:$0xff]  }
 0xc40   :  { %7824 = vmatprep.subr.mxu1 %v11142_v0  ;;  %7796 = vmatpush3.msra.mxu0 %v3417_v60 }
 0xc41   :  { %7825 = vmatpush3.msra.mxu1 %v3420_v56  ;;  %7797 = vmatprep.subr.mxu0 %v11142_v0  ;;  %v9889_v56 = vld [vmem:[%s11127_s17 + $0x30] ss:$8 sps:$4 sm:$0xff]  }
 0xc42   :  { %7826 = vmatprep.subr.mxu1 %v11142_v0  ;;  %7798 = vmatpush3.msra.mxu0 %v3416_v12 }
 0xc43   :  { %7827 = vmatpush3.msra.mxu1 %v3419_v57  ;;  %7799 = vmatprep.subr.mxu0 %v11142_v0  ;;  %v9895_v57 = vld [vmem:[%s11127_s17 + $0x24] ss:$8 sps:$4 sm:$0xff]  }
 0xc44   :  { %7828 = vmatprep.subr.mxu1 %v11142_v0  ;;  %7800 = vmatpush3.msra.mxu0 %v3415_v13 }
 0xc45   :  { %7829 = vmatpush3.msra.mxu1 %v3418_v58  ;;  %7801 = vmatprep.subr.mxu0 %v11142_v0  ;;  %v9901_v58 = vld [vmem:[%s11127_s17 + $0x20] ss:$8 sps:$4 sm:$0xff]  }
 0xc46   :  { %7830 = vmatprep.subr.mxu1 %v11142_v0  ;;  %7802 = vmatpush3.msra.mxu0 %v3414_v29 }
 0xc47   :  { %7831 = vmatpush3.msra.mxu1 %v3417_v60  ;;  %7841 = vmatprep.subr.bf16.mxu0 %v11142_v0  ;;  %v9907_v60 = vld [vmem:[%s11127_s17 + $0x14] ss:$8 sps:$4 sm:$0xff]  }
 0xc48   :  { %7832 = vmatprep.subr.mxu1 %v11142_v0 }
 0xc49   :  { %7833 = vmatpush3.msra.mxu1 %v3416_v12  ;;  %v9913_v12 = vld [vmem:[%s11127_s17 + $0x10] ss:$8 sps:$4 sm:$0xff]  }
 0xc4a   :  { %7834 = vmatprep.subr.mxu1 %v11142_v0 }
 0xc4b   :  { %7835 = vmatpush3.msra.mxu1 %v3415_v13  ;;  %v9919_v13 = vld [vmem:[%s11127_s17 + $0x4] ss:$8 sps:$4 sm:$0xff]  }
 0xc4c   :  { %7836 = vmatprep.subr.mxu1 %v11142_v0 }
 0xc4d   :  { %7837 = vmatpush3.msra.mxu1 %v3414_v29  ;;  %v9925_v29 = vld [vmem:[%s11127_s17] ss:$8 sps:$4 sm:$0xff]  }
 0xc4e   :  { %3934 = vmatprep.subr.bf16.mxu1 %v9841_v27 }
 0xce6   :  { %v3290_v33 = vpop.f32.mrf.mxu0 }
 0xce7   :  { %v3296_v4 = vadd.f32 %v3290_v33, %v9778_v41  ;;  %v3393_v41 = vadd.f32 %v3392_v10, %v3391_v8 }
 0xce8   :  { %v7743_v35 = vpop.f32.mrf.mxu0 }
 0xce9   :  { %v3394_v45 = vrot.slane %v3393_v41, 1 }
 0xcea   :  { %v3293_v62 = vpop.f32.mrf.mxu0 }
 0xceb   :  { %v3395_v14 = vadd.f32 %v3394_v45, %v3393_v41  ;;  %v9983_v41 = vld [vmem:[%s11127_s17 + $0xd4] ss:$8 sps:$4 sm:$0xff]   ;;  %v10013_v45 = vld [vmem:[%s11127_s17 + $0xb0] ss:$8 sps:$4 sm:$0xff]  }
 0xcec   :  { %v7744_v3 = vpop.f32.mrf.mxu0 }
 0xced   :  { %v3576_v3 = vld [vmem:[#allocation18] sm:$0x1] }
 0xcee   :  { %v3372_v7 = vpop.f32.mrf.mxu1 }
 0xcef   :  { %v3378_v6 = vadd.f32 %v3372_v7, %v3296_v4  ;;  %v3578_v7 = vld [vmem:[#allocation19] sm:$0x1] }
 0xcf0   :  { %v7769_v21 = vpop.f32.mrf.mxu1 }
 0xcf1   :  { %v9824_v22 = vadd.f32 %v6433_v55, %v3378_v6 }
 0xcf2   :  { %v3375_v24 = vpop.f32.mrf.mxu1 }
 0xcf3   :  { %v3397_v25 = vsel %vm2439_vm8, %v9824_v22, 0.0  ;;  %v3405_v9 = vmul.f32 %v9824_v22, %v9824_v22 }
 0xcf4   :  { %v3398_v11 = vrot.slane %v3397_v25, 4  ;;  %v7770_v15 = vpop.f32.mrf.mxu1 }
 0xcf5   :  { %v3406_v54 = vsel %vm2439_vm8, %v3405_v9, 0.0  ;;  %vm6184_vm8 = vcmask 9216  }
 0xcf6   :  { %v3399_v37 = vadd.f32 %v3398_v11, %v3397_v25  ;;  %v3407_v38 = vrot.slane %v3406_v54, 4 }
 0xcf8   :  { %v3400_v39 = vrot.slane %v3399_v37, 2  ;;  %v3408_v40 = vadd.f32 %v3407_v38, %v3406_v54  ;;  %v9964_v38 = vld [vmem:[%s11127_s17 + $0xf0] ss:$8 sps:$4 sm:$0xff]  }
 0xcfa   :  { %v3401_v42 = vadd.f32 %v3400_v39, %v3399_v37  ;;  %v3409_v59 = vrot.slane %v3408_v40, 2  ;;  %v9959_v37 = vld [vmem:[%s11126_s16 + $0x2] sm:$0x3]  ;;  %v9969_v39 = vld [vmem:[%s11127_s17 + $0xe4] ss:$8 sps:$4 sm:$0xff]  }
 0xcfc   :  { %v3402_v44 = vrot.slane %v3401_v42, 1  ;;  %v3410_v46 = vadd.f32 %v3409_v59, %v3408_v40  ;;  %v9977_v40 = vld [vmem:[%s11127_s17 + $0xe0] ss:$8 sps:$4 sm:$0xff]   ;;  %v9995_v59 = vld [vmem:[%s11127_s17 + $0xc4] ss:$8 sps:$4 sm:$0xff]  }
 0xcfe   :  { %v3403_v48 = vadd.f32 %v3402_v44, %v3401_v42  ;;  %v3411_v63 = vrot.slane %v3410_v46, 1  ;;  %v9989_v42 = vld [vmem:[%s11127_s17 + $0xd0] ss:$8 sps:$4 sm:$0xff]   ;;  %v10007_v44 = vld [vmem:[%s11127_s17 + $0xb4] ss:$8 sps:$4 sm:$0xff]  }
 0xd00   :  { %v3404_v2 = vadd.f32 %v3403_v48, %v3386_v47  ;;  %v3412_v17 = vadd.f32 %v3411_v63, %v3410_v46  ;;  %v10019_v46 = vld [vmem:[%s11127_s17 + $0xa4] ss:$8 sps:$4 sm:$0xff]   ;;  %v10025_v47 = vld [vmem:[%s11127_s17 + $0xa0] ss:$8 sps:$4 sm:$0xff]   ;;  %v10032_v48 = vld [vmem:[%s11127_s17 + $0x94] ss:$8 sps:$4 sm:$0xff]  }
 0xd01   :  { %v10037_v63 = vld [vmem:[%s11127_s17 + $0x90] ss:$8 sps:$4 sm:$0xff]  }
 0xd02   :  { %7804 = vmatmul.mubr.f32.vlgmr.msra.gmra.mxu0 %v3404_v2  ;;  %v3413_v18 = vadd.f32 %v3412_v17, %v3395_v14  ;;  %v11140_v2 = vmov 0   ;;  %v10046_v14 = vld [vmem:[%s11127_s17 + $0x84] ss:$8 sps:$4 sm:$0xff]   ;;  %v10051_v17 = vld [vmem:[%s11127_s17 + $0x80] ss:$8 sps:$4 sm:$0xff]  }
 0xd03   :  { %7843 = vmatprep.mubr.msk.bf16.mxu0 %vm8477_vm0, %v11142_v0 }
 0xd04   :  { %7839 = vmatmul.mubr.f32.vlgmr.msra.gmra.mxu1 %v3413_v18  ;;  %v10059_v18 = vld [vmem:[%s11127_s17 + $0x174] ss:$8 sps:$4 sm:$0xff]  }
 0xd05   :  { %3935 = vmatpush1.bf16.msra.mxu1 %v9836_v26  ;;  %3966 = vmatprep.mubr.bf16.mxu1 %v11140_v2 }
 0xd06   :  { %3936 = vmatprep.subr.bf16.mxu1 %v9846_v20 }
 0xd09   :  { %3937 = vmatpush1.bf16.msra.mxu1 %v9853_v30 }
 0xd0a   :  { %3938 = vmatprep.subr.bf16.mxu1 %v9859_v31 }
 0xd0d   :  { %3939 = vmatpush1.bf16.msra.mxu1 %v9865_v49 }
 0xd0e   :  { %3940 = vmatprep.subr.bf16.mxu1 %v9871_v50 }
 0xd11   :  { %3941 = vmatpush1.bf16.msra.mxu1 %v9877_v51 }
 0xd12   :  { %3942 = vmatprep.subr.bf16.mxu1 %v9883_v52 }
 0xd15   :  { %3943 = vmatpush1.bf16.msra.mxu1 %v9889_v56 }
 0xd16   :  { %3944 = vmatprep.subr.bf16.mxu1 %v9895_v57 }
 0xd19   :  { %3945 = vmatpush1.bf16.msra.mxu1 %v9901_v58 }
 0xd1a   :  { %3946 = vmatprep.subr.bf16.mxu1 %v9907_v60 }
 0xd1d   :  { %3947 = vmatpush1.bf16.msra.mxu1 %v9913_v12 }
 0xd1e   :  { %3948 = vmatprep.subr.bf16.mxu1 %v9919_v13 }
 0xd21   :  { %3949 = vmatpush1.bf16.msra.mxu1 %v9925_v29 }
 0xd22   :  { %4118 = vmatprep.subr.bf16.mxu1 %v10059_v18 }
 0xdc2   :  { %v3496_v55 = vpop.f32.mrf.mxu0 }
 0xdc3   :  { %v3500_v32 = vmul.f32 0.03125, %v3496_v55 }
 0xdc4   :  { %v7805_v33 = vpop.f32.mrf.mxu0  ;;  %v3567_v34 = vpop.f32.mrf.mxu1 }
 0xdc5   :  { %v3572_v35 = vmul.f32 %v3500_v32, %v3500_v32  ;;  %v3571_v61 = vmul.f32 0.03125, %v3567_v34  ;;  %v10070_v34 = vld [vmem:[%s11127_s17 + $0x164] ss:$8 sps:$4 sm:$0xff]  }
 0xdc6   :  { %v7840_v53 = vpop.f32.mrf.mxu1 }
 0xdc7   :  { %v3573_v62 = vsub.f32 %v3571_v61, %v3572_v35  ;;  %v10076_v53 = vld [vmem:[%s11127_s17 + $0x160] ss:$8 sps:$4 sm:$0xff]  }
 0xdc9   :  { %v3574_v1 = vadd.f32 1e-05, %v3573_v62  ;;  %v10083_v62 = vld [vmem:[%s11127_s17 + $0x154] ss:$8 sps:$4 sm:$0xff]  }
 0xdcb   :  { %8163 = vrsqrt.f32 %v3574_v1 }
 0xdd8   :  { %v8164_v4 = vpop.eup %8163 }
 0xdd9   :  { %v3577_v5 = vmul.f32 %v8164_v4, %v3576_v3 }
 0xddb   :  { %v3579_v6 = vmul.f32 %v3577_v5, %v3500_v32  ;;  %v3584_v8 = vrot.slane %v3577_v5, %v9497_v19  ;;  %v10065_v32 = vld [vmem:[%s11127_s17 + $0x170] ss:$8 sps:$4 sm:$0xff]  }
 0xddc   :  { %v10089_v5 = vld [vmem:[%s11127_s17 + $0x150] ss:$8 sps:$4 sm:$0xff]  }
 0xddd   :  { %v3580_v21 = vsub.f32 %v3578_v7, %v3579_v6  ;;  %v3585_v23 = vmul.f32 %v3584_v8, %v9816_v28  ;;  %v3593_v25 = vmul.f32 %v3584_v8, %v9824_v22  ;;  %v9942_v28 = vld [vmem:[%s11126_s16] sm:$0x3]  ;;  %v9948_v22 = vld [vmem:[%s11127_s17 + $0xf4] ss:$8 sps:$4 sm:$0xff]   ;;  %v10095_v6 = vld [vmem:[%s11127_s17 + $0x144] ss:$8 sps:$4 sm:$0xff]  }
 0xddf   :  { %v3590_v24 = vrot.slane %v3580_v21, %v9497_v19  ;;  %v10105_v21 = vld [vmem:[%s11127_s17 + $0x140] ss:$8 sps:$4 sm:$0xff]  }
 0xde0   :  { %v10231_v19 = vld [vmem:[%s11127_s17 + $0x100] ss:$8 sps:$4 sm:$0xff]  }
 0xde1   :  { %v3592_v9 = vadd.f32 %v3590_v24, %v3585_v23  ;;  %v9933_v10 = vadd.f32 %v3593_v25, %v3590_v24  ;;  %v10111_v24 = vld [vmem:[%s11126_s16 + $0x4] sm:$0x3]  ;;  %v10116_v25 = vld [vmem:[%s11127_s17 + $0x1f4] ss:$8 sps:$4 sm:$0xff]   ;;  %11211 = vst [vmem:[#allocation45_spill] sm:$0xff] %v10231_v19 }
 0xde3   :  { %vm3595_vm11 = vcmp.gt.f32.partialorder %v3592_v9, 0.0  ;;  %v3596_v11 = vmul.f32 0.2, %v3592_v9  ;;  %vm3599_vm14 = vcmp.gt.f32.partialorder %v9933_v10, 0.0 }
 0xde5   :  { %v3597_v15 = vsel %vm3595_vm11, %v3592_v9, %v3596_v11  ;;  %v10128_v9 = vld [vmem:[%s11126_s16 + $0x6] sm:$0x3]  ;;  %v10133_v11 = vld [vmem:[%s11127_s17 + $0x1f0] ss:$8 sps:$4 sm:$0xff]  }
 0xde6   :  { %v3598_v54 = vpack.c.bf16 %v3597_v15, %v3597_v15  ;;  %11197 = vst [vmem:[#allocation31_spill] sm:$0xff] %v10128_v9  ;;  %11198 = vst [vmem:[#allocation32_spill] sm:$0xff] %v10133_v11  ;;  %v10138_v15 = vld [vmem:[%s11127_s17 + $0x1e4] ss:$8 sps:$4 sm:$0xff]  }
 0xde7   :  { %11199 = vst [vmem:[#allocation33_spill] sm:$0xff] %v10138_v15 }
 0xde8   :  { %v9936_v36 = vsel %vm3609_vm12, %v3598_v54, 0  ;;  %v10146_v54 = vld [vmem:[%s11127_s17 + $0x1e0] ss:$8 sps:$4 sm:$0xff]  }
 0xde9   :  { %7842 = vmatpush3.bf16.msra.mxu0 %v9936_v36  ;;  %11200 = vst [vmem:[#allocation34_spill] sm:$0xff] %v10146_v54 }
 0xdea   :  { %7847 = vmatprep.subr.bf16.mxu0 %v11142_v0 }
 0xdec   :  { %7844 = vmatmul.mubr.msk.bf16.vlgmr.msra.gmra.mxu0 %vm3605_vm13, %v9942_v28 }
 0xded   :  { %7848 = vmatpush3.bf16.msra.mxu0 %v9936_v36  ;;  %7849 = vmatprep.mubr.msk.bf16.mxu0 %vm8477_vm0, %v11142_v0 }
 0xdee   :  { %3813 = vmatprep.subr.bf16.mxu0 %v9948_v22 }
 0xdf4   :  { %7850 = vmatmul.mubr.msk.bf16.vlgmr.msra.gmra.mxu0 %vm3605_vm13, %v9959_v37 }
 0xdf5   :  { %3814 = vmatpush1.bf16.msra.mxu0 %v9964_v38  ;;  %3845 = vmatprep.mubr.bf16.mxu0 %v11140_v2 }
 0xdf6   :  { %3815 = vmatprep.subr.bf16.mxu0 %v9969_v39 }
 0xdf9   :  { %3816 = vmatpush1.bf16.msra.mxu0 %v9977_v40 }
 0xdfa   :  { %3817 = vmatprep.subr.bf16.mxu0 %v9983_v41 }
 0xdfd   :  { %3818 = vmatpush1.bf16.msra.mxu0 %v9989_v42 }
 0xdfe   :  { %3819 = vmatprep.subr.bf16.mxu0 %v9995_v59 }
 0xe01   :  { %3820 = vmatpush1.bf16.msra.mxu0 %v10001_v43 }
 0xe02   :  { %3821 = vmatprep.subr.bf16.mxu0 %v10007_v44 }
 0xe05   :  { %3822 = vmatpush1.bf16.msra.mxu0 %v10013_v45 }
 0xe06   :  { %3823 = vmatprep.subr.bf16.mxu0 %v10019_v46 }
 0xe09   :  { %3824 = vmatpush1.bf16.msra.mxu0 %v10025_v47 }
 0xe0a   :  { %3825 = vmatprep.subr.bf16.mxu0 %v10032_v48 }
 0xe0d   :  { %3826 = vmatpush1.bf16.msra.mxu0 %v10037_v63 }
 0xe0e   :  { %3827 = vmatprep.subr.bf16.mxu0 %v10046_v14 }
 0xe11   :  { %3828 = vmatpush1.bf16.msra.mxu0 %v10051_v17 }
 0xe12   :  { %7853 = vmatprep.subr.bf16.mxu0 %v11142_v0 }
 0xeac   :  { %v3647_v55 = vpop.f32.mrf.mxu0 }
 0xead   :  { %v3653_v33 = vpack.c.bf16 %v3647_v55, %v3647_v55  ;;  %v10159_v55 = vld [vmem:[%s11127_s17 + $0x130] ss:$8 sps:$4 sm:$0xff]  }
 0xeae   :  { %v7845_v35 = vpop.f32.mrf.mxu0 }
 0xeaf   :  { %3967 = vmatmul.mubr.bf16.vlgmr.msra.gmra.mxu1 %v3653_v33  ;;  %v10164_v33 = vld [vmem:[%s11127_s17 + $0x1d0] ss:$8 sps:$4 sm:$0xff]   ;;  %v10169_v35 = vld [vmem:[%s11127_s17 + $0x1d4] ss:$8 sps:$4 sm:$0xff]  }
 0xeb0   :  { %v3650_v61 = vpop.f32.mrf.mxu0  ;;  %4119 = vmatpush1.bf16.msra.mxu1 %v10065_v32  ;;  %4150 = vmatprep.mubr.bf16.mxu1 %v11140_v2  ;;  %11201 = vst [vmem:[#allocation35_spill] sm:$0xff] %v10164_v33  ;;  %11202 = vst [vmem:[#allocation36_spill] sm:$0xff] %v10169_v35 }
 0xeb1   :  { %4120 = vmatprep.subr.bf16.mxu1 %v10070_v34  ;;  %v10178_v61 = vld [vmem:[%s11127_s17 + $0x124] ss:$8 sps:$4 sm:$0xff]  }
 0xeb2   :  { %v7846_v1 = vpop.f32.mrf.mxu0 }
 0xeb3   :  { %v10183_v1 = vld [vmem:[%s11127_s17 + $0x120] ss:$8 sps:$4 sm:$0xff]  }
 0xeb4   :  { %v3709_v3 = vpop.f32.mrf.mxu0  ;;  %4121 = vmatpush1.bf16.msra.mxu1 %v10076_v53  ;;  %11203 = vst [vmem:[#allocation37_spill] sm:$0xff] %v10183_v1 }
 0xeb5   :  { %v3715_v4 = vpack.c.bf16 %v3709_v3, %v3709_v3  ;;  %4122 = vmatprep.subr.bf16.mxu1 %v10083_v62  ;;  %v10188_v3 = vld [vmem:[%s11127_s17 + $0x1c0] ss:$8 sps:$4 sm:$0xff]  }
 0xeb6   :  { %v7851_v7 = vpop.f32.mrf.mxu0  ;;  %11204 = vst [vmem:[#allocation38_spill] sm:$0xff] %v10188_v3 }
 0xeb7   :  { %3846 = vmatmul.mubr.bf16.vlgmr.msra.gmra.mxu0 %v3715_v4  ;;  %v10193_v4 = vld [vmem:[%s11127_s17 + $0x1c4] ss:$8 sps:$4 sm:$0xff]   ;;  %v10202_v7 = vld [vmem:[%s11127_s17 + $0x114] ss:$8 sps:$4 sm:$0xff]  }
 0xeb8   :  { %7854 = vmatpush3.bf16.msra.mxu0 %v9936_v36  ;;  %v3712_v8 = vpop.f32.mrf.mxu0  ;;  %7855 = vmatprep.mubr.msk.bf16.mxu0 %vm8477_vm0, %v11142_v0  ;;  %11205 = vst [vmem:[#allocation39_spill] sm:$0xff] %v10193_v4  ;;  %11206 = vst [vmem:[#allocation40_spill] sm:$0xff] %v10202_v7 }
 0xeb9   :  { %7859 = vmatprep.subr.bf16.mxu0 %v11142_v0  ;;  %4123 = vmatpush1.bf16.msra.mxu1 %v10089_v5  ;;  %v10207_v8 = vld [vmem:[%s11127_s17 + $0x110] ss:$8 sps:$4 sm:$0xff]  }
 0xeba   :  { %v7852_v23 = vpop.f32.mrf.mxu0  ;;  %4124 = vmatprep.subr.bf16.mxu1 %v10095_v6  ;;  %11207 = vst [vmem:[#allocation41_spill] sm:$0xff] %v10207_v8 }
 0xebb   :  { %v10212_v23 = vld [vmem:[%s11127_s17 + $0x1b4] ss:$8 sps:$4 sm:$0xff]  }
 0xebc   :  { %11208 = vst [vmem:[#allocation42_spill] sm:$0xff] %v10212_v23 }
 0xebd   :  { %4125 = vmatpush1.bf16.msra.mxu1 %v10105_v21 }
 0xebf   :  { %7856 = vmatmul.mubr.msk.bf16.vlgmr.msra.gmra.mxu0 %vm3605_vm13, %v10111_v24 }
 0xec0   :  { %7860 = vmatpush3.bf16.msra.mxu0 %v9936_v36  ;;  %7861 = vmatprep.mubr.msk.bf16.mxu0 %vm8477_vm0, %v11142_v0  ;;  %v10154_v36 = vld [vmem:[%s11127_s17 + $0x134] ss:$8 sps:$4 sm:$0xff]   ;;  %v10226_v0 = vld [vmem:[%s11127_s17 + $0x104] ss:$8 sps:$4 sm:$0xff]  }
 0xec1   :  { %4304 = vmatprep.subr.bf16.mxu0 %v10116_v25  ;;  %4126 = vmatprep.subr.bf16.mxu1 %v10154_v36  ;;  %11210 = vst [vmem:[#allocation44_spill] sm:$0xff] %v10226_v0 }
 0xec2   :  { %4127 = vmatpush1.bf16.msra.mxu1 %v10159_v55 }
 0xec3   :  { %4128 = vmatprep.subr.bf16.mxu1 %v10178_v61 }
 0xec6   :  { %4129 = vmatpush1.bf16.msra.mxu1 %v10183_v1 }
 0xec7   :  { %7862 = vmatmul.mubr.msk.bf16.vlgmr.msra.gmra.mxu0 %vm3605_vm13, %v10128_v9  ;;  %4130 = vmatprep.subr.bf16.mxu1 %v10202_v7 }
 0xec8   :  { %4305 = vmatpush1.bf16.msra.mxu0 %v10133_v11  ;;  %4336 = vmatprep.mubr.bf16.mxu0 %v11140_v2  ;;  %v10218_v2 = vld [vmem:[%s11127_s17 + $0x1b0] ss:$8 sps:$4 sm:$0xff]  }
 0xec9   :  { %4306 = vmatprep.subr.bf16.mxu0 %v10138_v15  ;;  %11209 = vst [vmem:[#allocation43_spill] sm:$0xff] %v10218_v2 }
 0xeca   :  { %4131 = vmatpush1.bf16.msra.mxu1 %v10207_v8 }
 0xecb   :  { %4132 = vmatprep.subr.bf16.mxu1 %v10226_v0 }
 0xecc   :  { %4307 = vmatpush1.bf16.msra.mxu0 %v10146_v54  ;;  %v3600_v54 = vmul.f32 0.2, %v9933_v10 }
 0xecd   :  { %4308 = vmatprep.subr.bf16.mxu0 %v10169_v35 }
 0xece   :  { %4133 = vmatpush1.bf16.msra.mxu1 %v10231_v19 }
 0xed0   :  { %4309 = vmatpush1.bf16.msra.mxu0 %v10164_v33 }
 0xed1   :  { %4310 = vmatprep.subr.bf16.mxu0 %v10193_v4  ;;  %v10256_v4 = vld [vmem:[%s11127_s17 + $0x190] ss:$8 sps:$4 sm:$0xff]  }
 0xed2   :  { %11216 = vst [vmem:[#allocation49_spill] sm:$0xff] %v10256_v4 }
 0xed4   :  { %4311 = vmatpush1.bf16.msra.mxu0 %v10188_v3  ;;  %v10251_v3 = vld [vmem:[%s11127_s17 + $0x194] ss:$8 sps:$4 sm:$0xff]  }
 0xed5   :  { %4312 = vmatprep.subr.bf16.mxu0 %v10212_v23  ;;  %v10241_v23 = vld [vmem:[%s11127_s17 + $0x1a4] ss:$8 sps:$4 sm:$0xff]   ;;  %11215 = vst [vmem:[#allocation48_spill] sm:$0xff] %v10251_v3 }
 0xed6   :  { %11213 = vst [vmem:[#allocation47_spill] sm:$0xff] %v10241_v23 }
 0xed8   :  { %4313 = vmatpush1.bf16.msra.mxu0 %v10218_v2  ;;  %v11214_v2 = vmov 0.0  }
 0xed9   :  { %4314 = vmatprep.subr.bf16.mxu0 %v10241_v23  ;;  %7865 = vmatprep.subr.bf16.mxu1 %v11214_v2  ;;  %v10268_v23 = vld [vmem:[%s11127_s17 + $0x184] ss:$8 sps:$4 sm:$0xff]  }
 0xeda   :  { %11218 = vst [vmem:[#allocation51_spill] sm:$0xff] %v10268_v23 }
 0xedc   :  { %4315 = vmatpush1.bf16.msra.mxu0 %v10236_v16  ;;  %v10263_v16 = vld [vmem:[%s11127_s17 + $0x180] ss:$8 sps:$4 sm:$0xff]  }
 0xedd   :  { %4316 = vmatprep.subr.bf16.mxu0 %v10251_v3  ;;  %11217 = vst [vmem:[#allocation50_spill] sm:$0xff] %v10263_v16 }
 0xee0   :  { %4317 = vmatpush1.bf16.msra.mxu0 %v10256_v4 }
 0xee1   :  { %4318 = vmatprep.subr.bf16.mxu0 %v10268_v23  ;;  %v3601_v23 = vsel %vm3599_vm14, %v9933_v10, %v3600_v54 }
 0xee2   :  { %v3602_v9 = vpack.c.bf16 %v3601_v23, %v3601_v23 }
 0xee4   :  { %4319 = vmatpush1.bf16.msra.mxu0 %v10263_v16 }
 0xee5   :  { %4445 = vmatprep.subr.bf16.mxu0 %v9948_v22 }
 0xf6f   :  { %v3968_v33 = vpop.f32.mrf.mxu1 }
 0xf71   :  { %v3970_v3 = vpop.f32.mrf.mxu1 }
 0xf73   :  { %v3972_v19 = vpop.f32.mrf.mxu1 }
 0xf74   :  { %v10281_v19 = vsel %vm3609_vm12, %v3602_v9, 0 }
 0xf75   :  { %v3973_v4 = vpop.f32.mrf.mxu1 }
 0xf77   :  { %v3847_v35 = vpop.f32.mrf.mxu0 }
 0xf78   :  { %v10274_v0 = vadd.f32 %v3968_v33, %v3847_v35 }
 0xf79   :  { %v3849_v8 = vpop.f32.mrf.mxu0 }
 0xf7a   :  { %v10277_v15 = vadd.f32 %v3970_v3, %v3849_v8 }
 0xf7b   :  { %v3851_v11 = vpop.f32.mrf.mxu0 }
 0xf7d   :  { %v3852_v16 = vpop.f32.mrf.mxu0 }
 0xf7f   :  { %v4014_v22 = vpop.f32.mrf.mxu0 }
 0xf80   :  { %v4020_v7 = vpack.c.bf16 %v4014_v22, %v4014_v22 }
 0xf81   :  { %v7857_v1 = vpop.f32.mrf.mxu0 }
 0xf82   :  { %4151 = vmatmul.mubr.bf16.vlgmr.msra.gmra.mxu1 %v4020_v7  ;;  %v11219_v1 = vmov 0  }
 0xf83   :  { %7866 = vmatpush3.bf16.msra.mxu1 %v10281_v19  ;;  %v4017_v33 = vpop.f32.mrf.mxu0  ;;  %7867 = vmatprep.mubr.msk.bf16.mxu1 %vm8477_vm0, %v11214_v2 }
 0xf84   :  { %7871 = vmatprep.subr.bf16.mxu1 %v11214_v2  ;;  %v4797_v33 = vld [vmem:[%s11129_s19 + $0xf0] sm:$0xff] }
 0xf85   :  { %v7858_v11 = vpop.f32.mrf.mxu0 }
 0xf87   :  { %v4200_v35 = vpop.f32.mrf.mxu0 }
 0xf88   :  { %v4206_v10 = vpack.c.bf16 %v4200_v35, %v4200_v35  ;;  %v4796_v35 = vld [vmem:[%s11129_s19 + $0xe8] sm:$0xff] }
 0xf89   :  { %v7863_v16 = vpop.f32.mrf.mxu0 }
 0xf8a   :  { %4337 = vmatmul.mubr.bf16.vlgmr.msra.gmra.mxu0 %v4206_v10  ;;  %7868 = vmatmul.mubr.msk.bf16.vlgmr.msra.gmra.mxu1 %vm3605_vm13, %v9942_v28  ;;  %v4795_v10 = vld [vmem:[%s11129_s19 + $0xe0] sm:$0xff] }
 0xf8b   :  { %7872 = vmatpush3.bf16.msra.mxu1 %v10281_v19  ;;  %7873 = vmatprep.mubr.msk.bf16.mxu1 %vm8477_vm0, %v11214_v2  ;;  %v4203_v9 = vpop.f32.mrf.mxu0 }
 0xf8c   :  { %4486 = vmatprep.subr.bf16.mxu1 %v9841_v27  ;;  %4446 = vmatpush1.bf16.msra.mxu0 %v9964_v38  ;;  %v4794_v9 = vld [vmem:[%s11129_s19 + $0xd8] sm:$0xff] }
 0xf8d   :  { %v7864_v54 = vpop.f32.mrf.mxu0  ;;  %4447 = vmatprep.subr.bf16.mxu0 %v9969_v39  ;;  %4477 = vmatprep.mubr.bf16.mxu0 %v11219_v1 }
 0xf8e   :  { %v4793_v54 = vld [vmem:[%s11129_s19 + $0xd0] sm:$0xff] }
 0xf90   :  { %4448 = vmatpush1.bf16.msra.mxu0 %v9977_v40 }
 0xf91   :  { %4449 = vmatprep.subr.bf16.mxu0 %v9983_v41  ;;  %v11220_v41 = vld [vmem:[#allocation37_spill] sm:$0xff] }
 0xf92   :  { %7874 = vmatmul.mubr.msk.bf16.vlgmr.msra.gmra.mxu1 %vm3605_vm13, %v9959_v37 }
 0xf93   :  { %4487 = vmatpush1.bf16.msra.mxu1 %v9836_v26  ;;  %4518 = vmatprep.mubr.bf16.mxu1 %v11219_v1 }
 0xf94   :  { %4488 = vmatprep.subr.bf16.mxu1 %v9846_v20  ;;  %4450 = vmatpush1.bf16.msra.mxu0 %v9989_v42  ;;  %v11221_v42 = vld [vmem:[#allocation40_spill] sm:$0xff] }
 0xf95   :  { %4451 = vmatprep.subr.bf16.mxu0 %v9995_v59  ;;  %v11222_v59 = vld [vmem:[#allocation31_spill] sm:$0xff] }
 0xf97   :  { %4489 = vmatpush1.bf16.msra.mxu1 %v9853_v30 }
 0xf98   :  { %4490 = vmatprep.subr.bf16.mxu1 %v9859_v31  ;;  %4452 = vmatpush1.bf16.msra.mxu0 %v10001_v43  ;;  %v11223_v43 = vld [vmem:[#allocation32_spill] sm:$0xff] }
 0xf99   :  { %4453 = vmatprep.subr.bf16.mxu0 %v10007_v44  ;;  %v11224_v44 = vld [vmem:[#allocation33_spill] sm:$0xff] }
 0xf9b   :  { %4491 = vmatpush1.bf16.msra.mxu1 %v9865_v49 }
 0xf9c   :  { %4492 = vmatprep.subr.bf16.mxu1 %v9871_v50  ;;  %4454 = vmatpush1.bf16.msra.mxu0 %v10013_v45  ;;  %v11225_v45 = vld [vmem:[#allocation41_spill] sm:$0xff] }
 0xf9d   :  { %4455 = vmatprep.subr.bf16.mxu0 %v10019_v46  ;;  %v11226_v46 = vld [vmem:[#allocation44_spill] sm:$0xff] }
 0xf9f   :  { %4493 = vmatpush1.bf16.msra.mxu1 %v9877_v51 }
 0xfa0   :  { %4494 = vmatprep.subr.bf16.mxu1 %v9883_v52  ;;  %4456 = vmatpush1.bf16.msra.mxu0 %v10025_v47  ;;  %v11227_v47 = vld [vmem:[#allocation34_spill] sm:$0xff] }
 0xfa1   :  { %4457 = vmatprep.subr.bf16.mxu0 %v10032_v48  ;;  %v11228_v48 = vld [vmem:[#allocation36_spill] sm:$0xff] }
 0xfa3   :  { %4495 = vmatpush1.bf16.msra.mxu1 %v9889_v56 }
 0xfa4   :  { %4496 = vmatprep.subr.bf16.mxu1 %v9895_v57  ;;  %4458 = vmatpush1.bf16.msra.mxu0 %v10037_v63  ;;  %v11229_v63 = vld [vmem:[#allocation45_spill] sm:$0xff] }
 0xfa5   :  { %4459 = vmatprep.subr.bf16.mxu0 %v10046_v14  ;;  %v11231_v14 = vld [vmem:[#allocation39_spill] sm:$0xff] }
 0xfa7   :  { %4497 = vmatpush1.bf16.msra.mxu1 %v9901_v58 }
 0xfa8   :  { %4498 = vmatprep.subr.bf16.mxu1 %v9907_v60  ;;  %4460 = vmatpush1.bf16.msra.mxu0 %v10051_v17  ;;  %v11232_v17 = vld [vmem:[#allocation38_spill] sm:$0xff] }
 0xfa9   :  { %7877 = vmatprep.subr.bf16.mxu0 %v11214_v2 }
 0xfab   :  { %4499 = vmatpush1.bf16.msra.mxu1 %v9913_v12 }
 0xfac   :  { %4500 = vmatprep.subr.bf16.mxu1 %v9919_v13 }
 0xfaf   :  { %4501 = vmatpush1.bf16.msra.mxu1 %v9925_v29 }
 0xfb0   :  { %4568 = vmatprep.subr.bf16.mxu1 %v10059_v18  ;;  %v11233_v18 = vld [vmem:[#allocation42_spill] sm:$0xff] }
0x1042   :  { %v4152_v26 = vpop.f32.mrf.mxu1 }
0x1043   :  { %v4159_v27 = vadd.f32 %v4152_v26, %v10274_v0 }
0x1044   :  { %v4154_v20 = vpop.f32.mrf.mxu1 }
0x1045   :  { %v4160_v30 = vadd.f32 %v4154_v20, %v10277_v15  ;;  %v4791_v20 = vld [vmem:[%s11129_s19 + $0xc0] sm:$0xff] }
0x1046   :  { %v4156_v31 = vpop.f32.mrf.mxu1 }
0x1047   :  { %v4790_v31 = vld [vmem:[%s11129_s19 + $0xb8] sm:$0xff] }
0x1048   :  { %v4157_v49 = vpop.f32.mrf.mxu1 }
0x104a   :  { %v4338_v50 = vpop.f32.mrf.mxu0  ;;  %v4397_v51 = vpop.f32.mrf.mxu1 }
0x104b   :  { %v10331_v52 = vadd.f32 %v4338_v50, %v4159_v27  ;;  %v4403_v56 = vpack.c.bf16 %v4397_v51, %v4397_v51  ;;  %v4792_v27 = vld [vmem:[%s11129_s19 + $0xc8] sm:$0xff]  ;;  %v4789_v50 = vld [vmem:[%s11129_s19 + $0xb0] sm:$0xff] }
0x104c   :  { %v4340_v57 = vpop.f32.mrf.mxu0  ;;  %v7869_v58 = vpop.f32.mrf.mxu1 }
0x104d   :  { %v10333_v60 = vadd.f32 %v4340_v57, %v4160_v30  ;;  %4519 = vmatmul.mubr.bf16.vlgmr.msra.gmra.mxu1 %v4403_v56  ;;  %v4788_v56 = vld [vmem:[%s11129_s19 + $0xa8] sm:$0xff]  ;;  %v4787_v57 = vld [vmem:[%s11129_s19 + $0xa0] sm:$0xff] }
0x104e   :  { %v4400_v12 = vpop.f32.mrf.mxu1  ;;  %v4342_v13 = vpop.f32.mrf.mxu0  ;;  %4569 = vmatpush1.bf16.msra.mxu1 %v10065_v32  ;;  %4600 = vmatprep.mubr.bf16.mxu1 %v11219_v1  ;;  %v11234_v32 = vld [vmem:[#allocation43_spill] sm:$0xff] }
0x104f   :  { %4570 = vmatprep.subr.bf16.mxu1 %v10070_v34  ;;  %v11235_v34 = vld [vmem:[#allocation47_spill] sm:$0xff]  ;;  %v4786_v12 = vld [vmem:[%s11129_s19 + $0x98] sm:$0xff]  ;;  %v4785_v13 = vld [vmem:[%s11129_s19 + $0x90] sm:$0xff] }
0x1050   :  { %v7870_v0 = vpop.f32.mrf.mxu1  ;;  %v4343_v29 = vpop.f32.mrf.mxu0 }
0x1051   :  { %v4784_v29 = vld [vmem:[%s11129_s19 + $0x88] sm:$0xff] }
0x1052   :  { %v4438_v28 = vpop.f32.mrf.mxu1  ;;  %4571 = vmatpush1.bf16.msra.mxu1 %v10076_v53  ;;  %v11236_v53 = vld [vmem:[#allocation46_spill] sm:$0xff] }
0x1053   :  { %v4444_v37 = vpack.c.bf16 %v4438_v28, %v4438_v28  ;;  %4572 = vmatprep.subr.bf16.mxu1 %v10083_v62  ;;  %v11237_v62 = vld [vmem:[#allocation48_spill] sm:$0xff]  ;;  %v4783_v28 = vld [vmem:[%s11129_s19 + $0x80] sm:$0xff] }
0x1054   :  { %v7875_v38 = vpop.f32.mrf.mxu1 }
0x1055   :  { %4478 = vmatmul.mubr.bf16.vlgmr.msra.gmra.mxu0 %v4444_v37  ;;  %v4782_v37 = vld [vmem:[%s11129_s19 + $0x78] sm:$0xff]  ;;  %v4781_v38 = vld [vmem:[%s11129_s19 + $0x70] sm:$0xff] }
0x1056   :  { %7878 = vmatpush3.bf16.msra.mxu0 %v10281_v19  ;;  %v4441_v39 = vpop.f32.mrf.mxu1  ;;  %7879 = vmatprep.mubr.msk.bf16.mxu0 %vm8477_vm0, %v11214_v2 }
0x1057   :  { %7883 = vmatprep.subr.bf16.mxu0 %v11214_v2  ;;  %4573 = vmatpush1.bf16.msra.mxu1 %v10089_v5  ;;  %v11238_v5 = vld [vmem:[#allocation49_spill] sm:$0xff]  ;;  %v4780_v39 = vld [vmem:[%s11129_s19 + $0x68] sm:$0xff] }
0x1058   :  { %v7876_v40 = vpop.f32.mrf.mxu1  ;;  %4574 = vmatprep.subr.bf16.mxu1 %v10095_v6  ;;  %v11239_v6 = vld [vmem:[#allocation51_spill] sm:$0xff] }
0x1059   :  { %v4779_v40 = vld [vmem:[%s11129_s19 + $0x60] sm:$0xff] }
0x105b   :  { %4575 = vmatpush1.bf16.msra.mxu1 %v10105_v21  ;;  %v11240_v21 = vld [vmem:[#allocation50_spill] sm:$0xff] }
0x105c   :  { %4576 = vmatprep.subr.bf16.mxu1 %v10154_v36 }
0x105d   :  { %7880 = vmatmul.mubr.msk.bf16.vlgmr.msra.gmra.mxu0 %vm3605_vm13, %v10111_v24  ;;  %v4798_v24 = vld [vmem:[%s11129_s19 + $0xf8] sm:$0xff] }
0x105e   :  { %7884 = vmatpush3.bf16.msra.mxu0 %v10281_v19  ;;  %7885 = vmatprep.mubr.msk.bf16.mxu0 %vm8477_vm0, %v11214_v2  ;;  %v11230_v2 = vld [vmem:[#allocation35_spill] sm:$0xff]  ;;  %vm4697_vm0 = vcmask 1042432  }
0x105f   :  { %4652 = vmatprep.subr.bf16.mxu0 %v10116_v25  ;;  %4577 = vmatpush1.bf16.msra.mxu1 %v10159_v55 }
0x1060   :  { %4578 = vmatprep.subr.bf16.mxu1 %v10178_v61 }
0x1063   :  { %4579 = vmatpush1.bf16.msra.mxu1 %v11220_v41  ;;  %v4778_v41 = vld [vmem:[%s11129_s19 + $0x58] sm:$0xff] }
0x1064   :  { %4580 = vmatprep.subr.bf16.mxu1 %v11221_v42  ;;  %v4777_v42 = vld [vmem:[%s11129_s19 + $0x50] sm:$0xff] }
0x1065   :  { %7886 = vmatmul.mubr.msk.bf16.vlgmr.msra.gmra.mxu0 %vm3605_vm13, %v11222_v59  ;;  %v4776_v59 = vld [vmem:[%s11129_s19 + $0x48] sm:$0xff] }
0x1066   :  { %4653 = vmatpush1.bf16.msra.mxu0 %v11223_v43  ;;  %4684 = vmatprep.mubr.bf16.mxu0 %v11219_v1  ;;  %v4775_v43 = vld [vmem:[%s11129_s19 + $0x40] sm:$0xff] }
0x1067   :  { %4654 = vmatprep.subr.bf16.mxu0 %v11224_v44  ;;  %4581 = vmatpush1.bf16.msra.mxu1 %v11225_v45  ;;  %v4774_v44 = vld [vmem:[%s11129_s19 + $0x38] sm:$0xff]  ;;  %v4773_v45 = vld [vmem:[%s11129_s19 + $0x30] sm:$0xff] }
0x1068   :  { %4582 = vmatprep.subr.bf16.mxu1 %v11226_v46  ;;  %v4772_v46 = vld [vmem:[%s11129_s19 + $0x28] sm:$0xff] }
0x106a   :  { %4655 = vmatpush1.bf16.msra.mxu0 %v11227_v47  ;;  %v4771_v47 = vld [vmem:[%s11129_s19 + $0x20] sm:$0xff] }
0x106b   :  { %4656 = vmatprep.subr.bf16.mxu0 %v11228_v48  ;;  %4583 = vmatpush1.bf16.msra.mxu1 %v11229_v63  ;;  %v4770_v48 = vld [vmem:[%s11129_s19 + $0x18] sm:$0xff]  ;;  %v4769_v63 = vld [vmem:[%s11129_s19 + $0x10] sm:$0xff] }
0x106c   :  { %4819 = vmatprep.subr.mxu1 %v4798_v24 }
0x106e   :  { %4657 = vmatpush1.bf16.msra.mxu0 %v11230_v2  ;;  %v4768_v2 = vld [vmem:[%s11129_s19 + $0x8] sm:$0xff] }
0x106f   :  { %4658 = vmatprep.subr.bf16.mxu0 %v11231_v14  ;;  %v4767_v14 = vld [vmem:[%s11129_s19] sm:$0xff] }
0x1072   :  { %4659 = vmatpush1.bf16.msra.mxu0 %v11232_v17  ;;  %v4814_v17 = vld [vmem:[%s11129_s19 + $0x178] sm:$0xff] }
0x1073   :  { %4660 = vmatprep.subr.bf16.mxu0 %v11233_v18  ;;  %v4813_v18 = vld [vmem:[%s11129_s19 + $0x170] sm:$0xff] }
0x1076   :  { %4661 = vmatpush1.bf16.msra.mxu0 %v11234_v32  ;;  %v4812_v32 = vld [vmem:[%s11129_s19 + $0x168] sm:$0xff] }
0x1077   :  { %4662 = vmatprep.subr.bf16.mxu0 %v11235_v34  ;;  %v4811_v34 = vld [vmem:[%s11129_s19 + $0x160] sm:$0xff] }
0x107a   :  { %4663 = vmatpush1.bf16.msra.mxu0 %v11236_v53  ;;  %v4810_v53 = vld [vmem:[%s11129_s19 + $0x158] sm:$0xff] }
0x107b   :  { %4664 = vmatprep.subr.bf16.mxu0 %v11237_v62  ;;  %v4809_v62 = vld [vmem:[%s11129_s19 + $0x150] sm:$0xff] }
0x107e   :  { %4665 = vmatpush1.bf16.msra.mxu0 %v11238_v5  ;;  %v4808_v5 = vld [vmem:[%s11129_s19 + $0x148] sm:$0xff] }
0x107f   :  { %4666 = vmatprep.subr.bf16.mxu0 %v11239_v6  ;;  %v4807_v6 = vld [vmem:[%s11129_s19 + $0x140] sm:$0xff] }
0x1082   :  { %4667 = vmatpush1.bf16.msra.mxu0 %v11240_v21  ;;  %v4806_v21 = vld [vmem:[%s11129_s19 + $0x138] sm:$0xff] }
0x1083   :  { %4895 = vmatprep.subr.mxu0 %v4798_v24  ;;  %v4805_v24 = vld [vmem:[%s11129_s19 + $0x130] sm:$0xff] }
0x110d   :  { %v4520_v25 = vpop.f32.mrf.mxu1 }
0x110f   :  { %v4522_v15 = vpop.f32.mrf.mxu1 }
0x1111   :  { %v4524_v36 = vpop.f32.mrf.mxu1 }
0x1112   :  { %v4802_v36 = vld [vmem:[%s11129_s19 + $0x118] sm:$0xff] }
0x1113   :  { %v4525_v55 = vpop.f32.mrf.mxu1 }
0x1114   :  { %v4801_v55 = vld [vmem:[%s11129_s19 + $0x110] sm:$0xff] }
0x1115   :  { %v4479_v61 = vpop.f32.mrf.mxu0 }
0x1116   :  { %v10382_v3 = vadd.f32 %v4520_v25, %v4479_v61  ;;  %v4804_v25 = vld [vmem:[%s11129_s19 + $0x128] sm:$0xff] }
0x1117   :  { %v4481_v4 = vpop.f32.mrf.mxu0  ;;  %v4800_v61 = vld [vmem:[%s11129_s19 + $0x108] sm:$0xff] }
0x1118   :  { %v10384_v7 = vadd.f32 %v4522_v15, %v4481_v4  ;;  %v4803_v15 = vld [vmem:[%s11129_s19 + $0x120] sm:$0xff] }
0x1119   :  { %v4483_v8 = vpop.f32.mrf.mxu0  ;;  %v4799_v4 = vld [vmem:[%s11129_s19 + $0x100] sm:$0xff] }
0x111a   :  { %v11241_v8 = vld [vmem:[#allocation29_spill] sm:$0xff] }
0x111b   :  { %v4484_v23 = vpop.f32.mrf.mxu0 }
0x111c   :  { %v10529_v23 = vsub.s32 1, %v11241_v8 }
0x111d   :  { %v4561_v22 = vpop.f32.mrf.mxu0 }
0x111e   :  { %v4567_v19 = vpack.c.bf16 %v4561_v22, %v4561_v22  ;;  %v3603_v22 = vld [vmem:[%s11128_s18] sm:$0x3] }
0x111f   :  { %v7881_v11 = vpop.f32.mrf.mxu0 }
0x1120   :  { %4601 = vmatmul.mubr.bf16.vlgmr.msra.gmra.mxu1 %v4567_v19  ;;  %v4355_v19 = vrot.slane %v3603_v22, %v10529_v23 }
0x1121   :  { %v4564_v16 = vpop.f32.mrf.mxu0  ;;  %4820 = vmatpush1.msra.mxu1 %v4797_v33 }
0x1122   :  { %4821 = vmatprep.subr.mxu1 %v4796_v35 }
0x1123   :  { %v7882_v26 = vpop.f32.mrf.mxu0  ;;  %4822 = vmatpush1.msra.mxu1 %v4795_v10 }
0x1124   :  { %4823 = vmatprep.subr.mxu1 %v4794_v9 }
0x1125   :  { %v4645_v30 = vpop.f32.mrf.mxu0  ;;  %4824 = vmatpush1.msra.mxu1 %v4793_v54 }
0x1126   :  { %v4651_v49 = vpack.c.bf16 %v4645_v30, %v4645_v30  ;;  %4825 = vmatprep.subr.mxu1 %v4792_v27 }
0x1127   :  { %v7887_v51 = vpop.f32.mrf.mxu0  ;;  %4826 = vmatpush1.msra.mxu1 %v4791_v20 }
0x1128   :  { %4685 = vmatmul.mubr.bf16.vlgmr.msra.gmra.mxu0 %v4651_v49  ;;  %4827 = vmatprep.subr.mxu1 %v4790_v31 }
0x1129   :  { %v4648_v58 = vpop.f32.mrf.mxu0  ;;  %4896 = vmatpush1.msra.mxu0 %v4797_v33  ;;  %4828 = vmatpush1.msra.mxu1 %v4789_v50  ;;  %v11242_v33 = vld [vmem:[#allocation30_spill] sm:$0xff] }
0x112a   :  { %4897 = vmatprep.subr.mxu0 %v4796_v35  ;;  %4829 = vmatprep.subr.mxu1 %v4788_v56  ;;  %v4351_v11 = vrot.slane %v3603_v22, %v11242_v33  ;;  %v10537_v35 = vadd.f32 %v4355_v19, %v10333_v60 }
0x112b   :  { %v7888_v0 = vpop.f32.mrf.mxu0  ;;  %4898 = vmatpush1.msra.mxu0 %v4795_v10  ;;  %4830 = vmatpush1.msra.mxu1 %v4787_v57 }
0x112c   :  { %4899 = vmatprep.subr.mxu0 %v4794_v9  ;;  %4831 = vmatprep.subr.mxu1 %v4786_v12  ;;  %v10540_v10 = vadd.f32 %v4351_v11, %v10331_v52  ;;  %v4716_v16 = vmul.f32 %v10537_v35, %v10537_v35  ;;  %v4706_v26 = vsel %vm4705_vm15, %v10537_v35, 0.0 }
0x112d   :  { %4900 = vmatpush1.msra.mxu0 %v4793_v54  ;;  %4832 = vmatpush1.msra.mxu1 %v4785_v13 }
0x112e   :  { %4901 = vmatprep.subr.mxu0 %v4792_v27  ;;  %4833 = vmatprep.subr.mxu1 %v4784_v29  ;;  %v4715_v54 = vmul.f32 %v10540_v10, %v10540_v10  ;;  %v4698_v60 = vsel %vm4697_vm0, %v10540_v10, 0.0 }
0x112f   :  { %4902 = vmatpush1.msra.mxu0 %v4791_v20  ;;  %4834 = vmatpush1.msra.mxu1 %v4783_v28  ;;  %v4724_v20 = vsel %vm4705_vm15, %v4716_v16, 0.0  ;;  %v4699_v49 = vrot.slane %v4698_v60, 4 }
0x1130   :  { %4903 = vmatprep.subr.mxu0 %v4790_v31  ;;  %4835 = vmatprep.subr.mxu1 %v4782_v37  ;;  %v4717_v30 = vsel %vm4697_vm0, %v4715_v54, 0.0  ;;  %v4707_v31 = vrot.slane %v4706_v26, 4  ;;  %v4725_v51 = vrot.slane %v4724_v20, 4 }
0x1131   :  { %4904 = vmatpush1.msra.mxu0 %v4789_v50  ;;  %4836 = vmatpush1.msra.mxu1 %v4781_v38 }
0x1132   :  { %4905 = vmatprep.subr.mxu0 %v4788_v56  ;;  %4837 = vmatprep.subr.mxu1 %v4780_v39 }
0x1133   :  { %4906 = vmatpush1.msra.mxu0 %v4787_v57  ;;  %4838 = vmatpush1.msra.mxu1 %v4779_v40  ;;  %v4718_v57 = vrot.slane %v4717_v30, 4 }
0x1134   :  { %4907 = vmatprep.subr.mxu0 %v4786_v12  ;;  %4839 = vmatprep.subr.mxu1 %v4778_v41  ;;  %v4708_v12 = vadd.f32 %v4707_v31, %v4706_v26 }
0x1135   :  { %4908 = vmatpush1.msra.mxu0 %v4785_v13  ;;  %4840 = vmatpush1.msra.mxu1 %v4777_v42 }
0x1136   :  { %4909 = vmatprep.subr.mxu0 %v4784_v29  ;;  %4841 = vmatprep.subr.mxu1 %v4776_v59  ;;  %v4700_v29 = vadd.f32 %v4699_v49, %v4698_v60 }
0x1137   :  { %4910 = vmatpush1.msra.mxu0 %v4783_v28  ;;  %4842 = vmatpush1.msra.mxu1 %v4775_v43 }
0x1138   :  { %4911 = vmatprep.subr.mxu0 %v4782_v37  ;;  %4843 = vmatprep.subr.mxu1 %v4774_v44  ;;  %v4726_v37 = vadd.f32 %v4725_v51, %v4724_v20 }
0x1139   :  { %4912 = vmatpush1.msra.mxu0 %v4781_v38  ;;  %4844 = vmatpush1.msra.mxu1 %v4773_v45 }
0x113a   :  { %4913 = vmatprep.subr.mxu0 %v4780_v39  ;;  %4845 = vmatprep.subr.mxu1 %v4772_v46 }
0x113b   :  { %4914 = vmatpush1.msra.mxu0 %v4779_v40  ;;  %4846 = vmatpush1.msra.mxu1 %v4771_v47  ;;  %v4719_v40 = vadd.f32 %v4718_v57, %v4717_v30 }
0x113c   :  { %4915 = vmatprep.subr.mxu0 %v4778_v41  ;;  %4847 = vmatprep.subr.mxu1 %v4770_v48 }
0x113d   :  { %4916 = vmatpush1.msra.mxu0 %v4777_v42  ;;  %4848 = vmatpush1.msra.mxu1 %v4769_v63  ;;  %v4709_v42 = vrot.slane %v4708_v12, 2 }
0x113e   :  { %4917 = vmatprep.subr.mxu0 %v4776_v59  ;;  %4849 = vmatprep.subr.mxu1 %v4768_v2 }
0x113f   :  { %4918 = vmatpush1.msra.mxu0 %v4775_v43  ;;  %4850 = vmatpush1.msra.mxu1 %v4767_v14 }
0x1140   :  { %4919 = vmatprep.subr.mxu0 %v4774_v44  ;;  %4867 = vmatprep.subr.mxu1 %v4814_v17  ;;  %v4701_v44 = vrot.slane %v4700_v29, 2 }
0x1141   :  { %4920 = vmatpush1.msra.mxu0 %v4773_v45  ;;  %4868 = vmatpush2.msra.mxu1 %v4813_v18 }
0x1142   :  { %4921 = vmatprep.subr.mxu0 %v4772_v46  ;;  %4869 = vmatprep.subr.mxu1 %v4812_v32  ;;  %v4727_v46 = vrot.slane %v4726_v37, 2 }
0x1143   :  { %4922 = vmatpush1.msra.mxu0 %v4771_v47  ;;  %4870 = vmatpush2.msra.mxu1 %v4811_v34 }
0x1144   :  { %4923 = vmatprep.subr.mxu0 %v4770_v48  ;;  %4871 = vmatprep.subr.mxu1 %v4810_v53 }
0x1145   :  { %4924 = vmatpush1.msra.mxu0 %v4769_v63  ;;  %4872 = vmatpush2.msra.mxu1 %v4809_v62 }
0x1146   :  { %4925 = vmatprep.subr.mxu0 %v4768_v2  ;;  %4873 = vmatprep.subr.mxu1 %v4808_v5 }
0x1147   :  { %4926 = vmatpush1.msra.mxu0 %v4767_v14  ;;  %4874 = vmatpush2.msra.mxu1 %v4807_v6 }
0x1148   :  { %4943 = vmatprep.subr.mxu0 %v4814_v17  ;;  %4875 = vmatprep.subr.mxu1 %v4806_v21 }
0x1149   :  { %4944 = vmatpush2.msra.mxu0 %v4813_v18  ;;  %4876 = vmatpush2.msra.mxu1 %v4805_v24  ;;  %v4720_v18 = vrot.slane %v4719_v40, 2 }
0x114a   :  { %4945 = vmatprep.subr.mxu0 %v4812_v32  ;;  %4877 = vmatprep.subr.mxu1 %v4804_v25  ;;  %v4710_v32 = vadd.f32 %v4709_v42, %v4708_v12  ;;  %v10608_v42 = vld [vmem:[%s11133_s23 + $0x10] sm:$0xff]  }
0x114b   :  { %4946 = vmatpush2.msra.mxu0 %v4811_v34  ;;  %4878 = vmatpush2.msra.mxu1 %v4803_v15 }
0x114c   :  { %4947 = vmatprep.subr.mxu0 %v4810_v53  ;;  %4879 = vmatprep.subr.mxu1 %v4802_v36 }
0x114d   :  { %4948 = vmatpush2.msra.mxu0 %v4809_v62  ;;  %4880 = vmatpush2.msra.mxu1 %v4801_v55 }
0x114e   :  { %4949 = vmatprep.subr.mxu0 %v4808_v5  ;;  %4881 = vmatprep.subr.mxu1 %v4800_v61 }
0x114f   :  { %4950 = vmatpush2.msra.mxu0 %v4807_v6  ;;  %4882 = vmatpush2.msra.mxu1 %v4799_v4 }
0x1150   :  { %4951 = vmatprep.subr.mxu0 %v4806_v21  ;;  %v4702_v21 = vadd.f32 %v4701_v44, %v4700_v29 }
0x1151   :  { %4952 = vmatpush2.msra.mxu0 %v4805_v24  ;;  %v4728_v24 = vadd.f32 %v4727_v46, %v4726_v37  ;;  %v10580_v37 = vld [vmem:[%s11133_s23 + $0x30] sm:$0xff]  }
0x1152   :  { %4953 = vmatprep.subr.mxu0 %v4804_v25 }
0x1153   :  { %4954 = vmatpush2.msra.mxu0 %v4803_v15 }
0x1154   :  { %4955 = vmatprep.subr.mxu0 %v4802_v36 }
0x1155   :  { %4956 = vmatpush2.msra.mxu0 %v4801_v55 }
0x1156   :  { %4957 = vmatprep.subr.mxu0 %v4800_v61  ;;  %v4721_v61 = vadd.f32 %v4720_v18, %v4719_v40  ;;  %v10594_v40 = vld [vmem:[%s11133_s23 + $0x20] sm:$0xff]  }
0x1157   :  { %4958 = vmatpush2.msra.mxu0 %v4799_v4  ;;  %v4711_v4 = vrot.slane %v4710_v32, 1 }
0x1158   :  { %5400 = vmatprep.subr.bf16.mxu0 %v11219_v1  ;;  %v4722_v20 = vrot.slane %v4721_v61, 1 }
0x1159   :  { %v4712_v30 = vadd.f32 %v4711_v4, %v4710_v32 }
0x11e0   :  { %v4602_v9 = vpop.f32.mrf.mxu1 }
0x11e1   :  { %v4609_v56 = vadd.f32 %v4602_v9, %v10382_v3  ;;  %v4703_v9 = vrot.slane %v4702_v21, 1 }
0x11e2   :  { %v4604_v27 = vpop.f32.mrf.mxu1 }
0x11e3   :  { %v4610_v13 = vadd.f32 %v4604_v27, %v10384_v7  ;;  %v4729_v27 = vrot.slane %v4728_v24, 1 }
0x11e4   :  { %v4606_v52 = vpop.f32.mrf.mxu1 }
0x11e5   :  { %v4730_v57 = vadd.f32 %v4729_v27, %v4728_v24  ;;  %v4990_v27 = vld [vmem:[%s11131_s21] sm:$0x3] }
0x11e6   :  { %v4607_v50 = vpop.f32.mrf.mxu1 }
0x11e7   :  { %v4704_v50 = vadd.f32 %v4703_v9, %v4702_v21  ;;  %v10646_v21 = vld [vmem:[%s11133_s23 + $0x48] sm:$0xff]  }
0x11e8   :  { %v4686_v58 = vpop.f32.mrf.mxu0 }
0x11e9   :  { %v4693_v0 = vadd.f32 %v4686_v58, %v4609_v56 }
0x11ea   :  { %v4688_v28 = vpop.f32.mrf.mxu0 }
0x11eb   :  { %v10554_v38 = vadd.f32 %v4693_v0, %v4351_v11  ;;  %v4694_v39 = vadd.f32 %v4688_v28, %v4610_v13  ;;  %v4723_v13 = vadd.f32 %v4722_v20, %v4721_v61  ;;  %v10574_v28 = vld [vmem:[%s11133_s23 + $0x38] sm:$0xff]  }
0x11ec   :  { %v4690_v41 = vpop.f32.mrf.mxu0 }
0x11ed   :  { %v4733_v59 = vsel %vm4697_vm0, %v10554_v38, 0.0  ;;  %v4749_v3 = vmul.f32 %v10554_v38, %v10554_v38  ;;  %v10560_v43 = vadd.f32 %v4694_v39, %v4355_v19  ;;  %v10587_v39 = vld [vmem:[%s11133_s23 + $0x28] sm:$0xff]   ;;  %v10601_v41 = vld [vmem:[%s11133_s23 + $0x18] sm:$0xff]  }
0x11ee   :  { %v4734_v7 = vrot.slane %v4733_v59, 4  ;;  %v4691_v45 = vpop.f32.mrf.mxu0 }
0x11ef   :  { %v4751_v47 = vsel %vm4697_vm0, %v4749_v3, 0.0  ;;  %v4740_v48 = vsel %vm4705_vm15, %v10560_v43, 0.0  ;;  %v4750_v63 = vmul.f32 %v10560_v43, %v10560_v43  ;;  %v10615_v3 = vld [vmem:[%s11133_s23 + $0x8] sm:$0xff]  }
0x11f0   :  { %v4735_v2 = vadd.f32 %v4734_v7, %v4733_v59  ;;  %v4752_v14 = vrot.slane %v4751_v47, 4  ;;  %v4741_v17 = vrot.slane %v4740_v48, 4 }
0x11f1   :  { %v4758_v34 = vsel %vm4705_vm15, %v4750_v63, 0.0 }
0x11f2   :  { %v4736_v53 = vrot.slane %v4735_v2, 2  ;;  %v4753_v62 = vadd.f32 %v4752_v14, %v4751_v47  ;;  %v4742_v5 = vadd.f32 %v4741_v17, %v4740_v48  ;;  %v4759_v6 = vrot.slane %v4758_v34, 4 }
0x11f4   :  { %v4737_v25 = vadd.f32 %v4736_v53, %v4735_v2  ;;  %v4754_v15 = vrot.slane %v4753_v62, 2  ;;  %v4743_v36 = vrot.slane %v4742_v5, 2  ;;  %v4760_v55 = vadd.f32 %v4759_v6, %v4758_v34  ;;  %v10622_v2 = vld [vmem:[%s11133_s23] sm:$0xff]   ;;  %v10629_v53 = vld [vmem:[%s11133_s23 + $0x58] sm:$0xff]  }
0x11f5   :  { %v4976_v6 = vld [vmem:[%s11130_s20] sm:$0x3] }
0x11f6   :  { %v4738_v22 = vrot.slane %v4737_v25, 1  ;;  %v4755_v19 = vadd.f32 %v4754_v15, %v4753_v62  ;;  %v4744_v11 = vadd.f32 %v4743_v36, %v4742_v5  ;;  %v4761_v16 = vrot.slane %v4760_v55, 2  ;;  %v10636_v5 = vld [vmem:[%s11133_s23 + $0x50] sm:$0xff]  }
0x11f7   :  { %v4981_v24 = vrot.slane %v4976_v6, %v11242_v33  ;;  %v4985_v36 = vrot.slane %v4976_v6, %v10529_v23  ;;  %v10703_v6 = vld [vmem:[%s11133_s23 + $0x90] sm:$0xff]  }
0x11f8   :  { %v4756_v54 = vrot.slane %v4755_v19, 1  ;;  %v4745_v26 = vrot.slane %v4744_v11, 1  ;;  %v4762_v60 = vadd.f32 %v4761_v16, %v4760_v55  ;;  %v4739_v52 = vadd.f32 %v4738_v22, %v4737_v25 }
0x11f9   :  { %v8479_v25 = vmov 1966171168  }
0x11fa   :  { %v4746_v31 = vadd.f32 %v4745_v26, %v4744_v11  ;;  %v4763_v49 = vrot.slane %v4762_v60, 1  ;;  %v4757_v51 = vadd.f32 %v4756_v54, %v4755_v19  ;;  %v4747_v12 = vadd.f32 %v4739_v52, %v4704_v50 }
0x11fb   :  { %v4997_v15 = vunpack.c.l.s4 %v8479_v25  ;;  %v10717_v25 = vld [vmem:[%s11133_s23 + $0x80] sm:$0xff]  }
0x11fc   :  { %v4748_v56 = vadd.f32 %v4746_v31, %v4712_v30  ;;  %v4764_v58 = vadd.f32 %v4763_v49, %v4762_v60  ;;  %v4765_v29 = vadd.f32 %v4757_v51, %v4723_v13 }
0x11fd   :  { %v4998_v4 = vunpack.c.0.s8 %v4997_v15  ;;  %v10724_v15 = vld [vmem:[%s11133_s23 + $0x78] sm:$0xff]  }
0x11fe   :  { %6561 = vmatprep.mubr.msk.f32.mxu1 %vm4815_vm1, %v4748_v56  ;;  %v4766_v0 = vadd.f32 %v4764_v58, %v4730_v57 }
0x11ff   :  { %4884 = vmatmul.mubr.f32.vlgmr.msra.gmra.mxu1 %v4747_v12  ;;  %v5001_v9 = vsub.s32 %v4998_v4, %v11241_v8  ;;  %v10752_v4 = vld [vmem:[%s11133_s23 + $0xb8] sm:$0xff]  }
0x1200   :  { %6562 = vmatprep.mubr.msk.f32.mxu0 %vm4815_vm1, %v4766_v0  ;;  %5102 = vmatprep.mubr.bf16.mxu1 %v11219_v1  ;;  %v8480_v0 = vmov 65535  }
0x1201   :  { %4960 = vmatmul.mubr.f32.vlgmr.msra.gmra.mxu0 %v4765_v29  ;;  %v5062_v29 = vsel %vm5061_vm2, 4294967295, %v8480_v0  ;;  %v10835_v0 = vld [vmem:[%s11133_s23 + $0xd0] sm:$0xff]  }
0x1202   :  { %5401 = vmatpush1.bf16.msra.mxu0 %v10574_v28 }
0x1203   :  { %5402 = vmatprep.subr.bf16.mxu0 %v11219_v1 }
0x1206   :  { %5403 = vmatpush1.bf16.msra.mxu0 %v10580_v37 }
0x1207   :  { %5404 = vmatprep.subr.bf16.mxu0 %v11219_v1 }
0x120a   :  { %5405 = vmatpush1.bf16.msra.mxu0 %v10587_v39 }
0x120b   :  { %5406 = vmatprep.subr.bf16.mxu0 %v11219_v1 }
0x120e   :  { %5407 = vmatpush1.bf16.msra.mxu0 %v10594_v40 }
0x120f   :  { %5408 = vmatprep.subr.bf16.mxu0 %v11219_v1 }
0x1212   :  { %5409 = vmatpush1.bf16.msra.mxu0 %v10601_v41 }
0x1213   :  { %5410 = vmatprep.subr.bf16.mxu0 %v11219_v1 }
0x1216   :  { %5411 = vmatpush1.bf16.msra.mxu0 %v10608_v42 }
0x1217   :  { %5412 = vmatprep.subr.bf16.mxu0 %v11219_v1 }
0x121a   :  { %5413 = vmatpush1.bf16.msra.mxu0 %v10615_v3 }
0x121b   :  { %5414 = vmatprep.subr.bf16.mxu0 %v11219_v1 }
0x121e   :  { %5415 = vmatpush1.bf16.msra.mxu0 %v10622_v2 }
0x121f   :  { %5424 = vmatprep.subr.bf16.mxu0 %v11219_v1 }
0x1222   :  { %5425 = vmatpush2.bf16.msra.mxu0 %v10629_v53 }
0x1223   :  { %5426 = vmatprep.subr.bf16.mxu0 %v11219_v1 }
0x1226   :  { %5427 = vmatpush2.bf16.msra.mxu0 %v10636_v5 }
0x1227   :  { %5428 = vmatprep.subr.bf16.mxu0 %v11219_v1 }
0x122a   :  { %5429 = vmatpush2.bf16.msra.mxu0 %v10646_v21 }
0x122b   :  { %5430 = vmatprep.subr.bf16.mxu0 %v11219_v1 }
0x12bf   :  { %v4885_v59 = vpop.f32.mrf.mxu1 }
0x12c0   :  { %v4890_v44 = vmul.f32 0.055555556, %v4885_v59 }
0x12c1   :  { %v4887_v7 = vpop.f32.mrf.mxu1  ;;  %v4961_v45 = vpop.f32.mrf.mxu0 }
0x12c2   :  { %v4968_v46 = vmul.f32 %v4890_v44, %v4890_v44  ;;  %v4891_v47 = vmul.f32 0.055555556, %v4887_v7  ;;  %v4966_v48 = vmul.f32 0.055555556, %v4961_v45 }
0x12c3   :  { %v4963_v63 = vpop.f32.mrf.mxu0 }
0x12c4   :  { %v4969_v14 = vmul.f32 %v4891_v47, %v4891_v47  ;;  %v4970_v17 = vsub.f32 %v4966_v48, %v4968_v46  ;;  %v4967_v18 = vmul.f32 0.055555556, %v4963_v63 }
0x12c6   :  { %v4972_v32 = vadd.f32 1e-05, %v4970_v17  ;;  %v4971_v34 = vsub.f32 %v4967_v18, %v4969_v14 }
0x12c8   :  { %8165 = vrsqrt.f32 %v4972_v32  ;;  %v4973_v62 = vadd.f32 1e-05, %v4971_v34  ;;  %v10679_v32 = vld [vmem:[%s11132_s22] sm:$0x1]  ;;  %v10690_v34 = vld [vmem:[%s11132_s22 + $0x1] sm:$0x1] }
0x12ca   :  { %8167 = vrsqrt.f32 %v4973_v62  ;;  %v10695_v62 = vld [vmem:[%s11133_s23 + $0x98] sm:$0xff]  }
0x12d5   :  { %v8166_v55 = vpop.eup %8165 }
0x12d6   :  { %v4988_v61 = vmul.f32 %v8166_v55, %v4981_v24  ;;  %v10710_v24 = vld [vmem:[%s11133_s23 + $0x88] sm:$0xff]  }
0x12d7   :  { %v8168_v22 = vpop.eup %8167  ;;  %v10738_v55 = vld [vmem:[%s11133_s23 + $0x68] sm:$0xff]  }
0x12d8   :  { %v4989_v19 = vmul.f32 %v8168_v22, %v4985_v36  ;;  %v4991_v11 = vmul.f32 %v4988_v61, %v4890_v44  ;;  %v5015_v60 = vrot.slane %v4988_v61, %v11242_v33  ;;  %v10731_v36 = vld [vmem:[%s11133_s23 + $0x70] sm:$0xff]   ;;  %v10745_v61 = vld [vmem:[%s11133_s23 + $0x60] sm:$0xff]  }
0x12d9   :  { %v10759_v22 = vld [vmem:[%s11133_s23 + $0xb0] sm:$0xff]  }
0x12da   :  { %v4992_v16 = vmul.f32 %v4989_v19, %v4891_v47  ;;  %v5019_v52 = vrot.slane %v4989_v19, %v11242_v33  ;;  %v5020_v31 = vmul.f32 %v5015_v60, %v10540_v10  ;;  %v5035_v49 = vmul.f32 %v5015_v60, %v10554_v38  ;;  %v10766_v19 = vld [vmem:[%s11133_s23 + $0xa8] sm:$0xff]  }
0x12dc   :  { %v4995_v54 = vcombine.low %v4991_v11, %v4992_v16  ;;  %v5021_v50 = vmul.f32 %v5019_v52, %v10537_v35  ;;  %v5036_v56 = vmul.f32 %v5019_v52, %v10560_v43  ;;  %v10773_v11 = vld [vmem:[%s11133_s23 + $0xa0] sm:$0xff]  }
0x12dd   :  { %v10781_v16 = vld [vmem:[%s11133_s23 + $0x40] sm:$0xff]  }
0x12de   :  { %v5002_v26 = vrot.slane %v4995_v54, %v5001_v9  ;;  %5431 = vmatpush2.bf16.msra.mxu0 %v10781_v16 }
0x12df   :  { %5588 = vmatprep.subr.bf16.mxu0 %v11219_v1 }
0x12e0   :  { %v5009_v20 = vrot.slane %v5002_v26, %v5001_v9 }
0x12e2   :  { %v5011_v30 = vsub.f32 %v4990_v27, %v5009_v20  ;;  %v10788_v27 = vld [vmem:[%s11133_s23 + $0xf8] sm:$0xff]  }
0x12e4   :  { %v5030_v8 = vrot.slane %v5011_v30, %v10529_v23  ;;  %v5026_v51 = vrot.slane %v5011_v30, %v11242_v33  ;;  %v5063_v23 = vsel %vm3609_vm12, %v5062_v29, 0  ;;  %v10795_v30 = vld [vmem:[%s11133_s23 + $0xf0] sm:$0xff]   ;;  %v10844_v29 = vld [vmem:[%s11133_s23 + $0xc8] sm:$0xff]  }
0x12e6   :  { %v5034_v57 = vadd.f32 %v5030_v8, %v5021_v50  ;;  %v5033_v58 = vadd.f32 %v5026_v51, %v5020_v31  ;;  %v5038_v12 = vadd.f32 %v5036_v56, %v5030_v8  ;;  %v5037_v13 = vadd.f32 %v5035_v49, %v5026_v51  ;;  %v10802_v8 = vld [vmem:[%s11133_s23 + $0xe8] sm:$0xff]  }
0x12e8   :  { %vm5040_vm3 = vcmp.gt.f32.partialorder %v5034_v57, 0.0  ;;  %v5042_v59 = vmul.f32 0.2, %v5034_v57  ;;  %vm5039_vm4 = vcmp.gt.f32.partialorder %v5033_v58, 0.0  ;;  %v5041_v10 = vmul.f32 0.2, %v5033_v58 }
0x12e9   :  { %vm5048_vm5 = vcmp.gt.f32.partialorder %v5038_v12, 0.0  ;;  %v5050_v38 = vmul.f32 0.2, %v5038_v12  ;;  %vm5047_vm6 = vcmp.gt.f32.partialorder %v5037_v13, 0.0  ;;  %v5049_v35 = vmul.f32 0.2, %v5037_v13 }
0x12ea   :  { %v5044_v44 = vsel %vm5040_vm3, %v5034_v57, %v5042_v59  ;;  %v5043_v33 = vsel %vm5039_vm4, %v5033_v58, %v5041_v10  ;;  %v10811_v58 = vld [vmem:[%s11133_s23 + $0xe0] sm:$0xff]   ;;  %v10854_v10 = vld [vmem:[%s11133_s23 + $0x158] sm:$0xff]  }
0x12eb   :  { %v5046_v7 = vpack.c.bf16 %v5044_v44, %v5044_v44  ;;  %v5045_v43 = vpack.c.bf16 %v5043_v33, %v5043_v33  ;;  %v5052_v45 = vsel %vm5048_vm5, %v5038_v12, %v5050_v38  ;;  %v5051_v46 = vsel %vm5047_vm6, %v5037_v13, %v5049_v35  ;;  %v10820_v12 = vld [vmem:[%s11132_s22 + $0x2] sm:$0x1]  ;;  %v10825_v13 = vld [vmem:[%s11133_s23 + $0xd8] sm:$0xff]   ;;  %v10849_v59 = vld [vmem:[%s11132_s22 + $0x3] sm:$0x1] }
0x12ec   :  { %v5054_v47 = vpack.c.bf16 %v5052_v45, %v5052_v45  ;;  %v5053_v48 = vpack.c.bf16 %v5051_v46, %v5051_v46  ;;  %v10863_v38 = vld [vmem:[%s11133_s23 + $0xc0] sm:$0xff]   ;;  %v10869_v35 = vld [vmem:[%s11133_s23 + $0x150] sm:$0xff]   ;;  %v10883_v44 = vld [vmem:[%s11133_s23 + $0x148] sm:$0xff]  }
0x12ed   :  { %v10666_v63 = vand.u32 %v5063_v23, %v5046_v7  ;;  %v10668_v14 = vand.u32 %v5063_v23, %v5045_v43  ;;  %v10891_v33 = vld [vmem:[%s11133_s23 + $0x110] sm:$0xff]   ;;  %v10897_v7 = vld [vmem:[%s11133_s23 + $0x140] sm:$0xff]   ;;  %v10905_v43 = vld [vmem:[%s11133_s23 + $0x108] sm:$0xff]  }
0x12ee   :  { %v10670_v17 = vand.u32 %v5063_v23, %v5054_v47  ;;  %v10672_v18 = vand.u32 %v5063_v23, %v5053_v48  ;;  %v10877_v23 = vld [vmem:[%s11133_s23 + $0x118] sm:$0xff]   ;;  %v10919_v46 = vld [vmem:[%s11133_s23 + $0x100] sm:$0xff]   ;;  %v10929_v47 = vld [vmem:[%s11133_s23 + $0x130] sm:$0xff]  }
0x12ef   :  { %5084 = vmatprep.subr.bf16.mxu1 %v10666_v63  ;;  %v10911_v45 = vld [vmem:[%s11133_s23 + $0x138] sm:$0xff]   ;;  %v10936_v48 = vld [vmem:[%s11133_s23 + $0x128] sm:$0xff]  }
0x12f0   :  { %5085 = vmatpush1.bf16.msra.mxu1 %v10668_v14  ;;  %11243 = vst [vmem:[#allocation37_spill] sm:$0xff] %v10936_v48 }
0x12f1   :  { %5156 = vmatprep.subr.bf16.mxu1 %v10666_v63 }
0x12f3   :  { %6563 = vmatmul.mubr.msk.bf16.vlgmr.msra.gmra.mxu1 %vm5057_vm7, %v10679_v32 }
0x12f4   :  { %5157 = vmatpush1.bf16.msra.mxu1 %v10668_v14  ;;  %5174 = vmatprep.mubr.bf16.mxu1 %v11219_v1 }
0x12f5   :  { %5285 = vmatprep.subr.bf16.mxu1 %v11219_v1 }
0x12fb   :  { %6565 = vmatmul.mubr.msk.bf16.vlgmr.msra.gmra.mxu1 %vm5057_vm7, %v10690_v34 }
0x12fc   :  { %5286 = vmatpush1.bf16.msra.mxu1 %v10695_v62 }
0x12fd   :  { %5287 = vmatprep.subr.bf16.mxu1 %v11219_v1 }
0x1300   :  { %5288 = vmatpush1.bf16.msra.mxu1 %v10703_v6 }
0x1301   :  { %5289 = vmatprep.subr.bf16.mxu1 %v11219_v1 }
0x1304   :  { %5290 = vmatpush1.bf16.msra.mxu1 %v10710_v24 }
0x1305   :  { %5291 = vmatprep.subr.bf16.mxu1 %v11219_v1 }
0x1308   :  { %5292 = vmatpush1.bf16.msra.mxu1 %v10717_v25 }
0x1309   :  { %5293 = vmatprep.subr.bf16.mxu1 %v11219_v1 }
0x130c   :  { %5294 = vmatpush1.bf16.msra.mxu1 %v10724_v15 }
0x130d   :  { %5295 = vmatprep.subr.bf16.mxu1 %v11219_v1 }
0x1310   :  { %5296 = vmatpush1.bf16.msra.mxu1 %v10731_v36 }
0x1311   :  { %5297 = vmatprep.subr.bf16.mxu1 %v11219_v1 }
0x1314   :  { %5298 = vmatpush1.bf16.msra.mxu1 %v10738_v55 }
0x1315   :  { %5299 = vmatprep.subr.bf16.mxu1 %v11219_v1 }
0x1318   :  { %5300 = vmatpush1.bf16.msra.mxu1 %v10745_v61 }
0x1319   :  { %5309 = vmatprep.subr.bf16.mxu1 %v11219_v1 }
0x131c   :  { %5310 = vmatpush2.bf16.msra.mxu1 %v10752_v4 }
0x131d   :  { %5311 = vmatprep.subr.bf16.mxu1 %v11219_v1 }
0x1320   :  { %5312 = vmatpush2.bf16.msra.mxu1 %v10759_v22 }
0x1321   :  { %5313 = vmatprep.subr.bf16.mxu1 %v11219_v1 }
0x1324   :  { %5314 = vmatpush2.bf16.msra.mxu1 %v10766_v19 }
0x1325   :  { %5315 = vmatprep.subr.bf16.mxu1 %v11219_v1 }
0x1328   :  { %5316 = vmatpush2.bf16.msra.mxu1 %v10773_v11 }
0x1329   :  { %5459 = vmatprep.subr.bf16.mxu1 %v10666_v63 }
0x13b3   :  { %v5104_v9 = vpop.f32.mrf.mxu1 }
0x13b4   :  { %v5111_v60 = vpack.c.bf16 %v5104_v9, %v5104_v9  ;;  %v10957_v9 = vld [vmem:[%s11133_s23 + $0x170] sm:$0xff]  }
0x13b5   :  { %v5106_v54 = vpop.f32.mrf.mxu1  ;;  %11246 = vst [vmem:[#allocation32_spill] sm:$0xff] %v10957_v9 }
0x13b6   :  { %v5112_v26 = vpack.c.bf16 %v5106_v54, %v5106_v54  ;;  %v10964_v54 = vld [vmem:[%s11133_s23 + $0x168] sm:$0xff]  }
0x13b7   :  { %v5108_v20 = vpop.f32.mrf.mxu1  ;;  %11247 = vst [vmem:[#allocation33_spill] sm:$0xff] %v10964_v54 }
0x13b8   :  { %6615 = vmatprep.mubr.msk.bf16.mxu0 %vm4815_vm1, %v5112_v26  ;;  %v10971_v26 = vld [vmem:[%s11133_s23 + $0x160] sm:$0xff]  }
0x13b9   :  { %v5109_v52 = vpop.f32.mrf.mxu1  ;;  %5433 = vmatmul.mubr.bf16.vlgmr.msra.gmra.mxu0 %v5111_v60  ;;  %11248 = vst [vmem:[#allocation41_spill] sm:$0xff] %v10971_v26 }
0x13ba   :  { %5589 = vmatpush1.bf16.msra.mxu0 %v10788_v27 }
0x13bb   :  { %v5176_v31 = vpop.f32.mrf.mxu1  ;;  %5590 = vmatprep.subr.bf16.mxu0 %v11219_v1 }
0x13bc   :  { %v5183_v51 = vpack.c.bf16 %v5176_v31, %v5176_v31 }
0x13bd   :  { %v5178_v49 = vpop.f32.mrf.mxu1 }
0x13be   :  { %v5184_v50 = vpack.c.bf16 %v5178_v49, %v5178_v49  ;;  %5591 = vmatpush1.bf16.msra.mxu0 %v10795_v30 }
0x13bf   :  { %v5180_v56 = vpop.f32.mrf.mxu1  ;;  %5592 = vmatprep.subr.bf16.mxu0 %v11219_v1 }
0x13c0   :  { %6602 = vmatprep.mubr.msk.bf16.mxu1 %vm4815_vm1, %v5184_v50 }
0x13c1   :  { %v5181_v57 = vpop.f32.mrf.mxu1  ;;  %5318 = vmatmul.mubr.bf16.vlgmr.msra.gmra.mxu1 %v5183_v51 }
0x13c2   :  { %5460 = vmatpush1.bf16.msra.mxu1 %v10668_v14  ;;  %5593 = vmatpush1.bf16.msra.mxu0 %v10802_v8 }
0x13c3   :  { %5648 = vmatprep.subr.bf16.mxu1 %v10666_v63  ;;  %5594 = vmatprep.subr.bf16.mxu0 %v11219_v1  ;;  %v10943_v63 = vld [vmem:[%s11133_s23 + $0x120] sm:$0xff]  }
0x13c4   :  { %5477 = vmatprep.mubr.bf16.mxu1 %v11219_v1  ;;  %11244 = vst [vmem:[#allocation40_spill] sm:$0xff] %v10943_v63 }
0x13c6   :  { %5595 = vmatpush1.bf16.msra.mxu0 %v10811_v58 }
0x13c7   :  { %5596 = vmatprep.subr.bf16.mxu0 %v11219_v1 }
0x13c9   :  { %6617 = vmatmul.mubr.msk.bf16.vlgmr.msra.gmra.mxu1 %vm5057_vm7, %v10820_v12 }
0x13ca   :  { %5597 = vmatpush1.bf16.msra.mxu0 %v10825_v13  ;;  %5649 = vmatpush1.bf16.msra.mxu1 %v10668_v14  ;;  %v10950_v14 = vld [vmem:[%s11133_s23 + $0x178] sm:$0xff]  }
0x13cb   :  { %5598 = vmatprep.subr.bf16.mxu0 %v11219_v1  ;;  %5666 = vmatprep.mubr.bf16.mxu1 %v11219_v1  ;;  %11245 = vst [vmem:[#allocation31_spill] sm:$0xff] %v10950_v14 }
0x13cc   :  { %5777 = vmatprep.subr.bf16.mxu1 %v11219_v1 }
0x13ce   :  { %5599 = vmatpush1.bf16.msra.mxu0 %v10835_v0 }
0x13cf   :  { %5600 = vmatprep.subr.bf16.mxu0 %v11219_v1 }
0x13d1   :  { %6656 = vmatmul.mubr.msk.bf16.vlgmr.msra.gmra.mxu1 %vm5057_vm7, %v10849_v59 }
0x13d2   :  { %5601 = vmatpush1.bf16.msra.mxu0 %v10844_v29  ;;  %5778 = vmatpush1.bf16.msra.mxu1 %v10854_v10 }
0x13d3   :  { %5602 = vmatprep.subr.bf16.mxu0 %v11219_v1  ;;  %5779 = vmatprep.subr.bf16.mxu1 %v11219_v1 }
0x13d6   :  { %5603 = vmatpush1.bf16.msra.mxu0 %v10863_v38  ;;  %5780 = vmatpush1.bf16.msra.mxu1 %v10869_v35 }
0x13d7   :  { %5612 = vmatprep.subr.bf16.mxu0 %v11219_v1  ;;  %5781 = vmatprep.subr.bf16.mxu1 %v11219_v1 }
0x13da   :  { %5613 = vmatpush2.bf16.msra.mxu0 %v10877_v23  ;;  %5782 = vmatpush1.bf16.msra.mxu1 %v10883_v44 }
0x13db   :  { %5614 = vmatprep.subr.bf16.mxu0 %v11219_v1  ;;  %5783 = vmatprep.subr.bf16.mxu1 %v11219_v1 }
0x13de   :  { %5615 = vmatpush2.bf16.msra.mxu0 %v10891_v33  ;;  %5784 = vmatpush1.bf16.msra.mxu1 %v10897_v7 }
0x13df   :  { %5616 = vmatprep.subr.bf16.mxu0 %v11219_v1  ;;  %5785 = vmatprep.subr.bf16.mxu1 %v11219_v1 }
0x13e2   :  { %5617 = vmatpush2.bf16.msra.mxu0 %v10905_v43  ;;  %5786 = vmatpush1.bf16.msra.mxu1 %v10911_v45 }
0x13e3   :  { %5618 = vmatprep.subr.bf16.mxu0 %v11219_v1  ;;  %5787 = vmatprep.subr.bf16.mxu1 %v11219_v1 }
0x13e6   :  { %5619 = vmatpush2.bf16.msra.mxu0 %v10919_v46  ;;  %5788 = vmatpush1.bf16.msra.mxu1 %v10929_v47 }
0x13e7   :  { %5845 = vmatprep.subr.bf16.mxu0 %v10670_v17  ;;  %5789 = vmatprep.subr.bf16.mxu1 %v11219_v1 }
0x13ea   :  { %5790 = vmatpush1.bf16.msra.mxu1 %v10936_v48 }
0x13eb   :  { %5791 = vmatprep.subr.bf16.mxu1 %v11219_v1 }
0x13ee   :  { %5792 = vmatpush1.bf16.msra.mxu1 %v10943_v63 }
0x13ef   :  { %5801 = vmatprep.subr.bf16.mxu1 %v11219_v1 }
0x13f2   :  { %5802 = vmatpush2.bf16.msra.mxu1 %v10950_v14 }
0x13f3   :  { %5803 = vmatprep.subr.bf16.mxu1 %v11219_v1 }
0x13f6   :  { %5804 = vmatpush2.bf16.msra.mxu1 %v10957_v9 }
0x13f7   :  { %5805 = vmatprep.subr.bf16.mxu1 %v11219_v1 }
0x13fa   :  { %5806 = vmatpush2.bf16.msra.mxu1 %v10964_v54 }
0x13fb   :  { %5807 = vmatprep.subr.bf16.mxu1 %v11219_v1 }
0x13fe   :  { %5808 = vmatpush2.bf16.msra.mxu1 %v10971_v26 }
0x13ff   :  { %5920 = vmatprep.subr.bf16.mxu1 %v11219_v1 }
0x1479   :  { %v5434_v60 = vpop.f32.mrf.mxu0 }
0x147b   :  { %v5436_v20 = vpop.f32.mrf.mxu0 }
0x147d   :  { %v5437_v52 = vpop.f32.mrf.mxu0 }
0x147f   :  { %v5438_v31 = vpop.f32.mrf.mxu0 }
0x1481   :  { %v5319_v49 = vpop.f32.mrf.mxu1 }
0x1482   :  { %v10975_v50 = vadd.f32 %v5434_v60, %v5319_v49 }
0x1483   :  { %v5321_v51 = vpop.f32.mrf.mxu1 }
0x1485   :  { %v5322_v56 = vpop.f32.mrf.mxu1 }
0x1487   :  { %v5323_v57 = vpop.f32.mrf.mxu1 }
0x1489   :  { %v5479_v54 = vpop.f32.mrf.mxu1 }
0x148a   :  { %v5486_v63 = vpack.c.bf16 %v5479_v54, %v5479_v54 }
0x148b   :  { %v5481_v9 = vpop.f32.mrf.mxu1 }
0x148c   :  { %v5487_v14 = vpack.c.bf16 %v5481_v9, %v5481_v9 }
0x148d   :  { %v5483_v48 = vpop.f32.mrf.mxu1 }
0x148e   :  { %6654 = vmatprep.mubr.msk.bf16.mxu0 %vm4815_vm1, %v5487_v14 }
0x148f   :  { %v5484_v26 = vpop.f32.mrf.mxu1  ;;  %5621 = vmatmul.mubr.bf16.vlgmr.msra.gmra.mxu0 %v5486_v63 }
0x1490   :  { %5846 = vmatpush1.bf16.msra.mxu0 %v10672_v18  ;;  %5863 = vmatprep.mubr.bf16.mxu0 %v11219_v1 }
0x1491   :  { %5888 = vmatprep.subr.bf16.mxu0 %v10670_v17  ;;  %v5668_v60 = vpop.f32.mrf.mxu1 }
0x1492   :  { %v5675_v20 = vpack.c.bf16 %v5668_v60, %v5668_v60 }
0x1493   :  { %v5670_v52 = vpop.f32.mrf.mxu1 }
0x1494   :  { %v5676_v31 = vpack.c.bf16 %v5670_v52, %v5670_v52 }
0x1495   :  { %v5672_v49 = vpop.f32.mrf.mxu1 }
0x1496   :  { %6693 = vmatprep.mubr.msk.bf16.mxu1 %vm4815_vm1, %v5676_v31 }
0x1497   :  { %5810 = vmatmul.mubr.bf16.vlgmr.msra.gmra.mxu1 %v5675_v20  ;;  %6695 = vmatmul.mubr.msk.bf16.vlgmr.msra.gmra.mxu0 %vm5057_vm7, %v10679_v32  ;;  %v5673_v48 = vpop.f32.mrf.mxu1 }
0x1498   :  { %5889 = vmatpush1.bf16.msra.mxu0 %v10672_v18  ;;  %5921 = vmatpush1.bf16.msra.mxu1 %v10695_v62 }
0x1499   :  { %5922 = vmatprep.subr.bf16.mxu1 %v11219_v1  ;;  %5906 = vmatprep.mubr.bf16.mxu0 %v11219_v1 }
0x149a   :  { %5963 = vmatprep.subr.bf16.mxu0 %v11219_v1 }
0x149c   :  { %5923 = vmatpush1.bf16.msra.mxu1 %v10703_v6 }
0x149d   :  { %5924 = vmatprep.subr.bf16.mxu1 %v11219_v1 }
0x149f   :  { %6696 = vmatmul.mubr.msk.bf16.vlgmr.msra.gmra.mxu0 %vm5057_vm7, %v10690_v34 }
0x14a0   :  { %5925 = vmatpush1.bf16.msra.mxu1 %v10710_v24  ;;  %5964 = vmatpush1.bf16.msra.mxu0 %v10574_v28 }
0x14a1   :  { %5926 = vmatprep.subr.bf16.mxu1 %v11219_v1  ;;  %5965 = vmatprep.subr.bf16.mxu0 %v11219_v1 }
0x14a4   :  { %5927 = vmatpush1.bf16.msra.mxu1 %v10717_v25  ;;  %5966 = vmatpush1.bf16.msra.mxu0 %v10580_v37 }
0x14a5   :  { %5928 = vmatprep.subr.bf16.mxu1 %v11219_v1  ;;  %5967 = vmatprep.subr.bf16.mxu0 %v11219_v1 }
0x14a8   :  { %5929 = vmatpush1.bf16.msra.mxu1 %v10724_v15  ;;  %5968 = vmatpush1.bf16.msra.mxu0 %v10587_v39 }
0x14a9   :  { %5930 = vmatprep.subr.bf16.mxu1 %v11219_v1  ;;  %5969 = vmatprep.subr.bf16.mxu0 %v11219_v1 }
0x14ac   :  { %5931 = vmatpush1.bf16.msra.mxu1 %v10731_v36  ;;  %5970 = vmatpush1.bf16.msra.mxu0 %v10594_v40 }
0x14ad   :  { %5932 = vmatprep.subr.bf16.mxu1 %v11219_v1  ;;  %5971 = vmatprep.subr.bf16.mxu0 %v11219_v1 }
0x14b0   :  { %5933 = vmatpush1.bf16.msra.mxu1 %v10738_v55  ;;  %5972 = vmatpush1.bf16.msra.mxu0 %v10601_v41 }
0x14b1   :  { %5934 = vmatprep.subr.bf16.mxu1 %v11219_v1  ;;  %5973 = vmatprep.subr.bf16.mxu0 %v11219_v1 }
0x14b4   :  { %5935 = vmatpush1.bf16.msra.mxu1 %v10745_v61  ;;  %5974 = vmatpush1.bf16.msra.mxu0 %v10608_v42  ;;  %v11038_v42 = vld [vmem:[#allocation21] ss:$0 sm:$0xff] }
0x14b5   :  { %5944 = vmatprep.subr.bf16.mxu1 %v11219_v1  ;;  %5975 = vmatprep.subr.bf16.mxu0 %v11219_v1 }
0x14b8   :  { %5945 = vmatpush2.bf16.msra.mxu1 %v10752_v4  ;;  %5976 = vmatpush1.bf16.msra.mxu0 %v10615_v3 }
0x14b9   :  { %5946 = vmatprep.subr.bf16.mxu1 %v11219_v1  ;;  %5977 = vmatprep.subr.bf16.mxu0 %v11219_v1 }
0x14bc   :  { %5947 = vmatpush2.bf16.msra.mxu1 %v10759_v22  ;;  %5978 = vmatpush1.bf16.msra.mxu0 %v10622_v2 }
0x14bd   :  { %5948 = vmatprep.subr.bf16.mxu1 %v11219_v1  ;;  %5987 = vmatprep.subr.bf16.mxu0 %v11219_v1 }
0x14c0   :  { %5949 = vmatpush2.bf16.msra.mxu1 %v10766_v19  ;;  %5988 = vmatpush2.bf16.msra.mxu0 %v10629_v53 }
0x14c1   :  { %5950 = vmatprep.subr.bf16.mxu1 %v11219_v1  ;;  %5989 = vmatprep.subr.bf16.mxu0 %v11219_v1 }
0x14c4   :  { %5951 = vmatpush2.bf16.msra.mxu1 %v10773_v11  ;;  %5990 = vmatpush2.bf16.msra.mxu0 %v10636_v5 }
0x14c5   :  { %6017 = vmatprep.subr.bf16.mxu1 %v10670_v17  ;;  %5991 = vmatprep.subr.bf16.mxu0 %v11219_v1 }
0x14c8   :  { %5992 = vmatpush2.bf16.msra.mxu0 %v10646_v21 }
0x14c9   :  { %5993 = vmatprep.subr.bf16.mxu0 %v11219_v1 }
0x14cc   :  { %5994 = vmatpush2.bf16.msra.mxu0 %v10781_v16 }
0x14cd   :  { %6049 = vmatprep.subr.bf16.mxu0 %v11219_v1 }
0x154f   :  { %v5622_v28 = vpop.f32.mrf.mxu0 }
0x1550   :  { %v5628_v41 = vadd.f32 %v5622_v28, %v10975_v50 }
0x1551   :  { %v5624_v37 = vpop.f32.mrf.mxu0 }
0x1553   :  { %v5625_v39 = vpop.f32.mrf.mxu0 }
0x1555   :  { %v5626_v40 = vpop.f32.mrf.mxu0 }
0x1557   :  { %v5811_v3 = vpop.f32.mrf.mxu1  ;;  %v5865_v2 = vpop.f32.mrf.mxu0 }
0x1558   :  { %v5817_v53 = vadd.f32 %v5811_v3, %v5628_v41  ;;  %v5872_v62 = vpack.c.bf16 %v5865_v2, %v5865_v2 }
0x1559   :  { %v5867_v5 = vpop.f32.mrf.mxu0  ;;  %v5813_v32 = vpop.f32.mrf.mxu1 }
0x155a   :  { %v5824_v21 = vadd.f32 %v11038_v42, %v5817_v53  ;;  %v5873_v34 = vpack.c.bf16 %v5867_v5, %v5867_v5 }
0x155b   :  { %v5869_v6 = vpop.f32.mrf.mxu0  ;;  %v5814_v24 = vpop.f32.mrf.mxu1 }
0x155c   :  { %v6703_v25 = vmul.f32 -1.442695, %v5824_v21  ;;  %6698 = vmatprep.mubr.msk.bf16.mxu0 %vm4815_vm1, %v5873_v34 }
0x155d   :  { %v5870_v15 = vpop.f32.mrf.mxu0  ;;  %5996 = vmatmul.mubr.bf16.vlgmr.msra.gmra.mxu0 %v5872_v62  ;;  %v5815_v36 = vpop.f32.mrf.mxu1 }
0x155e   :  { %8169 = vpow2.f32 %v6703_v25  ;;  %6050 = vmatpush1.bf16.msra.mxu0 %v10788_v27 }
0x155f   :  { %v5908_v55 = vpop.f32.mrf.mxu0  ;;  %6051 = vmatprep.subr.bf16.mxu0 %v11219_v1 }
0x1560   :  { %v5915_v22 = vpack.c.bf16 %v5908_v55, %v5908_v55 }
0x1561   :  { %v5910_v61 = vpop.f32.mrf.mxu0 }
0x1562   :  { %v5916_v4 = vpack.c.bf16 %v5910_v61, %v5910_v61  ;;  %6052 = vmatpush1.bf16.msra.mxu0 %v10795_v30  ;;  %v11250_v30 = vld [vmem:[#allocation40_spill] sm:$0xff] }
0x1563   :  { %v5912_v19 = vpop.f32.mrf.mxu0  ;;  %6053 = vmatprep.subr.bf16.mxu0 %v11219_v1 }
0x1564   :  { %6697 = vmatprep.mubr.msk.bf16.mxu1 %vm4815_vm1, %v5916_v4 }
0x1565   :  { %v5913_v11 = vpop.f32.mrf.mxu0  ;;  %5953 = vmatmul.mubr.bf16.vlgmr.msra.gmra.mxu1 %v5915_v22 }
0x1566   :  { %6018 = vmatpush1.bf16.msra.mxu1 %v10672_v18  ;;  %6035 = vmatprep.mubr.bf16.mxu1 %v11219_v1 }
0x1567   :  { %6104 = vmatprep.subr.bf16.mxu1 %v10670_v17  ;;  %6054 = vmatpush1.bf16.msra.mxu0 %v10802_v8  ;;  %v11251_v8 = vld [vmem:[#allocation31_spill] sm:$0xff] }
0x1568   :  { %6055 = vmatprep.subr.bf16.mxu0 %v11219_v1 }
0x156b   :  { %v8170_v16 = vpop.eup %8169  ;;  %6056 = vmatpush1.bf16.msra.mxu0 %v10811_v58  ;;  %v11252_v58 = vld [vmem:[#allocation32_spill] sm:$0xff] }
0x156c   :  { %v6181_v27 = vadd.f32 1.0, %v8170_v16  ;;  %6057 = vmatprep.subr.bf16.mxu0 %v11219_v1 }
0x156d   :  { %6699 = vmatmul.mubr.msk.bf16.vlgmr.msra.gmra.mxu1 %vm5057_vm7, %v10820_v12  ;;  %v11253_v12 = vld [vmem:[#allocation33_spill] sm:$0xff] }
0x156e   :  { %8171 = vrcp.f32 %v6181_v27  ;;  %6105 = vmatpush1.bf16.msra.mxu1 %v10672_v18  ;;  %6122 = vmatprep.mubr.bf16.mxu1 %v11219_v1  ;;  %v11249_v18 = vld [vmem:[#allocation37_spill] sm:$0xff] }
0x156f   :  { %6136 = vmatprep.subr.bf16.mxu1 %v11219_v1  ;;  %6058 = vmatpush1.bf16.msra.mxu0 %v10825_v13  ;;  %v11254_v13 = vld [vmem:[#allocation41_spill] sm:$0xff] }
0x1570   :  { %6059 = vmatprep.subr.bf16.mxu0 %v11219_v1 }
0x1573   :  { %6060 = vmatpush1.bf16.msra.mxu0 %v10835_v0 }
0x1574   :  { %6061 = vmatprep.subr.bf16.mxu0 %v11219_v1 }
0x1575   :  { %6701 = vmatmul.mubr.msk.bf16.vlgmr.msra.gmra.mxu1 %vm5057_vm7, %v10849_v59 }
0x1576   :  { %6137 = vmatpush1.bf16.msra.mxu1 %v10854_v10 }
0x1577   :  { %6138 = vmatprep.subr.bf16.mxu1 %v11219_v1  ;;  %6062 = vmatpush1.bf16.msra.mxu0 %v10844_v29 }
0x1578   :  { %6063 = vmatprep.subr.bf16.mxu0 %v11219_v1 }
0x157a   :  { %6139 = vmatpush1.bf16.msra.mxu1 %v10869_v35 }
0x157b   :  { %v8172_v17 = vpop.eup %8171  ;;  %6140 = vmatprep.subr.bf16.mxu1 %v11219_v1  ;;  %6064 = vmatpush1.bf16.msra.mxu0 %v10863_v38 }
0x157c   :  { %6185 = vst.msk [vmem:[%s11135_s25] sm:$0x3] %vm6184_vm8, %v8172_v17  ;;  %6073 = vmatprep.subr.bf16.mxu0 %v11219_v1 }
0x157e   :  { %6141 = vmatpush1.bf16.msra.mxu1 %v10883_v44 }
0x157f   :  { %6142 = vmatprep.subr.bf16.mxu1 %v11219_v1  ;;  %6074 = vmatpush2.bf16.msra.mxu0 %v10877_v23 }
0x1580   :  { %6075 = vmatprep.subr.bf16.mxu0 %v11219_v1 }
0x1582   :  { %6143 = vmatpush1.bf16.msra.mxu1 %v10897_v7 }
0x1583   :  { %6144 = vmatprep.subr.bf16.mxu1 %v11219_v1  ;;  %6076 = vmatpush2.bf16.msra.mxu0 %v10891_v33 }
0x1584   :  { %6077 = vmatprep.subr.bf16.mxu0 %v11219_v1 }
0x1586   :  { %6145 = vmatpush1.bf16.msra.mxu1 %v10911_v45 }
0x1587   :  { %6146 = vmatprep.subr.bf16.mxu1 %v11219_v1  ;;  %6078 = vmatpush2.bf16.msra.mxu0 %v10905_v43 }
0x1588   :  { %6079 = vmatprep.subr.bf16.mxu0 %v11219_v1 }
0x158a   :  { %6147 = vmatpush1.bf16.msra.mxu1 %v10929_v47 }
0x158b   :  { %6148 = vmatprep.subr.bf16.mxu1 %v11219_v1  ;;  %6080 = vmatpush2.bf16.msra.mxu0 %v10919_v46 }
0x158e   :  { %6149 = vmatpush1.bf16.msra.mxu1 %v11249_v18 }
0x158f   :  { %6150 = vmatprep.subr.bf16.mxu1 %v11219_v1 }
0x1592   :  { %6151 = vmatpush1.bf16.msra.mxu1 %v11250_v30 }
0x1593   :  { %6160 = vmatprep.subr.bf16.mxu1 %v11219_v1 }
0x1596   :  { %6161 = vmatpush2.bf16.msra.mxu1 %v11251_v8 }
0x1597   :  { %6162 = vmatprep.subr.bf16.mxu1 %v11219_v1 }
0x159a   :  { %6163 = vmatpush2.bf16.msra.mxu1 %v11252_v58 }
0x159b   :  { %6164 = vmatprep.subr.bf16.mxu1 %v11219_v1 }
0x159e   :  { %6165 = vmatpush2.bf16.msra.mxu1 %v11253_v12 }
0x159f   :  { %6166 = vmatprep.subr.bf16.mxu1 %v11219_v1 }
0x15a2   :  { %6167 = vmatpush2.bf16.msra.mxu1 %v11254_v13 }
0x161d   :  { %v5997_v0 = vpop.f32.mrf.mxu0 }
0x161f   :  { %v5999_v29 = vpop.f32.mrf.mxu0 }
0x1621   :  { %v6000_v59 = vpop.f32.mrf.mxu0 }
0x1623   :  { %v6001_v10 = vpop.f32.mrf.mxu0 }
0x1625   :  { %v5954_v38 = vpop.f32.mrf.mxu1 }
0x1626   :  { %v5998_v35 = vadd.f32 %v5997_v0, %v5954_v38 }
0x1627   :  { %v5956_v23 = vpop.f32.mrf.mxu1 }
0x1629   :  { %v5957_v44 = vpop.f32.mrf.mxu1 }
0x162b   :  { %v5958_v33 = vpop.f32.mrf.mxu1 }
0x162d   :  { %v6037_v7 = vpop.f32.mrf.mxu1 }
0x162e   :  { %v6044_v46 = vpack.c.bf16 %v6037_v7, %v6037_v7 }
0x162f   :  { %v6039_v43 = vpop.f32.mrf.mxu1 }
0x1630   :  { %v6045_v45 = vpack.c.bf16 %v6039_v43, %v6039_v43 }
0x1631   :  { %v6041_v47 = vpop.f32.mrf.mxu1 }
0x1632   :  { %6700 = vmatprep.mubr.msk.bf16.mxu0 %vm4815_vm1, %v6045_v45 }
0x1633   :  { %v6042_v63 = vpop.f32.mrf.mxu1  ;;  %6082 = vmatmul.mubr.bf16.vlgmr.msra.gmra.mxu0 %v6044_v46 }
0x1635   :  { %v6124_v1 = vpop.f32.mrf.mxu1 }
0x1636   :  { %v6131_v54 = vpack.c.bf16 %v6124_v1, %v6124_v1 }
0x1637   :  { %v6126_v14 = vpop.f32.mrf.mxu1 }
0x1638   :  { %v6132_v9 = vpack.c.bf16 %v6126_v14, %v6126_v14 }
0x1639   :  { %v6128_v26 = vpop.f32.mrf.mxu1 }
0x163a   :  { %6702 = vmatprep.mubr.msk.bf16.mxu1 %vm4815_vm1, %v6132_v9 }
0x163b   :  { %v6129_v50 = vpop.f32.mrf.mxu1  ;;  %6169 = vmatmul.mubr.bf16.vlgmr.msra.gmra.mxu1 %v6131_v54 }
0x16f3   :  { %v6083_v51 = vpop.f32.mrf.mxu0 }
0x16f4   :  { %v6089_v20 = vadd.f32 %v6083_v51, %v5998_v35 }
0x16f5   :  { %v6085_v56 = vpop.f32.mrf.mxu0 }
0x16f7   :  { %v6086_v57 = vpop.f32.mrf.mxu0 }
0x16f9   :  { %v6087_v60 = vpop.f32.mrf.mxu0 }
0x16fb   :  { %v6170_v52 = vpop.f32.mrf.mxu1 }
0x16fc   :  { %v6176_v31 = vadd.f32 %v6170_v52, %v6089_v20 }
0x16fd   :  { %v6172_v49 = vpop.f32.mrf.mxu1 }
0x16fe   :  { %v6177_v48 = vadd.f32 %v11038_v42, %v6176_v31 }
0x16ff   :  { %v6173_v28 = vpop.f32.mrf.mxu1 }
0x1700   :  { %v6704_v37 = vmul.f32 -1.442695, %v6177_v48 }
0x1701   :  { %v6174_v39 = vpop.f32.mrf.mxu1 }
0x1702   :  { %8173 = vpow2.f32 %v6704_v37 }
0x170f   :  { %v8174_v40 = vpop.eup %8173 }
0x1710   :  { %v6189_v41 = vadd.f32 1.0, %v8174_v40 }
0x1712   :  { %8175 = vrcp.f32 %v6189_v41 }
0x171f   :  { %v8176_v3 = vpop.eup %8175 }
0x1720   :  { %6192 = vst.msk [vmem:[%s11135_s25 + $0x2] sm:$0x3] %vm6184_vm8, %v8176_v3 }
0x1721   :  { %6197 = vsyncpa [#allocation3], 1 }
0x1722   :  { %6198 = vsyncpa [#allocation5], 1 }
0x1723   :  { %6199 = vsyncpa [#allocation8], 1 }
0x1724   :  { %6200 = vsyncpa [#allocation11], 1 }
0x1725   :  { %6201 = vsyncpa [#allocation14], 1 }
0x1726   :  { %6202 = vsyncpa [#allocation17], 1 }
0x1727   :  { %6203 = vsyncpa [#allocation20], 1 }

</bundles_post_ra>
